<compile_context>
chip_gen: v6e
topology: v6e:2x2x1
jax: 0.10.0
libtpu: 0.0.40
codegen_flags: <defaults>
</compile_context>

<pallas_src>
import functools
import math

import jax
import jax.numpy as jnp
from jax.experimental import pallas as pl
from jax.experimental.pallas import tpu as pltpu


# ----------------------------------------------------------------------------
# shared math helpers
# ----------------------------------------------------------------------------
def _gelu_tanh(x):
    # TODO(synk): torch nn.GELU() is the exact-erf variant; the tanh
    # approximation is used (kernel and reference) to guarantee Mosaic
    # lowering.  Max deviation from erf-GELU is ~1e-3 absolute.
    c = math.sqrt(2.0 / math.pi)
    return 0.5 * x * (1.0 + jnp.tanh(c * (x + 0.044715 * x * x * x)))


def _ln(x, g, b, eps=1e-6):
    """Plain LayerNorm over the last axis (reference path)."""
    mu = jnp.mean(x, axis=-1, keepdims=True)
    xc = x - mu
    var = jnp.mean(xc * xc, axis=-1, keepdims=True)
    return xc * jax.lax.rsqrt(var + eps) * g + b


def _ln_halves(x, g, b, C, mask_lo, eps=1e-6):
    """LayerNorm applied independently to x[:, :C] and x[:, C:2C].

    Uses masked lane reductions + blends so no cross-lane data movement is
    needed; rsqrt stays on the EUP slot.  g, b, mask_lo: (1, 2C)."""
    inv_c = 1.0 / C
    mask_hi = 1.0 - mask_lo
    s_lo = jnp.sum(x * mask_lo, axis=-1, keepdims=True)
    s_all = jnp.sum(x, axis=-1, keepdims=True)
    mu = (s_lo * mask_lo + (s_all - s_lo) * mask_hi) * inv_c
    xc = x - mu
    q = xc * xc
    q_lo = jnp.sum(q * mask_lo, axis=-1, keepdims=True)
    q_all = jnp.sum(q, axis=-1, keepdims=True)
    var = (q_lo * mask_lo + (q_all - q_lo) * mask_hi) * inv_c
    return xc * jax.lax.rsqrt(var + eps) * g + b


# ----------------------------------------------------------------------------
# parameter packing: branch fusion (block-diagonal), layer stacking, gamma fold
# ----------------------------------------------------------------------------
def _block_diag(a, b):
    ra, ca = a.shape
    rb, cb = b.shape
    out = jnp.zeros((ra + rb, ca + cb), a.dtype)
    return out.at[:ra, :ca].set(a).at[ra:, ca:].set(b)


def _pack_params(params, use_bf16):
    pm, pp = params['pre_mag'], params['pre_pha']
    K, F, C = pm['w'].shape
    H = params['blocks_mag'][0]['w1'].shape[1]
    L = len(params['blocks_mag'])
    wd = jnp.bfloat16 if use_bf16 else jnp.float32

    # conv_pre: per-tap block-diagonal weights (K, 2F, 2C), combined bias / LN
    wpre = jnp.zeros((K, 2 * F, 2 * C), jnp.float32)
    wpre = wpre.at[:, :F, :C].set(pm['w']).at[:, F:, C:].set(pp['w'])
    bpre = jnp.concatenate([pm['b'], pp['b']], axis=-1)
    gpre = jnp.concatenate([pm['ln_g'], pp['ln_g']], axis=-1)
    bepre = jnp.concatenate([pm['ln_b'], pp['ln_b']], axis=-1)

    # ConvNeXt layers: stacked over layers, branches fused along channels
    dww, dwb, lng, lnb, w1, b1, w2, b2 = [], [], [], [], [], [], [], []
    for bm, bp in zip(params['blocks_mag'], params['blocks_pha']):
        dww.append(jnp.concatenate([bm['dw_w'], bp['dw_w']], axis=-1)[:, None, :])
        dwb.append(jnp.concatenate([bm['dw_b'], bp['dw_b']], axis=-1))
        lng.append(jnp.concatenate([bm['ln_g'], bp['ln_g']], axis=-1))
        lnb.append(jnp.concatenate([bm['ln_b'], bp['ln_b']], axis=-1))
        w1.append(_block_diag(bm['w1'], bp['w1']))
        b1.append(jnp.concatenate([bm['b1'], bp['b1']], axis=-1))
        # layer-scale gamma folded into the second pointwise conv
        w2.append(_block_diag(bm['w2'] * bm['gamma'], bp['w2'] * bp['gamma']))
        b2.append(jnp.concatenate([bm['b2'] * bm['gamma'],
                                   bp['b2'] * bp['gamma']], axis=-1))
    dww = jnp.stack(dww).reshape(L * K, 1, 2 * C)    # flat layer*tap index
    dwb = jnp.stack(dwb)                              # (L, 1, 2C)
    lng = jnp.stack(lng)
    lnb = jnp.stack(lnb)
    w1 = jnp.stack(w1)                                # (L, 2C, 2H)
    b1 = jnp.stack(b1)                                # (L, 1, 2H)
    w2 = jnp.stack(w2)                                # (L, 2H, 2C)
    b2 = jnp.stack(b2)                                # (L, 1, 2C)

    # post: combined LN params + fused [mag | real | imag] head (2C, 3F)
    pmm, ppp = params['post_mag'], params['post_pha']
    gpost = jnp.concatenate([pmm['ln_g'], ppp['ln_g']], axis=-1)
    bepost = jnp.concatenate([pmm['ln_b'], ppp['ln_b']], axis=-1)
    wpost = jnp.zeros((2 * C, 3 * F), jnp.float32)
    wpost = wpost.at[:C, :F].set(pmm['w'])
    wpost = wpost.at[C:, F:2 * F].set(ppp['wr'])
    wpost = wpost.at[C:, 2 * F:].set(ppp['wi'])
    bpost = jnp.concatenate([pmm['b'], ppp['br'], ppp['bi']], axis=-1)

    # cross-branch mixing matrix: [xm | xp] @ mix = [xm+xp | xm+2xp] (exact)
    eye = jnp.eye(C, dtype=jnp.float32)
    mix = jnp.block([[eye, eye], [eye, 2.0 * eye]])

    ops = dict(wpre=wpre.astype(wd), bpre=bpre, gpre=gpre, bepre=bepre,
               dww=dww, dwb=dwb, lng=lng, lnb=lnb,
               w1=w1.astype(wd), b1=b1, w2=w2.astype(wd), b2=b2,
               gpost=gpost, bepost=bepost, wpost=wpost.astype(wd), bpost=bpost,
               mix=mix)
    dims = dict(K=K, F=F, C=C, H=H, L=L)
    return ops, dims


# ----------------------------------------------------------------------------
# the fused kernel
# ----------------------------------------------------------------------------
def _make_kernel(*, T, C, F, H, L, K, pad, front):
    TWO_C = 2 * C

    def kernel(xin_ref, wpre_ref, bpre_ref, gpre_ref, bepre_ref,
               dww_ref, dwb_ref, lng_ref, lnb_ref,
               w1_ref, b1_ref, w2_ref, b2_ref,
               gpost_ref, bepost_ref, wpost_ref, bpost_ref, mix_ref,
               o_ref, st_ref):
        mm_dtype = wpre_ref.dtype               # bf16 (v6e/v7x perf) or f32
        # hoisted constants (built once, reused by every layer)
        mask_lo = (jax.lax.broadcasted_iota(jnp.int32, (1, TWO_C), 1)
                   < C).astype(jnp.float32)
        mix = mix_ref[...]

        # ---- conv_pre (both branches): K block-diag tap matmuls + LayerNorm ----
        acc = jnp.zeros((T, TWO_C), jnp.float32) + bpre_ref[...]
        for k in range(K):
            win = xin_ref[0, pl.ds(k, T), :].astype(mm_dtype)   # shifted ref load
            acc = acc + jnp.dot(win, wpre_ref[k],
                                preferred_element_type=jnp.float32)
        x = _ln_halves(acc, gpre_ref[...], bepre_ref[...], C, mask_lo)

        # zero the depthwise-conv halo rows of the state scratch once
        st_ref[pl.ds(0, front), :] = jnp.zeros((front, TWO_C), jnp.float32)
        st_ref[pl.ds(front + T, front), :] = jnp.zeros((front, TWO_C), jnp.float32)

        # first block input: [xm+xp | xm+2xp] via the mixing matmul (exact)
        s = jnp.dot(x, mix, preferred_element_type=jnp.float32)
        st_ref[pl.ds(front, T), :] = s          # aligned interior store

        # ---- ConvNeXt stack (both branches fused), resident in VMEM ----
        for l in range(L):
            # depthwise conv: per-tap shifted ref loads (vld), VPU FMA on 64 lanes
            h = jnp.zeros((T, TWO_C), jnp.float32) + dwb_ref[l]
            for k in range(K):
                h = h + st_ref[pl.ds(front - pad + k, T), :] * dww_ref[l * K + k]
            h = _ln_halves(h, lng_ref[l], lnb_ref[l], C, mask_lo)
            a = jnp.dot(h.astype(mm_dtype), w1_ref[l],
                        preferred_element_type=jnp.float32) + b1_ref[l]
            a = _gelu_tanh(a)
            y = jnp.dot(a.astype(mm_dtype), w2_ref[l],
                        preferred_element_type=jnp.float32) + b2_ref[l]
            u = s + y                           # residual (gamma folded into w2/b2)
            if l + 1 < L:
                s = jnp.dot(u, mix, preferred_element_type=jnp.float32)
                st_ref[pl.ds(front, T), :] = s  # next layer's dwconv input
            else:
                s = u

        # ---- post: per-branch LayerNorm + fused [mag | real | imag] heads ----
        hp = _ln_halves(s, gpost_ref[...], bepost_ref[...], C, mask_lo)
        o_ref[0] = jnp.dot(hp.astype(mm_dtype), wpost_ref[...],
                           preferred_element_type=jnp.float32) + bpost_ref[...]

    return kernel


# ----------------------------------------------------------------------------
# shared epilogue (plain XLA): "+ mag_nb", atan2, exp/cos/sin, layout restore
# ----------------------------------------------------------------------------
def _finalize(mag_wb_t, r, i):
    # TODO(synk): atan2 has no guaranteed Mosaic lowering, so this cheap
    # elementwise epilogue on the small (B, T, F) outputs stays in XLA.
    pha_wb_t = jnp.arctan2(i, r)
    mag_wb = jnp.transpose(mag_wb_t, (0, 2, 1))      # (B, F, T)
    pha_wb = jnp.transpose(pha_wb_t, (0, 2, 1))
    em = jnp.exp(mag_wb)
    com_wb = jnp.stack((em * jnp.cos(pha_wb), em * jnp.sin(pha_wb)), axis=-1)
    return mag_wb, pha_wb, com_wb


# ----------------------------------------------------------------------------
# full forward pass (Pallas path)
# ----------------------------------------------------------------------------
def apnet_forward(mag_nb, pha_nb, params, *, use_bf16=False):
    """APNet_BWE_Model.forward.  mag_nb, pha_nb: (B, n_fft//2, T) f32."""
    B, F, T = mag_nb.shape
    ops, dims = _pack_params(params, use_bf16)
    K, C, H, L = dims['K'], dims['C'], dims['H'], dims['L']
    pad = (K - 1) // 2
    front = 8                               # >= pad, multiple of 8 (aligned stores)
    Tp = T + 2 * pad

    mag_t = jnp.transpose(mag_nb, (0, 2, 1))             # (B, T, F)
    pha_t = jnp.transpose(pha_nb, (0, 2, 1))
    # single lane-dense combined input, zero-padded ONCE for the K=7 halo
    xin = jnp.pad(jnp.concatenate([mag_t, pha_t], axis=-1),
                  ((0, 0), (pad, pad), (0, 0)))           # (B, T+6, 2F)

    kernel = _make_kernel(T=T, C=C, F=F, H=H, L=L, K=K, pad=pad, front=front)

    weight_names = ['wpre', 'bpre', 'gpre', 'bepre', 'dww', 'dwb', 'lng', 'lnb',
                    'w1', 'b1', 'w2', 'b2', 'gpost', 'bepost', 'wpost', 'bpost',
                    'mix']
    weights = [ops[n] for n in weight_names]

    def _const_spec(arr):
        nd = arr.ndim
        return pl.BlockSpec(arr.shape, lambda b, _nd=nd: (0,) * _nd)

    out = pl.pallas_call(
        kernel,
        out_shape=jax.ShapeDtypeStruct((B, T, 3 * F), jnp.float32),
        grid=(B,),
        in_specs=[pl.BlockSpec((1, Tp, 2 * F), lambda b: (b, 0, 0))]
                 + [_const_spec(w) for w in weights],
        out_specs=pl.BlockSpec((1, T, 3 * F), lambda b: (b, 0, 0)),
        scratch_shapes=[pltpu.VMEM((T + 2 * front, 2 * C), jnp.float32)],
        compiler_params=pltpu.CompilerParams(
            # batches shard across TensorCores; for B=1 on v7x one core idles
            # (time-splitting would need cross-layer halo exchange).
            dimension_semantics=("parallel",),
            vmem_limit_bytes=48 * 1024 * 1024,   # stays under v7x's 64 MiB physical
        ),
    )(xin, *weights)

    mag_wb_t = mag_t + out[..., :F]           # "+ mag_nb" fused into XLA epilogue
    r = out[..., F:2 * F]
    i = out[..., 2 * F:]
    return _finalize(mag_wb_t, r, i)


# ----------------------------------------------------------------------------
# pure-JAX reference (same math, lax convs at HIGHEST precision)
# ----------------------------------------------------------------------------
def ref_forward(mag_nb, pha_nb, params):
    HI = jax.lax.Precision.HIGHEST
    mag_t = jnp.transpose(mag_nb, (0, 2, 1))
    pha_t = jnp.transpose(pha_nb, (0, 2, 1))

    def conv_pre(x, p):
        K = p['w'].shape[0]
        pad = (K - 1) // 2
        y = jax.lax.conv_general_dilated(
            x, p['w'], (1,), [(pad, pad)],
            dimension_numbers=('NHC', 'HIO', 'NHC'), precision=HI) + p['b']
        return _ln(y, p['ln_g'], p['ln_b'])

    def block(s, p):
        K, C = p['dw_w'].shape
        pad = (K - 1) // 2
        h = jax.lax.conv_general_dilated(
            s, p['dw_w'][:, None, :], (1,), [(pad, pad)],
            dimension_numbers=('NHC', 'HIO', 'NHC'),
            feature_group_count=C, precision=HI) + p['dw_b']
        h = _ln(h, p['ln_g'], p['ln_b'])
        a = _gelu_tanh(jnp.dot(h, p['w1'], precision=HI) + p['b1'])
        y = jnp.dot(a, p['w2'], precision=HI) + p['b2']
        return s + p['gamma'] * y

    xm = conv_pre(mag_t, params['pre_mag'])
    xp = conv_pre(pha_t, params['pre_pha'])
    for pm, pp in zip(params['blocks_mag'], params['blocks_pha']):
        s_mag = xm + xp
        s_pha = s_mag + xp
        xm = block(s_mag, pm)
        xp = block(s_pha, pp)

    pmm = params['post_mag']
    h = _ln(xm, pmm['ln_g'], pmm['ln_b'])
    mag_wb_t = mag_t + jnp.dot(h, pmm['w'], precision=HI) + pmm['b']
    ppp = params['post_pha']
    h = _ln(xp, ppp['ln_g'], ppp['ln_b'])
    r = jnp.dot(h, ppp['wr'], precision=HI) + ppp['br']
    i = jnp.dot(h, ppp['wi'], precision=HI) + ppp['bi']
    return _finalize(mag_wb_t, r, i), (r, i)


# ----------------------------------------------------------------------------
# synthetic deterministic parameters (torch layouts noted in comments)
# ----------------------------------------------------------------------------
class KeyGen:
    def __init__(self, key):
        self.key = key

    def __call__(self):
        self.key, sub = jax.random.split(self.key)
        return sub


def init_params(key, n_layers, C, F, K=7):
    kg = KeyGen(key)

    def w(shape, std=0.02):
        return std * jax.random.normal(kg(), shape, jnp.float32)

    def ln(dim):  # LayerNorm weight/bias perturbed from (1, 0) to exercise the path
        return (1.0 + 0.05 * jax.random.normal(kg(), (1, dim), jnp.float32),
                0.05 * jax.random.normal(kg(), (1, dim), jnp.float32))

    def pre():
        # torch Conv1d weight (C, F, K) -> here (K, F, C)
        g, b = ln(C)
        return dict(w=w((K, F, C)), b=w((1, C)), ln_g=g, ln_b=b)

    def block():
        # torch depthwise weight (C, 1, K) -> (K, C); torch Linear (out,in) -> (in,out)
        g, b = ln(C)
        return dict(dw_w=w((K, C)), dw_b=w((1, C)), ln_g=g, ln_b=b,
                    w1=w((C, 3 * C)), b1=w((1, 3 * C)),
                    w2=w((3 * C, C)), b2=w((1, C)),
                    gamma=jnp.full((1, C), 1.0 / n_layers, jnp.float32))

    def post_m():
        g, b = ln(C)
        return dict(ln_g=g, ln_b=b, w=w((C, F)), b=w((1, F)))

    def post_p():
        g, b = ln(C)
        return dict(ln_g=g, ln_b=b, wr=w((C, F)), br=w((1, F)),
                    wi=w((C, F)), bi=w((1, F)))

    return dict(pre_mag=pre(), pre_pha=pre(),
                blocks_mag=[block() for _ in range(n_layers)],
                blocks_pha=[block() for _ in range(n_layers)],
                post_mag=post_m(), post_pha=post_p())


# ----------------------------------------------------------------------------
if __name__ == "__main__":
    ConvNeXt_layers = 2
    ConvNeXt_channels = 32
    n_fft = 64
    F = n_fft // 2                     # 32
    B, T = 2, 64

    key = jax.random.PRNGKey(0)
    k_in, k_par = jax.random.split(key)
    k_mag, k_pha = jax.random.split(k_in)
    mag_nb = jax.random.normal(k_mag, (B, F, T), jnp.float32)
    pha_nb = math.pi * jax.random.uniform(k_pha, (B, F, T), jnp.float32,
                                          minval=-1.0, maxval=1.0)

    params = init_params(k_par, ConvNeXt_layers, ConvNeXt_channels, F)

    # --- f32 MXU path: tight functional check against the reference ---
    fwd = jax.jit(functools.partial(apnet_forward, use_bf16=False))
    mag_wb, pha_wb, com_wb = jax.block_until_ready(fwd(mag_nb, pha_nb, params))

    (rm, rp, rc), (rr, ri) = jax.block_until_ready(
        jax.jit(ref_forward)(mag_nb, pha_nb, params))

    def max_rel(a, b):
        return float(jnp.max(jnp.abs(a - b)) / (jnp.max(jnp.abs(b)) + 1e-12))

    assert mag_wb.shape == (B, F, T)
    assert pha_wb.shape == (B, F, T)
    assert com_wb.shape == (B, F, T, 2)
    for t in (mag_wb, pha_wb, com_wb):
        assert bool(jnp.all(jnp.isfinite(t)))

    e_mag = max_rel(mag_wb, rm)
    assert e_mag < 2e-3, ("mag_wb mismatch", e_mag)

    # phase: angular error weighted by the (r, i) radius (atan2 is
    # ill-conditioned where r and i are both tiny).
    radius_t = jnp.transpose(jnp.sqrt(rr * rr + ri * ri), (0, 2, 1))   # (B, F, T)

    def pha_err(p):
        dang = jnp.arctan2(jnp.sin(p - rp), jnp.cos(p - rp))
        return float(jnp.max(jnp.abs(dang) * radius_t) / (jnp.max(radius_t) + 1e-12))

    e_pha = pha_err(pha_wb)
    assert e_pha < 5e-3, ("pha_wb mismatch", e_pha)

    # --- bf16 MXU-operand path (v6e/v7x perf mode): reduced-precision sanity ---
    fwd16 = jax.jit(functools.partial(apnet_forward, use_bf16=True))
    mag16, pha16, com16 = jax.block_until_ready(fwd16(mag_nb, pha_nb, params))
    for t in (mag16, pha16, com16):
        assert bool(jnp.all(jnp.isfinite(t)))
    e_mag16 = max_rel(mag16, rm)
    assert e_mag16 < 2e-2, ("bf16 mag_wb mismatch", e_mag16)
    e_pha16 = pha_err(pha16)
    assert e_pha16 < 1e-1, ("bf16 pha_wb mismatch", e_pha16)

    print("KERNEL_OK")
</pallas_src>

<mosaic_0001>
module attributes {stable_mosaic.version = 11 : i64} {
  func.func @kernel(%arg0: i32, %arg1: memref<1x70x64xf32, #tpu.memory_space<vmem>>, %arg2: memref<7x64x64xf32, #tpu.memory_space<vmem>>, %arg3: memref<1x64xf32, #tpu.memory_space<vmem>>, %arg4: memref<1x64xf32, #tpu.memory_space<vmem>>, %arg5: memref<1x64xf32, #tpu.memory_space<vmem>>, %arg6: memref<14x1x64xf32, #tpu.memory_space<vmem>>, %arg7: memref<2x1x64xf32, #tpu.memory_space<vmem>>, %arg8: memref<2x1x64xf32, #tpu.memory_space<vmem>>, %arg9: memref<2x1x64xf32, #tpu.memory_space<vmem>>, %arg10: memref<2x64x192xf32, #tpu.memory_space<vmem>>, %arg11: memref<2x1x192xf32, #tpu.memory_space<vmem>>, %arg12: memref<2x192x64xf32, #tpu.memory_space<vmem>>, %arg13: memref<2x1x64xf32, #tpu.memory_space<vmem>>, %arg14: memref<1x64xf32, #tpu.memory_space<vmem>>, %arg15: memref<1x64xf32, #tpu.memory_space<vmem>>, %arg16: memref<64x96xf32, #tpu.memory_space<vmem>>, %arg17: memref<1x96xf32, #tpu.memory_space<vmem>>, %arg18: memref<64x64xf32, #tpu.memory_space<vmem>>, %arg19: memref<1x64x96xf32, #tpu.memory_space<vmem>>, %arg20: memref<80x64xf32, #tpu.memory_space<vmem>>) attributes {dimension_semantics = [#tpu.dimension_semantics<parallel>], iteration_bounds = array<i64: 2>, scalar_prefetch = 0 : i64, scratch_operands = 1 : i64, tpu.core_type = #tpu.core_type<tc>, window_params = [{transform_indices = @transform_0, window_bounds = array<i64: 1, 70, 64>}, {pipeline_mode = #tpu.pipeline_mode<synchronous>, transform_indices = @transform_1, window_bounds = array<i64: 7, 64, 64>}, {pipeline_mode = #tpu.pipeline_mode<synchronous>, transform_indices = @transform_2, window_bounds = array<i64: 1, 64>}, {pipeline_mode = #tpu.pipeline_mode<synchronous>, transform_indices = @transform_3, window_bounds = array<i64: 1, 64>}, {pipeline_mode = #tpu.pipeline_mode<synchronous>, transform_indices = @transform_4, window_bounds = array<i64: 1, 64>}, {pipeline_mode = #tpu.pipeline_mode<synchronous>, transform_indices = @transform_5, window_bounds = array<i64: 14, 1, 64>}, {pipeline_mode = #tpu.pipeline_mode<synchronous>, transform_indices = @transform_6, window_bounds = array<i64: 2, 1, 64>}, {pipeline_mode = #tpu.pipeline_mode<synchronous>, transform_indices = @transform_7, window_bounds = array<i64: 2, 1, 64>}, {pipeline_mode = #tpu.pipeline_mode<synchronous>, transform_indices = @transform_8, window_bounds = array<i64: 2, 1, 64>}, {pipeline_mode = #tpu.pipeline_mode<synchronous>, transform_indices = @transform_9, window_bounds = array<i64: 2, 64, 192>}, {pipeline_mode = #tpu.pipeline_mode<synchronous>, transform_indices = @transform_10, window_bounds = array<i64: 2, 1, 192>}, {pipeline_mode = #tpu.pipeline_mode<synchronous>, transform_indices = @transform_11, window_bounds = array<i64: 2, 192, 64>}, {pipeline_mode = #tpu.pipeline_mode<synchronous>, transform_indices = @transform_12, window_bounds = array<i64: 2, 1, 64>}, {pipeline_mode = #tpu.pipeline_mode<synchronous>, transform_indices = @transform_13, window_bounds = array<i64: 1, 64>}, {pipeline_mode = #tpu.pipeline_mode<synchronous>, transform_indices = @transform_14, window_bounds = array<i64: 1, 64>}, {pipeline_mode = #tpu.pipeline_mode<synchronous>, transform_indices = @transform_15, window_bounds = array<i64: 64, 96>}, {pipeline_mode = #tpu.pipeline_mode<synchronous>, transform_indices = @transform_16, window_bounds = array<i64: 1, 96>}, {pipeline_mode = #tpu.pipeline_mode<synchronous>, transform_indices = @transform_17, window_bounds = array<i64: 64, 64>}, {transform_indices = @transform_18, window_bounds = array<i64: 1, 64, 96>}]} {
    %0 = tpu.iota {dimensions = array<i32: 1>} : vector<1x64xi32>
    %c32_i32 = arith.constant 32 : i32
    %1 = vector.broadcast %c32_i32 : i32 to vector<1x64xi32>
    %2 = arith.cmpi slt, %0, %1 : vector<1x64xi32>
    %3 = arith.extui %2 : vector<1x64xi1> to vector<1x64xi32>
    %4 = arith.sitofp %3 : vector<1x64xi32> to vector<1x64xf32>
    %c0 = arith.constant 0 : index
    %c0_0 = arith.constant 0 : index
    %5 = vector.load %arg18[%c0, %c0_0] : memref<64x64xf32, #tpu.memory_space<vmem>>, vector<64x64xf32>
    %cst = arith.constant 0.000000e+00 : f32
    %6 = vector.broadcast %cst : f32 to vector<64x64xf32>
    %c0_1 = arith.constant 0 : index
    %c0_2 = arith.constant 0 : index
    %7 = vector.load %arg3[%c0_1, %c0_2] : memref<1x64xf32, #tpu.memory_space<vmem>>, vector<1x64xf32>
    %8 = vector.broadcast %7 : vector<1x64xf32> to vector<64x64xf32>
    %9 = arith.addf %6, %8 : vector<64x64xf32>
    %c0_3 = arith.constant 0 : index
    %c0_4 = arith.constant 0 : index
    %c0_5 = arith.constant 0 : index
    %10 = vector.load %arg1[%c0_3, %c0_4, %c0_5] : memref<1x70x64xf32, #tpu.memory_space<vmem>>, vector<1x64x64xf32>
    %11 = vector.shape_cast %10 : vector<1x64x64xf32> to vector<64x64xf32>
    %c0_6 = arith.constant 0 : index
    %c0_7 = arith.constant 0 : index
    %c0_8 = arith.constant 0 : index
    %12 = vector.load %arg2[%c0_6, %c0_7, %c0_8] : memref<7x64x64xf32, #tpu.memory_space<vmem>>, vector<1x64x64xf32>
    %13 = vector.shape_cast %12 : vector<1x64x64xf32> to vector<64x64xf32>
    %cst_9 = arith.constant dense<0.000000e+00> : vector<64x64xf32>
    %14 = tpu.matmul %11, %13, %cst_9 {dimension_numbers = #tpu.dot_dimension_numbers<[1], [0], [0], [1], [0, 0, 1, 1], [], []>} : vector<64x64xf32>, vector<64x64xf32>, vector<64x64xf32> -> vector<64x64xf32>
    %15 = arith.addf %9, %14 : vector<64x64xf32>
    %c0_10 = arith.constant 0 : index
    %c1 = arith.constant 1 : index
    %c0_11 = arith.constant 0 : index
    %16 = vector.load %arg1[%c0_10, %c1, %c0_11] : memref<1x70x64xf32, #tpu.memory_space<vmem>>, vector<1x64x64xf32>
    %17 = vector.shape_cast %16 : vector<1x64x64xf32> to vector<64x64xf32>
    %c1_12 = arith.constant 1 : index
    %c0_13 = arith.constant 0 : index
    %c0_14 = arith.constant 0 : index
    %18 = vector.load %arg2[%c1_12, %c0_13, %c0_14] : memref<7x64x64xf32, #tpu.memory_space<vmem>>, vector<1x64x64xf32>
    %19 = vector.shape_cast %18 : vector<1x64x64xf32> to vector<64x64xf32>
    %cst_15 = arith.constant dense<0.000000e+00> : vector<64x64xf32>
    %20 = tpu.matmul %17, %19, %cst_15 {dimension_numbers = #tpu.dot_dimension_numbers<[1], [0], [0], [1], [0, 0, 1, 1], [], []>} : vector<64x64xf32>, vector<64x64xf32>, vector<64x64xf32> -> vector<64x64xf32>
    %21 = arith.addf %15, %20 : vector<64x64xf32>
    %c0_16 = arith.constant 0 : index
    %c2 = arith.constant 2 : index
    %c0_17 = arith.constant 0 : index
    %22 = vector.load %arg1[%c0_16, %c2, %c0_17] : memref<1x70x64xf32, #tpu.memory_space<vmem>>, vector<1x64x64xf32>
    %23 = vector.shape_cast %22 : vector<1x64x64xf32> to vector<64x64xf32>
    %c2_18 = arith.constant 2 : index
    %c0_19 = arith.constant 0 : index
    %c0_20 = arith.constant 0 : index
    %24 = vector.load %arg2[%c2_18, %c0_19, %c0_20] : memref<7x64x64xf32, #tpu.memory_space<vmem>>, vector<1x64x64xf32>
    %25 = vector.shape_cast %24 : vector<1x64x64xf32> to vector<64x64xf32>
    %cst_21 = arith.constant dense<0.000000e+00> : vector<64x64xf32>
    %26 = tpu.matmul %23, %25, %cst_21 {dimension_numbers = #tpu.dot_dimension_numbers<[1], [0], [0], [1], [0, 0, 1, 1], [], []>} : vector<64x64xf32>, vector<64x64xf32>, vector<64x64xf32> -> vector<64x64xf32>
    %27 = arith.addf %21, %26 : vector<64x64xf32>
    %c0_22 = arith.constant 0 : index
    %c3 = arith.constant 3 : index
    %c0_23 = arith.constant 0 : index
    %28 = vector.load %arg1[%c0_22, %c3, %c0_23] : memref<1x70x64xf32, #tpu.memory_space<vmem>>, vector<1x64x64xf32>
    %29 = vector.shape_cast %28 : vector<1x64x64xf32> to vector<64x64xf32>
    %c3_24 = arith.constant 3 : index
    %c0_25 = arith.constant 0 : index
    %c0_26 = arith.constant 0 : index
    %30 = vector.load %arg2[%c3_24, %c0_25, %c0_26] : memref<7x64x64xf32, #tpu.memory_space<vmem>>, vector<1x64x64xf32>
    %31 = vector.shape_cast %30 : vector<1x64x64xf32> to vector<64x64xf32>
    %cst_27 = arith.constant dense<0.000000e+00> : vector<64x64xf32>
    %32 = tpu.matmul %29, %31, %cst_27 {dimension_numbers = #tpu.dot_dimension_numbers<[1], [0], [0], [1], [0, 0, 1, 1], [], []>} : vector<64x64xf32>, vector<64x64xf32>, vector<64x64xf32> -> vector<64x64xf32>
    %33 = arith.addf %27, %32 : vector<64x64xf32>
    %c0_28 = arith.constant 0 : index
    %c4 = arith.constant 4 : index
    %c0_29 = arith.constant 0 : index
    %34 = vector.load %arg1[%c0_28, %c4, %c0_29] : memref<1x70x64xf32, #tpu.memory_space<vmem>>, vector<1x64x64xf32>
    %35 = vector.shape_cast %34 : vector<1x64x64xf32> to vector<64x64xf32>
    %c4_30 = arith.constant 4 : index
    %c0_31 = arith.constant 0 : index
    %c0_32 = arith.constant 0 : index
    %36 = vector.load %arg2[%c4_30, %c0_31, %c0_32] : memref<7x64x64xf32, #tpu.memory_space<vmem>>, vector<1x64x64xf32>
    %37 = vector.shape_cast %36 : vector<1x64x64xf32> to vector<64x64xf32>
    %cst_33 = arith.constant dense<0.000000e+00> : vector<64x64xf32>
    %38 = tpu.matmul %35, %37, %cst_33 {dimension_numbers = #tpu.dot_dimension_numbers<[1], [0], [0], [1], [0, 0, 1, 1], [], []>} : vector<64x64xf32>, vector<64x64xf32>, vector<64x64xf32> -> vector<64x64xf32>
    %39 = arith.addf %33, %38 : vector<64x64xf32>
    %c0_34 = arith.constant 0 : index
    %c5 = arith.constant 5 : index
    %c0_35 = arith.constant 0 : index
    %40 = vector.load %arg1[%c0_34, %c5, %c0_35] : memref<1x70x64xf32, #tpu.memory_space<vmem>>, vector<1x64x64xf32>
    %41 = vector.shape_cast %40 : vector<1x64x64xf32> to vector<64x64xf32>
    %c5_36 = arith.constant 5 : index
    %c0_37 = arith.constant 0 : index
    %c0_38 = arith.constant 0 : index
    %42 = vector.load %arg2[%c5_36, %c0_37, %c0_38] : memref<7x64x64xf32, #tpu.memory_space<vmem>>, vector<1x64x64xf32>
    %43 = vector.shape_cast %42 : vector<1x64x64xf32> to vector<64x64xf32>
    %cst_39 = arith.constant dense<0.000000e+00> : vector<64x64xf32>
    %44 = tpu.matmul %41, %43, %cst_39 {dimension_numbers = #tpu.dot_dimension_numbers<[1], [0], [0], [1], [0, 0, 1, 1], [], []>} : vector<64x64xf32>, vector<64x64xf32>, vector<64x64xf32> -> vector<64x64xf32>
    %45 = arith.addf %39, %44 : vector<64x64xf32>
    %c0_40 = arith.constant 0 : index
    %c6 = arith.constant 6 : index
    %c0_41 = arith.constant 0 : index
    %46 = vector.load %arg1[%c0_40, %c6, %c0_41] : memref<1x70x64xf32, #tpu.memory_space<vmem>>, vector<1x64x64xf32>
    %47 = vector.shape_cast %46 : vector<1x64x64xf32> to vector<64x64xf32>
    %c6_42 = arith.constant 6 : index
    %c0_43 = arith.constant 0 : index
    %c0_44 = arith.constant 0 : index
    %48 = vector.load %arg2[%c6_42, %c0_43, %c0_44] : memref<7x64x64xf32, #tpu.memory_space<vmem>>, vector<1x64x64xf32>
    %49 = vector.shape_cast %48 : vector<1x64x64xf32> to vector<64x64xf32>
    %cst_45 = arith.constant dense<0.000000e+00> : vector<64x64xf32>
    %50 = tpu.matmul %47, %49, %cst_45 {dimension_numbers = #tpu.dot_dimension_numbers<[1], [0], [0], [1], [0, 0, 1, 1], [], []>} : vector<64x64xf32>, vector<64x64xf32>, vector<64x64xf32> -> vector<64x64xf32>
    %51 = arith.addf %45, %50 : vector<64x64xf32>
    %c0_46 = arith.constant 0 : index
    %c0_47 = arith.constant 0 : index
    %52 = vector.load %arg4[%c0_46, %c0_47] : memref<1x64xf32, #tpu.memory_space<vmem>>, vector<1x64xf32>
    %c0_48 = arith.constant 0 : index
    %c0_49 = arith.constant 0 : index
    %53 = vector.load %arg5[%c0_48, %c0_49] : memref<1x64xf32, #tpu.memory_space<vmem>>, vector<1x64xf32>
    %cst_50 = arith.constant 1.000000e+00 : f32
    %54 = vector.broadcast %cst_50 : f32 to vector<1x64xf32>
    %55 = arith.subf %54, %4 : vector<1x64xf32>
    %56 = vector.broadcast %4 : vector<1x64xf32> to vector<64x64xf32>
    %57 = arith.mulf %51, %56 : vector<64x64xf32>
    %cst_51 = arith.constant dense<0.000000e+00> : vector<64xf32>
    %58 = vector.multi_reduction <add>, %57, %cst_51 [1] : vector<64x64xf32> to vector<64xf32>
    %59 = vector.shape_cast %58 : vector<64xf32> to vector<64x1xf32>
    %cst_52 = arith.constant dense<0.000000e+00> : vector<64xf32>
    %60 = vector.multi_reduction <add>, %51, %cst_52 [1] : vector<64x64xf32> to vector<64xf32>
    %61 = vector.shape_cast %60 : vector<64xf32> to vector<64x1xf32>
    %62 = vector.broadcast %59 : vector<64x1xf32> to vector<64x64xf32>
    %63 = vector.broadcast %4 : vector<1x64xf32> to vector<64x64xf32>
    %64 = arith.mulf %62, %63 : vector<64x64xf32>
    %65 = arith.subf %61, %59 : vector<64x1xf32>
    %66 = vector.broadcast %65 : vector<64x1xf32> to vector<64x64xf32>
    %67 = vector.broadcast %55 : vector<1x64xf32> to vector<64x64xf32>
    %68 = arith.mulf %66, %67 : vector<64x64xf32>
    %69 = arith.addf %64, %68 : vector<64x64xf32>
    %cst_53 = arith.constant 3.125000e-02 : f32
    %70 = vector.broadcast %cst_53 : f32 to vector<64x64xf32>
    %71 = arith.mulf %69, %70 : vector<64x64xf32>
    %72 = arith.subf %51, %71 : vector<64x64xf32>
    %73 = arith.mulf %72, %72 : vector<64x64xf32>
    %74 = vector.broadcast %4 : vector<1x64xf32> to vector<64x64xf32>
    %75 = arith.mulf %73, %74 : vector<64x64xf32>
    %cst_54 = arith.constant dense<0.000000e+00> : vector<64xf32>
    %76 = vector.multi_reduction <add>, %75, %cst_54 [1] : vector<64x64xf32> to vector<64xf32>
    %77 = vector.shape_cast %76 : vector<64xf32> to vector<64x1xf32>
    %cst_55 = arith.constant dense<0.000000e+00> : vector<64xf32>
    %78 = vector.multi_reduction <add>, %73, %cst_55 [1] : vector<64x64xf32> to vector<64xf32>
    %79 = vector.shape_cast %78 : vector<64xf32> to vector<64x1xf32>
    %80 = vector.broadcast %77 : vector<64x1xf32> to vector<64x64xf32>
    %81 = vector.broadcast %4 : vector<1x64xf32> to vector<64x64xf32>
    %82 = arith.mulf %80, %81 : vector<64x64xf32>
    %83 = arith.subf %79, %77 : vector<64x1xf32>
    %84 = vector.broadcast %83 : vector<64x1xf32> to vector<64x64xf32>
    %85 = vector.broadcast %55 : vector<1x64xf32> to vector<64x64xf32>
    %86 = arith.mulf %84, %85 : vector<64x64xf32>
    %87 = arith.addf %82, %86 : vector<64x64xf32>
    %cst_56 = arith.constant 3.125000e-02 : f32
    %88 = vector.broadcast %cst_56 : f32 to vector<64x64xf32>
    %89 = arith.mulf %87, %88 : vector<64x64xf32>
    %cst_57 = arith.constant 9.99999997E-7 : f32
    %90 = vector.broadcast %cst_57 : f32 to vector<64x64xf32>
    %91 = arith.addf %89, %90 : vector<64x64xf32>
    %92 = math.rsqrt %91 : vector<64x64xf32>
    %93 = arith.mulf %72, %92 : vector<64x64xf32>
    %94 = vector.broadcast %52 : vector<1x64xf32> to vector<64x64xf32>
    %95 = arith.mulf %93, %94 : vector<64x64xf32>
    %96 = vector.broadcast %53 : vector<1x64xf32> to vector<64x64xf32>
    %97 = arith.addf %95, %96 : vector<64x64xf32>
    %cst_58 = arith.constant 0.000000e+00 : f32
    %98 = vector.broadcast %cst_58 : f32 to vector<8x64xf32>
    %c0_59 = arith.constant 0 : index
    %c0_60 = arith.constant 0 : index
    %99 = vector.load %arg20[%c0_59, %c0_60] : memref<80x64xf32, #tpu.memory_space<vmem>>, vector<8x64xf32>
    tpu.vector_store %arg20[%c0_59, %c0_60], %98 {strides = array<i32>} : memref<80x64xf32, #tpu.memory_space<vmem>>, vector<8x64xf32>,
    %cst_61 = arith.constant 0.000000e+00 : f32
    %100 = vector.broadcast %cst_61 : f32 to vector<8x64xf32>
    %c72 = arith.constant 72 : index
    %c0_62 = arith.constant 0 : index
    %101 = vector.load %arg20[%c72, %c0_62] : memref<80x64xf32, #tpu.memory_space<vmem>>, vector<8x64xf32>
    tpu.vector_store %arg20[%c72, %c0_62], %100 {strides = array<i32>} : memref<80x64xf32, #tpu.memory_space<vmem>>, vector<8x64xf32>,
    %cst_63 = arith.constant dense<0.000000e+00> : vector<64x64xf32>
    %102 = tpu.matmul %97, %5, %cst_63 {dimension_numbers = #tpu.dot_dimension_numbers<[1], [0], [0], [1], [0, 0, 1, 1], [], []>} : vector<64x64xf32>, vector<64x64xf32>, vector<64x64xf32> -> vector<64x64xf32>
    %c8 = arith.constant 8 : index
    %c0_64 = arith.constant 0 : index
    %103 = vector.load %arg20[%c8, %c0_64] : memref<80x64xf32, #tpu.memory_space<vmem>>, vector<64x64xf32>
    tpu.vector_store %arg20[%c8, %c0_64], %102 {strides = array<i32>} : memref<80x64xf32, #tpu.memory_space<vmem>>, vector<64x64xf32>,
    %cst_65 = arith.constant 0.000000e+00 : f32
    %104 = vector.broadcast %cst_65 : f32 to vector<64x64xf32>
    %c0_66 = arith.constant 0 : index
    %c0_67 = arith.constant 0 : index
    %c0_68 = arith.constant 0 : index
    %105 = vector.load %arg7[%c0_66, %c0_67, %c0_68] : memref<2x1x64xf32, #tpu.memory_space<vmem>>, vector<1x1x64xf32>
    %106 = vector.shape_cast %105 : vector<1x1x64xf32> to vector<1x64xf32>
    %107 = vector.broadcast %106 : vector<1x64xf32> to vector<64x64xf32>
    %108 = arith.addf %104, %107 : vector<64x64xf32>
    %c5_69 = arith.constant 5 : index
    %c0_70 = arith.constant 0 : index
    %109 = vector.load %arg20[%c5_69, %c0_70] : memref<80x64xf32, #tpu.memory_space<vmem>>, vector<64x64xf32>
    %c0_71 = arith.constant 0 : index
    %c0_72 = arith.constant 0 : index
    %c0_73 = arith.constant 0 : index
    %110 = vector.load %arg6[%c0_71, %c0_72, %c0_73] : memref<14x1x64xf32, #tpu.memory_space<vmem>>, vector<1x1x64xf32>
    %111 = vector.shape_cast %110 : vector<1x1x64xf32> to vector<1x64xf32>
    %112 = vector.broadcast %111 : vector<1x64xf32> to vector<64x64xf32>
    %113 = arith.mulf %109, %112 : vector<64x64xf32>
    %114 = arith.addf %108, %113 : vector<64x64xf32>
    %c6_74 = arith.constant 6 : index
    %c0_75 = arith.constant 0 : index
    %115 = vector.load %arg20[%c6_74, %c0_75] : memref<80x64xf32, #tpu.memory_space<vmem>>, vector<64x64xf32>
    %c1_76 = arith.constant 1 : index
    %c0_77 = arith.constant 0 : index
    %c0_78 = arith.constant 0 : index
    %116 = vector.load %arg6[%c1_76, %c0_77, %c0_78] : memref<14x1x64xf32, #tpu.memory_space<vmem>>, vector<1x1x64xf32>
    %117 = vector.shape_cast %116 : vector<1x1x64xf32> to vector<1x64xf32>
    %118 = vector.broadcast %117 : vector<1x64xf32> to vector<64x64xf32>
    %119 = arith.mulf %115, %118 : vector<64x64xf32>
    %120 = arith.addf %114, %119 : vector<64x64xf32>
    %c7 = arith.constant 7 : index
    %c0_79 = arith.constant 0 : index
    %121 = vector.load %arg20[%c7, %c0_79] : memref<80x64xf32, #tpu.memory_space<vmem>>, vector<64x64xf32>
    %c2_80 = arith.constant 2 : index
    %c0_81 = arith.constant 0 : index
    %c0_82 = arith.constant 0 : index
    %122 = vector.load %arg6[%c2_80, %c0_81, %c0_82] : memref<14x1x64xf32, #tpu.memory_space<vmem>>, vector<1x1x64xf32>
    %123 = vector.shape_cast %122 : vector<1x1x64xf32> to vector<1x64xf32>
    %124 = vector.broadcast %123 : vector<1x64xf32> to vector<64x64xf32>
    %125 = arith.mulf %121, %124 : vector<64x64xf32>
    %126 = arith.addf %120, %125 : vector<64x64xf32>
    %c8_83 = arith.constant 8 : index
    %c0_84 = arith.constant 0 : index
    %127 = vector.load %arg20[%c8_83, %c0_84] : memref<80x64xf32, #tpu.memory_space<vmem>>, vector<64x64xf32>
    %c3_85 = arith.constant 3 : index
    %c0_86 = arith.constant 0 : index
    %c0_87 = arith.constant 0 : index
    %128 = vector.load %arg6[%c3_85, %c0_86, %c0_87] : memref<14x1x64xf32, #tpu.memory_space<vmem>>, vector<1x1x64xf32>
    %129 = vector.shape_cast %128 : vector<1x1x64xf32> to vector<1x64xf32>
    %130 = vector.broadcast %129 : vector<1x64xf32> to vector<64x64xf32>
    %131 = arith.mulf %127, %130 : vector<64x64xf32>
    %132 = arith.addf %126, %131 : vector<64x64xf32>
    %c9 = arith.constant 9 : index
    %c0_88 = arith.constant 0 : index
    %133 = vector.load %arg20[%c9, %c0_88] : memref<80x64xf32, #tpu.memory_space<vmem>>, vector<64x64xf32>
    %c4_89 = arith.constant 4 : index
    %c0_90 = arith.constant 0 : index
    %c0_91 = arith.constant 0 : index
    %134 = vector.load %arg6[%c4_89, %c0_90, %c0_91] : memref<14x1x64xf32, #tpu.memory_space<vmem>>, vector<1x1x64xf32>
    %135 = vector.shape_cast %134 : vector<1x1x64xf32> to vector<1x64xf32>
    %136 = vector.broadcast %135 : vector<1x64xf32> to vector<64x64xf32>
    %137 = arith.mulf %133, %136 : vector<64x64xf32>
    %138 = arith.addf %132, %137 : vector<64x64xf32>
    %c10 = arith.constant 10 : index
    %c0_92 = arith.constant 0 : index
    %139 = vector.load %arg20[%c10, %c0_92] : memref<80x64xf32, #tpu.memory_space<vmem>>, vector<64x64xf32>
    %c5_93 = arith.constant 5 : index
    %c0_94 = arith.constant 0 : index
    %c0_95 = arith.constant 0 : index
    %140 = vector.load %arg6[%c5_93, %c0_94, %c0_95] : memref<14x1x64xf32, #tpu.memory_space<vmem>>, vector<1x1x64xf32>
    %141 = vector.shape_cast %140 : vector<1x1x64xf32> to vector<1x64xf32>
    %142 = vector.broadcast %141 : vector<1x64xf32> to vector<64x64xf32>
    %143 = arith.mulf %139, %142 : vector<64x64xf32>
    %144 = arith.addf %138, %143 : vector<64x64xf32>
    %c11 = arith.constant 11 : index
    %c0_96 = arith.constant 0 : index
    %145 = vector.load %arg20[%c11, %c0_96] : memref<80x64xf32, #tpu.memory_space<vmem>>, vector<64x64xf32>
    %c6_97 = arith.constant 6 : index
    %c0_98 = arith.constant 0 : index
    %c0_99 = arith.constant 0 : index
    %146 = vector.load %arg6[%c6_97, %c0_98, %c0_99] : memref<14x1x64xf32, #tpu.memory_space<vmem>>, vector<1x1x64xf32>
    %147 = vector.shape_cast %146 : vector<1x1x64xf32> to vector<1x64xf32>
    %148 = vector.broadcast %147 : vector<1x64xf32> to vector<64x64xf32>
    %149 = arith.mulf %145, %148 : vector<64x64xf32>
    %150 = arith.addf %144, %149 : vector<64x64xf32>
    %c0_100 = arith.constant 0 : index
    %c0_101 = arith.constant 0 : index
    %c0_102 = arith.constant 0 : index
    %151 = vector.load %arg8[%c0_100, %c0_101, %c0_102] : memref<2x1x64xf32, #tpu.memory_space<vmem>>, vector<1x1x64xf32>
    %152 = vector.shape_cast %151 : vector<1x1x64xf32> to vector<1x64xf32>
    %c0_103 = arith.constant 0 : index
    %c0_104 = arith.constant 0 : index
    %c0_105 = arith.constant 0 : index
    %153 = vector.load %arg9[%c0_103, %c0_104, %c0_105] : memref<2x1x64xf32, #tpu.memory_space<vmem>>, vector<1x1x64xf32>
    %154 = vector.shape_cast %153 : vector<1x1x64xf32> to vector<1x64xf32>
    %cst_106 = arith.constant 1.000000e+00 : f32
    %155 = vector.broadcast %cst_106 : f32 to vector<1x64xf32>
    %156 = arith.subf %155, %4 : vector<1x64xf32>
    %157 = vector.broadcast %4 : vector<1x64xf32> to vector<64x64xf32>
    %158 = arith.mulf %150, %157 : vector<64x64xf32>
    %cst_107 = arith.constant dense<0.000000e+00> : vector<64xf32>
    %159 = vector.multi_reduction <add>, %158, %cst_107 [1] : vector<64x64xf32> to vector<64xf32>
    %160 = vector.shape_cast %159 : vector<64xf32> to vector<64x1xf32>
    %cst_108 = arith.constant dense<0.000000e+00> : vector<64xf32>
    %161 = vector.multi_reduction <add>, %150, %cst_108 [1] : vector<64x64xf32> to vector<64xf32>
    %162 = vector.shape_cast %161 : vector<64xf32> to vector<64x1xf32>
    %163 = vector.broadcast %160 : vector<64x1xf32> to vector<64x64xf32>
    %164 = vector.broadcast %4 : vector<1x64xf32> to vector<64x64xf32>
    %165 = arith.mulf %163, %164 : vector<64x64xf32>
    %166 = arith.subf %162, %160 : vector<64x1xf32>
    %167 = vector.broadcast %166 : vector<64x1xf32> to vector<64x64xf32>
    %168 = vector.broadcast %156 : vector<1x64xf32> to vector<64x64xf32>
    %169 = arith.mulf %167, %168 : vector<64x64xf32>
    %170 = arith.addf %165, %169 : vector<64x64xf32>
    %cst_109 = arith.constant 3.125000e-02 : f32
    %171 = vector.broadcast %cst_109 : f32 to vector<64x64xf32>
    %172 = arith.mulf %170, %171 : vector<64x64xf32>
    %173 = arith.subf %150, %172 : vector<64x64xf32>
    %174 = arith.mulf %173, %173 : vector<64x64xf32>
    %175 = vector.broadcast %4 : vector<1x64xf32> to vector<64x64xf32>
    %176 = arith.mulf %174, %175 : vector<64x64xf32>
    %cst_110 = arith.constant dense<0.000000e+00> : vector<64xf32>
    %177 = vector.multi_reduction <add>, %176, %cst_110 [1] : vector<64x64xf32> to vector<64xf32>
    %178 = vector.shape_cast %177 : vector<64xf32> to vector<64x1xf32>
    %cst_111 = arith.constant dense<0.000000e+00> : vector<64xf32>
    %179 = vector.multi_reduction <add>, %174, %cst_111 [1] : vector<64x64xf32> to vector<64xf32>
    %180 = vector.shape_cast %179 : vector<64xf32> to vector<64x1xf32>
    %181 = vector.broadcast %178 : vector<64x1xf32> to vector<64x64xf32>
    %182 = vector.broadcast %4 : vector<1x64xf32> to vector<64x64xf32>
    %183 = arith.mulf %181, %182 : vector<64x64xf32>
    %184 = arith.subf %180, %178 : vector<64x1xf32>
    %185 = vector.broadcast %184 : vector<64x1xf32> to vector<64x64xf32>
    %186 = vector.broadcast %156 : vector<1x64xf32> to vector<64x64xf32>
    %187 = arith.mulf %185, %186 : vector<64x64xf32>
    %188 = arith.addf %183, %187 : vector<64x64xf32>
    %cst_112 = arith.constant 3.125000e-02 : f32
    %189 = vector.broadcast %cst_112 : f32 to vector<64x64xf32>
    %190 = arith.mulf %188, %189 : vector<64x64xf32>
    %cst_113 = arith.constant 9.99999997E-7 : f32
    %191 = vector.broadcast %cst_113 : f32 to vector<64x64xf32>
    %192 = arith.addf %190, %191 : vector<64x64xf32>
    %193 = math.rsqrt %192 : vector<64x64xf32>
    %194 = arith.mulf %173, %193 : vector<64x64xf32>
    %195 = vector.broadcast %152 : vector<1x64xf32> to vector<64x64xf32>
    %196 = arith.mulf %194, %195 : vector<64x64xf32>
    %197 = vector.broadcast %154 : vector<1x64xf32> to vector<64x64xf32>
    %198 = arith.addf %196, %197 : vector<64x64xf32>
    %c0_114 = arith.constant 0 : index
    %c0_115 = arith.constant 0 : index
    %c0_116 = arith.constant 0 : index
    %199 = vector.load %arg10[%c0_114, %c0_115, %c0_116] : memref<2x64x192xf32, #tpu.memory_space<vmem>>, vector<1x64x192xf32>
    %200 = vector.shape_cast %199 : vector<1x64x192xf32> to vector<64x192xf32>
    %cst_117 = arith.constant dense<0.000000e+00> : vector<64x192xf32>
    %201 = tpu.matmul %198, %200, %cst_117 {dimension_numbers = #tpu.dot_dimension_numbers<[1], [0], [0], [1], [0, 0, 1, 1], [], []>} : vector<64x64xf32>, vector<64x192xf32>, vector<64x192xf32> -> vector<64x192xf32>
    %c0_118 = arith.constant 0 : index
    %c0_119 = arith.constant 0 : index
    %c0_120 = arith.constant 0 : index
    %202 = vector.load %arg11[%c0_118, %c0_119, %c0_120] : memref<2x1x192xf32, #tpu.memory_space<vmem>>, vector<1x1x192xf32>
    %203 = vector.shape_cast %202 : vector<1x1x192xf32> to vector<1x192xf32>
    %204 = vector.broadcast %203 : vector<1x192xf32> to vector<64x192xf32>
    %205 = arith.addf %201, %204 : vector<64x192xf32>
    %cst_121 = arith.constant 5.000000e-01 : f32
    %206 = vector.broadcast %cst_121 : f32 to vector<64x192xf32>
    %207 = arith.mulf %206, %205 : vector<64x192xf32>
    %cst_122 = arith.constant 4.471500e-02 : f32
    %208 = vector.broadcast %cst_122 : f32 to vector<64x192xf32>
    %209 = arith.mulf %208, %205 : vector<64x192xf32>
    %210 = arith.mulf %209, %205 : vector<64x192xf32>
    %211 = arith.mulf %210, %205 : vector<64x192xf32>
    %212 = arith.addf %205, %211 : vector<64x192xf32>
    %cst_123 = arith.constant 0.797884583 : f32
    %213 = vector.broadcast %cst_123 : f32 to vector<64x192xf32>
    %214 = arith.mulf %213, %212 : vector<64x192xf32>
    %215 = math.tanh %214 : vector<64x192xf32>
    %cst_124 = arith.constant 1.000000e+00 : f32
    %216 = vector.broadcast %cst_124 : f32 to vector<64x192xf32>
    %217 = arith.addf %216, %215 : vector<64x192xf32>
    %218 = arith.mulf %207, %217 : vector<64x192xf32>
    %c0_125 = arith.constant 0 : index
    %c0_126 = arith.constant 0 : index
    %c0_127 = arith.constant 0 : index
    %219 = vector.load %arg12[%c0_125, %c0_126, %c0_127] : memref<2x192x64xf32, #tpu.memory_space<vmem>>, vector<1x192x64xf32>
    %220 = vector.shape_cast %219 : vector<1x192x64xf32> to vector<192x64xf32>
    %cst_128 = arith.constant dense<0.000000e+00> : vector<64x64xf32>
    %221 = tpu.matmul %218, %220, %cst_128 {dimension_numbers = #tpu.dot_dimension_numbers<[1], [0], [0], [1], [0, 0, 1, 1], [], []>} : vector<64x192xf32>, vector<192x64xf32>, vector<64x64xf32> -> vector<64x64xf32>
    %c0_129 = arith.constant 0 : index
    %c0_130 = arith.constant 0 : index
    %c0_131 = arith.constant 0 : index
    %222 = vector.load %arg13[%c0_129, %c0_130, %c0_131] : memref<2x1x64xf32, #tpu.memory_space<vmem>>, vector<1x1x64xf32>
    %223 = vector.shape_cast %222 : vector<1x1x64xf32> to vector<1x64xf32>
    %224 = vector.broadcast %223 : vector<1x64xf32> to vector<64x64xf32>
    %225 = arith.addf %221, %224 : vector<64x64xf32>
    %226 = arith.addf %102, %225 : vector<64x64xf32>
    %cst_132 = arith.constant dense<0.000000e+00> : vector<64x64xf32>
    %227 = tpu.matmul %226, %5, %cst_132 {dimension_numbers = #tpu.dot_dimension_numbers<[1], [0], [0], [1], [0, 0, 1, 1], [], []>} : vector<64x64xf32>, vector<64x64xf32>, vector<64x64xf32> -> vector<64x64xf32>
    %c8_133 = arith.constant 8 : index
    %c0_134 = arith.constant 0 : index
    %228 = vector.load %arg20[%c8_133, %c0_134] : memref<80x64xf32, #tpu.memory_space<vmem>>, vector<64x64xf32>
    tpu.vector_store %arg20[%c8_133, %c0_134], %227 {strides = array<i32>} : memref<80x64xf32, #tpu.memory_space<vmem>>, vector<64x64xf32>,
    %cst_135 = arith.constant 0.000000e+00 : f32
    %229 = vector.broadcast %cst_135 : f32 to vector<64x64xf32>
    %c1_136 = arith.constant 1 : index
    %c0_137 = arith.constant 0 : index
    %c0_138 = arith.constant 0 : index
    %230 = vector.load %arg7[%c1_136, %c0_137, %c0_138] : memref<2x1x64xf32, #tpu.memory_space<vmem>>, vector<1x1x64xf32>
    %231 = vector.shape_cast %230 : vector<1x1x64xf32> to vector<1x64xf32>
    %232 = vector.broadcast %231 : vector<1x64xf32> to vector<64x64xf32>
    %233 = arith.addf %229, %232 : vector<64x64xf32>
    %c5_139 = arith.constant 5 : index
    %c0_140 = arith.constant 0 : index
    %234 = vector.load %arg20[%c5_139, %c0_140] : memref<80x64xf32, #tpu.memory_space<vmem>>, vector<64x64xf32>
    %c7_141 = arith.constant 7 : index
    %c0_142 = arith.constant 0 : index
    %c0_143 = arith.constant 0 : index
    %235 = vector.load %arg6[%c7_141, %c0_142, %c0_143] : memref<14x1x64xf32, #tpu.memory_space<vmem>>, vector<1x1x64xf32>
    %236 = vector.shape_cast %235 : vector<1x1x64xf32> to vector<1x64xf32>
    %237 = vector.broadcast %236 : vector<1x64xf32> to vector<64x64xf32>
    %238 = arith.mulf %234, %237 : vector<64x64xf32>
    %239 = arith.addf %233, %238 : vector<64x64xf32>
    %c6_144 = arith.constant 6 : index
    %c0_145 = arith.constant 0 : index
    %240 = vector.load %arg20[%c6_144, %c0_145] : memref<80x64xf32, #tpu.memory_space<vmem>>, vector<64x64xf32>
    %c8_146 = arith.constant 8 : index
    %c0_147 = arith.constant 0 : index
    %c0_148 = arith.constant 0 : index
    %241 = vector.load %arg6[%c8_146, %c0_147, %c0_148] : memref<14x1x64xf32, #tpu.memory_space<vmem>>, vector<1x1x64xf32>
    %242 = vector.shape_cast %241 : vector<1x1x64xf32> to vector<1x64xf32>
    %243 = vector.broadcast %242 : vector<1x64xf32> to vector<64x64xf32>
    %244 = arith.mulf %240, %243 : vector<64x64xf32>
    %245 = arith.addf %239, %244 : vector<64x64xf32>
    %c7_149 = arith.constant 7 : index
    %c0_150 = arith.constant 0 : index
    %246 = vector.load %arg20[%c7_149, %c0_150] : memref<80x64xf32, #tpu.memory_space<vmem>>, vector<64x64xf32>
    %c9_151 = arith.constant 9 : index
    %c0_152 = arith.constant 0 : index
    %c0_153 = arith.constant 0 : index
    %247 = vector.load %arg6[%c9_151, %c0_152, %c0_153] : memref<14x1x64xf32, #tpu.memory_space<vmem>>, vector<1x1x64xf32>
    %248 = vector.shape_cast %247 : vector<1x1x64xf32> to vector<1x64xf32>
    %249 = vector.broadcast %248 : vector<1x64xf32> to vector<64x64xf32>
    %250 = arith.mulf %246, %249 : vector<64x64xf32>
    %251 = arith.addf %245, %250 : vector<64x64xf32>
    %c8_154 = arith.constant 8 : index
    %c0_155 = arith.constant 0 : index
    %252 = vector.load %arg20[%c8_154, %c0_155] : memref<80x64xf32, #tpu.memory_space<vmem>>, vector<64x64xf32>
    %c10_156 = arith.constant 10 : index
    %c0_157 = arith.constant 0 : index
    %c0_158 = arith.constant 0 : index
    %253 = vector.load %arg6[%c10_156, %c0_157, %c0_158] : memref<14x1x64xf32, #tpu.memory_space<vmem>>, vector<1x1x64xf32>
    %254 = vector.shape_cast %253 : vector<1x1x64xf32> to vector<1x64xf32>
    %255 = vector.broadcast %254 : vector<1x64xf32> to vector<64x64xf32>
    %256 = arith.mulf %252, %255 : vector<64x64xf32>
    %257 = arith.addf %251, %256 : vector<64x64xf32>
    %c9_159 = arith.constant 9 : index
    %c0_160 = arith.constant 0 : index
    %258 = vector.load %arg20[%c9_159, %c0_160] : memref<80x64xf32, #tpu.memory_space<vmem>>, vector<64x64xf32>
    %c11_161 = arith.constant 11 : index
    %c0_162 = arith.constant 0 : index
    %c0_163 = arith.constant 0 : index
    %259 = vector.load %arg6[%c11_161, %c0_162, %c0_163] : memref<14x1x64xf32, #tpu.memory_space<vmem>>, vector<1x1x64xf32>
    %260 = vector.shape_cast %259 : vector<1x1x64xf32> to vector<1x64xf32>
    %261 = vector.broadcast %260 : vector<1x64xf32> to vector<64x64xf32>
    %262 = arith.mulf %258, %261 : vector<64x64xf32>
    %263 = arith.addf %257, %262 : vector<64x64xf32>
    %c10_164 = arith.constant 10 : index
    %c0_165 = arith.constant 0 : index
    %264 = vector.load %arg20[%c10_164, %c0_165] : memref<80x64xf32, #tpu.memory_space<vmem>>, vector<64x64xf32>
    %c12 = arith.constant 12 : index
    %c0_166 = arith.constant 0 : index
    %c0_167 = arith.constant 0 : index
    %265 = vector.load %arg6[%c12, %c0_166, %c0_167] : memref<14x1x64xf32, #tpu.memory_space<vmem>>, vector<1x1x64xf32>
    %266 = vector.shape_cast %265 : vector<1x1x64xf32> to vector<1x64xf32>
    %267 = vector.broadcast %266 : vector<1x64xf32> to vector<64x64xf32>
    %268 = arith.mulf %264, %267 : vector<64x64xf32>
    %269 = arith.addf %263, %268 : vector<64x64xf32>
    %c11_168 = arith.constant 11 : index
    %c0_169 = arith.constant 0 : index
    %270 = vector.load %arg20[%c11_168, %c0_169] : memref<80x64xf32, #tpu.memory_space<vmem>>, vector<64x64xf32>
    %c13 = arith.constant 13 : index
    %c0_170 = arith.constant 0 : index
    %c0_171 = arith.constant 0 : index
    %271 = vector.load %arg6[%c13, %c0_170, %c0_171] : memref<14x1x64xf32, #tpu.memory_space<vmem>>, vector<1x1x64xf32>
    %272 = vector.shape_cast %271 : vector<1x1x64xf32> to vector<1x64xf32>
    %273 = vector.broadcast %272 : vector<1x64xf32> to vector<64x64xf32>
    %274 = arith.mulf %270, %273 : vector<64x64xf32>
    %275 = arith.addf %269, %274 : vector<64x64xf32>
    %c1_172 = arith.constant 1 : index
    %c0_173 = arith.constant 0 : index
    %c0_174 = arith.constant 0 : index
    %276 = vector.load %arg8[%c1_172, %c0_173, %c0_174] : memref<2x1x64xf32, #tpu.memory_space<vmem>>, vector<1x1x64xf32>
    %277 = vector.shape_cast %276 : vector<1x1x64xf32> to vector<1x64xf32>
    %c1_175 = arith.constant 1 : index
    %c0_176 = arith.constant 0 : index
    %c0_177 = arith.constant 0 : index
    %278 = vector.load %arg9[%c1_175, %c0_176, %c0_177] : memref<2x1x64xf32, #tpu.memory_space<vmem>>, vector<1x1x64xf32>
    %279 = vector.shape_cast %278 : vector<1x1x64xf32> to vector<1x64xf32>
    %cst_178 = arith.constant 1.000000e+00 : f32
    %280 = vector.broadcast %cst_178 : f32 to vector<1x64xf32>
    %281 = arith.subf %280, %4 : vector<1x64xf32>
    %282 = vector.broadcast %4 : vector<1x64xf32> to vector<64x64xf32>
    %283 = arith.mulf %275, %282 : vector<64x64xf32>
    %cst_179 = arith.constant dense<0.000000e+00> : vector<64xf32>
    %284 = vector.multi_reduction <add>, %283, %cst_179 [1] : vector<64x64xf32> to vector<64xf32>
    %285 = vector.shape_cast %284 : vector<64xf32> to vector<64x1xf32>
    %cst_180 = arith.constant dense<0.000000e+00> : vector<64xf32>
    %286 = vector.multi_reduction <add>, %275, %cst_180 [1] : vector<64x64xf32> to vector<64xf32>
    %287 = vector.shape_cast %286 : vector<64xf32> to vector<64x1xf32>
    %288 = vector.broadcast %285 : vector<64x1xf32> to vector<64x64xf32>
    %289 = vector.broadcast %4 : vector<1x64xf32> to vector<64x64xf32>
    %290 = arith.mulf %288, %289 : vector<64x64xf32>
    %291 = arith.subf %287, %285 : vector<64x1xf32>
    %292 = vector.broadcast %291 : vector<64x1xf32> to vector<64x64xf32>
    %293 = vector.broadcast %281 : vector<1x64xf32> to vector<64x64xf32>
    %294 = arith.mulf %292, %293 : vector<64x64xf32>
    %295 = arith.addf %290, %294 : vector<64x64xf32>
    %cst_181 = arith.constant 3.125000e-02 : f32
    %296 = vector.broadcast %cst_181 : f32 to vector<64x64xf32>
    %297 = arith.mulf %295, %296 : vector<64x64xf32>
    %298 = arith.subf %275, %297 : vector<64x64xf32>
    %299 = arith.mulf %298, %298 : vector<64x64xf32>
    %300 = vector.broadcast %4 : vector<1x64xf32> to vector<64x64xf32>
    %301 = arith.mulf %299, %300 : vector<64x64xf32>
    %cst_182 = arith.constant dense<0.000000e+00> : vector<64xf32>
    %302 = vector.multi_reduction <add>, %301, %cst_182 [1] : vector<64x64xf32> to vector<64xf32>
    %303 = vector.shape_cast %302 : vector<64xf32> to vector<64x1xf32>
    %cst_183 = arith.constant dense<0.000000e+00> : vector<64xf32>
    %304 = vector.multi_reduction <add>, %299, %cst_183 [1] : vector<64x64xf32> to vector<64xf32>
    %305 = vector.shape_cast %304 : vector<64xf32> to vector<64x1xf32>
    %306 = vector.broadcast %303 : vector<64x1xf32> to vector<64x64xf32>
    %307 = vector.broadcast %4 : vector<1x64xf32> to vector<64x64xf32>
    %308 = arith.mulf %306, %307 : vector<64x64xf32>
    %309 = arith.subf %305, %303 : vector<64x1xf32>
    %310 = vector.broadcast %309 : vector<64x1xf32> to vector<64x64xf32>
    %311 = vector.broadcast %281 : vector<1x64xf32> to vector<64x64xf32>
    %312 = arith.mulf %310, %311 : vector<64x64xf32>
    %313 = arith.addf %308, %312 : vector<64x64xf32>
    %cst_184 = arith.constant 3.125000e-02 : f32
    %314 = vector.broadcast %cst_184 : f32 to vector<64x64xf32>
    %315 = arith.mulf %313, %314 : vector<64x64xf32>
    %cst_185 = arith.constant 9.99999997E-7 : f32
    %316 = vector.broadcast %cst_185 : f32 to vector<64x64xf32>
    %317 = arith.addf %315, %316 : vector<64x64xf32>
    %318 = math.rsqrt %317 : vector<64x64xf32>
    %319 = arith.mulf %298, %318 : vector<64x64xf32>
    %320 = vector.broadcast %277 : vector<1x64xf32> to vector<64x64xf32>
    %321 = arith.mulf %319, %320 : vector<64x64xf32>
    %322 = vector.broadcast %279 : vector<1x64xf32> to vector<64x64xf32>
    %323 = arith.addf %321, %322 : vector<64x64xf32>
    %c1_186 = arith.constant 1 : index
    %c0_187 = arith.constant 0 : index
    %c0_188 = arith.constant 0 : index
    %324 = vector.load %arg10[%c1_186, %c0_187, %c0_188] : memref<2x64x192xf32, #tpu.memory_space<vmem>>, vector<1x64x192xf32>
    %325 = vector.shape_cast %324 : vector<1x64x192xf32> to vector<64x192xf32>
    %cst_189 = arith.constant dense<0.000000e+00> : vector<64x192xf32>
    %326 = tpu.matmul %323, %325, %cst_189 {dimension_numbers = #tpu.dot_dimension_numbers<[1], [0], [0], [1], [0, 0, 1, 1], [], []>} : vector<64x64xf32>, vector<64x192xf32>, vector<64x192xf32> -> vector<64x192xf32>
    %c1_190 = arith.constant 1 : index
    %c0_191 = arith.constant 0 : index
    %c0_192 = arith.constant 0 : index
    %327 = vector.load %arg11[%c1_190, %c0_191, %c0_192] : memref<2x1x192xf32, #tpu.memory_space<vmem>>, vector<1x1x192xf32>
    %328 = vector.shape_cast %327 : vector<1x1x192xf32> to vector<1x192xf32>
    %329 = vector.broadcast %328 : vector<1x192xf32> to vector<64x192xf32>
    %330 = arith.addf %326, %329 : vector<64x192xf32>
    %cst_193 = arith.constant 5.000000e-01 : f32
    %331 = vector.broadcast %cst_193 : f32 to vector<64x192xf32>
    %332 = arith.mulf %331, %330 : vector<64x192xf32>
    %cst_194 = arith.constant 4.471500e-02 : f32
    %333 = vector.broadcast %cst_194 : f32 to vector<64x192xf32>
    %334 = arith.mulf %333, %330 : vector<64x192xf32>
    %335 = arith.mulf %334, %330 : vector<64x192xf32>
    %336 = arith.mulf %335, %330 : vector<64x192xf32>
    %337 = arith.addf %330, %336 : vector<64x192xf32>
    %cst_195 = arith.constant 0.797884583 : f32
    %338 = vector.broadcast %cst_195 : f32 to vector<64x192xf32>
    %339 = arith.mulf %338, %337 : vector<64x192xf32>
    %340 = math.tanh %339 : vector<64x192xf32>
    %cst_196 = arith.constant 1.000000e+00 : f32
    %341 = vector.broadcast %cst_196 : f32 to vector<64x192xf32>
    %342 = arith.addf %341, %340 : vector<64x192xf32>
    %343 = arith.mulf %332, %342 : vector<64x192xf32>
    %c1_197 = arith.constant 1 : index
    %c0_198 = arith.constant 0 : index
    %c0_199 = arith.constant 0 : index
    %344 = vector.load %arg12[%c1_197, %c0_198, %c0_199] : memref<2x192x64xf32, #tpu.memory_space<vmem>>, vector<1x192x64xf32>
    %345 = vector.shape_cast %344 : vector<1x192x64xf32> to vector<192x64xf32>
    %cst_200 = arith.constant dense<0.000000e+00> : vector<64x64xf32>
    %346 = tpu.matmul %343, %345, %cst_200 {dimension_numbers = #tpu.dot_dimension_numbers<[1], [0], [0], [1], [0, 0, 1, 1], [], []>} : vector<64x192xf32>, vector<192x64xf32>, vector<64x64xf32> -> vector<64x64xf32>
    %c1_201 = arith.constant 1 : index
    %c0_202 = arith.constant 0 : index
    %c0_203 = arith.constant 0 : index
    %347 = vector.load %arg13[%c1_201, %c0_202, %c0_203] : memref<2x1x64xf32, #tpu.memory_space<vmem>>, vector<1x1x64xf32>
    %348 = vector.shape_cast %347 : vector<1x1x64xf32> to vector<1x64xf32>
    %349 = vector.broadcast %348 : vector<1x64xf32> to vector<64x64xf32>
    %350 = arith.addf %346, %349 : vector<64x64xf32>
    %351 = arith.addf %227, %350 : vector<64x64xf32>
    %c0_204 = arith.constant 0 : index
    %c0_205 = arith.constant 0 : index
    %352 = vector.load %arg14[%c0_204, %c0_205] : memref<1x64xf32, #tpu.memory_space<vmem>>, vector<1x64xf32>
    %c0_206 = arith.constant 0 : index
    %c0_207 = arith.constant 0 : index
    %353 = vector.load %arg15[%c0_206, %c0_207] : memref<1x64xf32, #tpu.memory_space<vmem>>, vector<1x64xf32>
    %cst_208 = arith.constant 1.000000e+00 : f32
    %354 = vector.broadcast %cst_208 : f32 to vector<1x64xf32>
    %355 = arith.subf %354, %4 : vector<1x64xf32>
    %356 = vector.broadcast %4 : vector<1x64xf32> to vector<64x64xf32>
    %357 = arith.mulf %351, %356 : vector<64x64xf32>
    %cst_209 = arith.constant dense<0.000000e+00> : vector<64xf32>
    %358 = vector.multi_reduction <add>, %357, %cst_209 [1] : vector<64x64xf32> to vector<64xf32>
    %359 = vector.shape_cast %358 : vector<64xf32> to vector<64x1xf32>
    %cst_210 = arith.constant dense<0.000000e+00> : vector<64xf32>
    %360 = vector.multi_reduction <add>, %351, %cst_210 [1] : vector<64x64xf32> to vector<64xf32>
    %361 = vector.shape_cast %360 : vector<64xf32> to vector<64x1xf32>
    %362 = vector.broadcast %359 : vector<64x1xf32> to vector<64x64xf32>
    %363 = vector.broadcast %4 : vector<1x64xf32> to vector<64x64xf32>
    %364 = arith.mulf %362, %363 : vector<64x64xf32>
    %365 = arith.subf %361, %359 : vector<64x1xf32>
    %366 = vector.broadcast %365 : vector<64x1xf32> to vector<64x64xf32>
    %367 = vector.broadcast %355 : vector<1x64xf32> to vector<64x64xf32>
    %368 = arith.mulf %366, %367 : vector<64x64xf32>
    %369 = arith.addf %364, %368 : vector<64x64xf32>
    %cst_211 = arith.constant 3.125000e-02 : f32
    %370 = vector.broadcast %cst_211 : f32 to vector<64x64xf32>
    %371 = arith.mulf %369, %370 : vector<64x64xf32>
    %372 = arith.subf %351, %371 : vector<64x64xf32>
    %373 = arith.mulf %372, %372 : vector<64x64xf32>
    %374 = vector.broadcast %4 : vector<1x64xf32> to vector<64x64xf32>
    %375 = arith.mulf %373, %374 : vector<64x64xf32>
    %cst_212 = arith.constant dense<0.000000e+00> : vector<64xf32>
    %376 = vector.multi_reduction <add>, %375, %cst_212 [1] : vector<64x64xf32> to vector<64xf32>
    %377 = vector.shape_cast %376 : vector<64xf32> to vector<64x1xf32>
    %cst_213 = arith.constant dense<0.000000e+00> : vector<64xf32>
    %378 = vector.multi_reduction <add>, %373, %cst_213 [1] : vector<64x64xf32> to vector<64xf32>
    %379 = vector.shape_cast %378 : vector<64xf32> to vector<64x1xf32>
    %380 = vector.broadcast %377 : vector<64x1xf32> to vector<64x64xf32>
    %381 = vector.broadcast %4 : vector<1x64xf32> to vector<64x64xf32>
    %382 = arith.mulf %380, %381 : vector<64x64xf32>
    %383 = arith.subf %379, %377 : vector<64x1xf32>
    %384 = vector.broadcast %383 : vector<64x1xf32> to vector<64x64xf32>
    %385 = vector.broadcast %355 : vector<1x64xf32> to vector<64x64xf32>
    %386 = arith.mulf %384, %385 : vector<64x64xf32>
    %387 = arith.addf %382, %386 : vector<64x64xf32>
    %cst_214 = arith.constant 3.125000e-02 : f32
    %388 = vector.broadcast %cst_214 : f32 to vector<64x64xf32>
    %389 = arith.mulf %387, %388 : vector<64x64xf32>
    %cst_215 = arith.constant 9.99999997E-7 : f32
    %390 = vector.broadcast %cst_215 : f32 to vector<64x64xf32>
    %391 = arith.addf %389, %390 : vector<64x64xf32>
    %392 = math.rsqrt %391 : vector<64x64xf32>
    %393 = arith.mulf %372, %392 : vector<64x64xf32>
    %394 = vector.broadcast %352 : vector<1x64xf32> to vector<64x64xf32>
    %395 = arith.mulf %393, %394 : vector<64x64xf32>
    %396 = vector.broadcast %353 : vector<1x64xf32> to vector<64x64xf32>
    %397 = arith.addf %395, %396 : vector<64x64xf32>
    %c0_216 = arith.constant 0 : index
    %c0_217 = arith.constant 0 : index
    %398 = vector.load %arg16[%c0_216, %c0_217] : memref<64x96xf32, #tpu.memory_space<vmem>>, vector<64x96xf32>
    %cst_218 = arith.constant dense<0.000000e+00> : vector<64x96xf32>
    %399 = tpu.matmul %397, %398, %cst_218 {dimension_numbers = #tpu.dot_dimension_numbers<[1], [0], [0], [1], [0, 0, 1, 1], [], []>} : vector<64x64xf32>, vector<64x96xf32>, vector<64x96xf32> -> vector<64x96xf32>
    %c0_219 = arith.constant 0 : index
    %c0_220 = arith.constant 0 : index
    %400 = vector.load %arg17[%c0_219, %c0_220] : memref<1x96xf32, #tpu.memory_space<vmem>>, vector<1x96xf32>
    %401 = vector.broadcast %400 : vector<1x96xf32> to vector<64x96xf32>
    %402 = arith.addf %399, %401 : vector<64x96xf32>
    %c0_221 = arith.constant 0 : index
    %c0_222 = arith.constant 0 : index
    %c0_223 = arith.constant 0 : index
    %403 = vector.load %arg19[%c0_221, %c0_222, %c0_223] : memref<1x64x96xf32, #tpu.memory_space<vmem>>, vector<1x64x96xf32>
    %404 = vector.shape_cast %403 : vector<1x64x96xf32> to vector<64x96xf32>
    %405 = vector.shape_cast %402 : vector<64x96xf32> to vector<1x64x96xf32>
    tpu.vector_store %arg19[%c0_221, %c0_222, %c0_223], %405 {strides = array<i32>} : memref<1x64x96xf32, #tpu.memory_space<vmem>>, vector<1x64x96xf32>,
    return
  }
  func.func @transform_0(%arg0: i32) -> (i32, i32, i32) {
    %c0_i32 = arith.constant 0 : i32
    %c0_i32_0 = arith.constant 0 : i32
    %c0_i32_1 = arith.constant 0 : i32
    return %arg0, %c0_i32, %c0_i32_0 : i32, i32, i32
  }
  func.func @transform_1(%arg0: i32) -> (i32, i32, i32) {
    %c0_i32 = arith.constant 0 : i32
    %c0_i32_0 = arith.constant 0 : i32
    %c0_i32_1 = arith.constant 0 : i32
    %c0_i32_2 = arith.constant 0 : i32
    return %c0_i32, %c0_i32_0, %c0_i32_1 : i32, i32, i32
  }
  func.func @transform_2(%arg0: i32) -> (i32, i32) {
    %c0_i32 = arith.constant 0 : i32
    %c0_i32_0 = arith.constant 0 : i32
    %c0_i32_1 = arith.constant 0 : i32
    return %c0_i32, %c0_i32_0 : i32, i32
  }
  func.func @transform_3(%arg0: i32) -> (i32, i32) {
    %c0_i32 = arith.constant 0 : i32
    %c0_i32_0 = arith.constant 0 : i32
    %c0_i32_1 = arith.constant 0 : i32
    return %c0_i32, %c0_i32_0 : i32, i32
  }
  func.func @transform_4(%arg0: i32) -> (i32, i32) {
    %c0_i32 = arith.constant 0 : i32
    %c0_i32_0 = arith.constant 0 : i32
    %c0_i32_1 = arith.constant 0 : i32
    return %c0_i32, %c0_i32_0 : i32, i32
  }
  func.func @transform_5(%arg0: i32) -> (i32, i32, i32) {
    %c0_i32 = arith.constant 0 : i32
    %c0_i32_0 = arith.constant 0 : i32
    %c0_i32_1 = arith.constant 0 : i32
    %c0_i32_2 = arith.constant 0 : i32
    return %c0_i32, %c0_i32_0, %c0_i32_1 : i32, i32, i32
  }
  func.func @transform_6(%arg0: i32) -> (i32, i32, i32) {
    %c0_i32 = arith.constant 0 : i32
    %c0_i32_0 = arith.constant 0 : i32
    %c0_i32_1 = arith.constant 0 : i32
    %c0_i32_2 = arith.constant 0 : i32
    return %c0_i32, %c0_i32_0, %c0_i32_1 : i32, i32, i32
  }
  func.func @transform_7(%arg0: i32) -> (i32, i32, i32) {
    %c0_i32 = arith.constant 0 : i32
    %c0_i32_0 = arith.constant 0 : i32
    %c0_i32_1 = arith.constant 0 : i32
    %c0_i32_2 = arith.constant 0 : i32
    return %c0_i32, %c0_i32_0, %c0_i32_1 : i32, i32, i32
  }
  func.func @transform_8(%arg0: i32) -> (i32, i32, i32) {
    %c0_i32 = arith.constant 0 : i32
    %c0_i32_0 = arith.constant 0 : i32
    %c0_i32_1 = arith.constant 0 : i32
    %c0_i32_2 = arith.constant 0 : i32
    return %c0_i32, %c0_i32_0, %c0_i32_1 : i32, i32, i32
  }
  func.func @transform_9(%arg0: i32) -> (i32, i32, i32) {
    %c0_i32 = arith.constant 0 : i32
    %c0_i32_0 = arith.constant 0 : i32
    %c0_i32_1 = arith.constant 0 : i32
    %c0_i32_2 = arith.constant 0 : i32
    return %c0_i32, %c0_i32_0, %c0_i32_1 : i32, i32, i32
  }
  func.func @transform_10(%arg0: i32) -> (i32, i32, i32) {
    %c0_i32 = arith.constant 0 : i32
    %c0_i32_0 = arith.constant 0 : i32
    %c0_i32_1 = arith.constant 0 : i32
    %c0_i32_2 = arith.constant 0 : i32
    return %c0_i32, %c0_i32_0, %c0_i32_1 : i32, i32, i32
  }
  func.func @transform_11(%arg0: i32) -> (i32, i32, i32) {
    %c0_i32 = arith.constant 0 : i32
    %c0_i32_0 = arith.constant 0 : i32
    %c0_i32_1 = arith.constant 0 : i32
    %c0_i32_2 = arith.constant 0 : i32
    return %c0_i32, %c0_i32_0, %c0_i32_1 : i32, i32, i32
  }
  func.func @transform_12(%arg0: i32) -> (i32, i32, i32) {
    %c0_i32 = arith.constant 0 : i32
    %c0_i32_0 = arith.constant 0 : i32
    %c0_i32_1 = arith.constant 0 : i32
    %c0_i32_2 = arith.constant 0 : i32
    return %c0_i32, %c0_i32_0, %c0_i32_1 : i32, i32, i32
  }
  func.func @transform_13(%arg0: i32) -> (i32, i32) {
    %c0_i32 = arith.constant 0 : i32
    %c0_i32_0 = arith.constant 0 : i32
    %c0_i32_1 = arith.constant 0 : i32
    return %c0_i32, %c0_i32_0 : i32, i32
  }
  func.func @transform_14(%arg0: i32) -> (i32, i32) {
    %c0_i32 = arith.constant 0 : i32
    %c0_i32_0 = arith.constant 0 : i32
    %c0_i32_1 = arith.constant 0 : i32
    return %c0_i32, %c0_i32_0 : i32, i32
  }
  func.func @transform_15(%arg0: i32) -> (i32, i32) {
    %c0_i32 = arith.constant 0 : i32
    %c0_i32_0 = arith.constant 0 : i32
    %c0_i32_1 = arith.constant 0 : i32
    return %c0_i32, %c0_i32_0 : i32, i32
  }
  func.func @transform_16(%arg0: i32) -> (i32, i32) {
    %c0_i32 = arith.constant 0 : i32
    %c0_i32_0 = arith.constant 0 : i32
    %c0_i32_1 = arith.constant 0 : i32
    return %c0_i32, %c0_i32_0 : i32, i32
  }
  func.func @transform_17(%arg0: i32) -> (i32, i32) {
    %c0_i32 = arith.constant 0 : i32
    %c0_i32_0 = arith.constant 0 : i32
    %c0_i32_1 = arith.constant 0 : i32
    return %c0_i32, %c0_i32_0 : i32, i32
  }
  func.func @transform_18(%arg0: i32) -> (i32, i32, i32) {
    %c0_i32 = arith.constant 0 : i32
    %c0_i32_0 = arith.constant 0 : i32
    %c0_i32_1 = arith.constant 0 : i32
    return %arg0, %c0_i32, %c0_i32_0 : i32, i32, i32
  }
}

</mosaic_0001>

<bundles_post_ra>
// kernel: mul.33
= control target key start
LH: loop header
LB: loop body
LE: loop exit
PB: predicated region body
PF: predicated region fallthrough
CT: control target
= control target key end

     0   :  { %s34_s0 = inlined_call_operand.vmem [shape: f32[1,32], index: 0, kind: input, shape index: {}]   ;;  %s35_s1 = inlined_call_operand.vmem [shape: f32[1,32], index: 1, kind: input, shape index: {}]   ;;  %s36_s2 = inlined_call_operand.vmem [shape: f32[1,32], index: 2, kind: output, shape index: {}]  }
   0x1   :  { %v3_v0 = vld [vmem:[%s34_s0] sm:$0x1] }
   0x2   :  { %v4_v1 = vld [vmem:[%s35_s1] sm:$0x1] }
   0x3   :  { %v7_v2 = vmul.f32 %v4_v1, %v3_v0 }
   0x5   :  { %9 = vst [vmem:[%s36_s2] sm:$0x1] %v7_v2 }

// kernel: apnet_forward.1
= control target key start
LH: loop header
LB: loop body
LE: loop exit
PB: predicated region body
PF: predicated region fallthrough
CT: control target
= control target key end

     0   :  { %s5580_s27 = smov 0   ;;  %s7694_s0 = inlined_call_operand.vmem [shape: f32[2,70,64], index: 0, kind: input, shape index: {}]   ;;  %s7695_s1 = inlined_call_operand.vmem [shape: f32[7,64,64], index: 1, kind: input, shape index: {}]   ;;  %s7696_s2 = inlined_call_operand.vmem [shape: f32[1,64], index: 2, kind: input, shape index: {}]   ;;  %s7697_s3 = inlined_call_operand.vmem [shape: f32[1,64], index: 3, kind: input, shape index: {}]   ;;  %s7698_s4 = inlined_call_operand.vmem [shape: f32[1,64], index: 4, kind: input, shape index: {}]   ;;  %s7699_s5 = inlined_call_operand.vmem [shape: f32[14,1,64], index: 5, kind: input, shape index: {}]   ;;  %s7700_s6 = inlined_call_operand.vmem [shape: f32[2,1,64], index: 6, kind: input, shape index: {}]   ;;  %s7701_s7 = inlined_call_operand.vmem [shape: f32[2,1,64], index: 7, kind: input, shape index: {}]   ;;  %s7702_s8 = inlined_call_operand.vmem [shape: f32[2,1,64], index: 8, kind: input, shape index: {}]   ;;  %s7703_s9 = inlined_call_operand.vmem [shape: f32[2,64,192], index: 9, kind: input, shape index: {}]   ;;  %s7704_s10 = inlined_call_operand.vmem [shape: f32[2,1,192], index: 10, kind: input, shape index: {}]   ;;  %s7705_s11 = inlined_call_operand.vmem [shape: f32[2,192,64], index: 11, kind: input, shape index: {}]   ;;  %s7706_s12 = inlined_call_operand.vmem [shape: f32[2,1,64], index: 12, kind: input, shape index: {}]   ;;  %s7707_s13 = inlined_call_operand.vmem [shape: f32[1,64], index: 13, kind: input, shape index: {}]   ;;  %s7708_s14 = inlined_call_operand.vmem [shape: f32[1,64], index: 14, kind: input, shape index: {}]   ;;  %s7709_s15 = inlined_call_operand.vmem [shape: f32[64,96], index: 15, kind: input, shape index: {}]   ;;  %s7710_s16 = inlined_call_operand.vmem [shape: f32[1,96], index: 16, kind: input, shape index: {}]   ;;  %s7711_s17 = inlined_call_operand.vmem [shape: f32[64,64], index: 17, kind: input, shape index: {}]   ;;  %s7712_s18 = inlined_call_operand.vmem [shape: f32[2,64,96], index: 18, kind: output, shape index: {}]  }
   0x1   :  { %7714 = sst [smem:[#allocation3_spill]] %s7694_s0 }
   0x2   :  { %7715 = sst [smem:[#allocation4_spill]] %s7695_s1 }
   0x3   :  { %7716 = sst [smem:[#allocation5_spill]] %s7696_s2 }
   0x4 LB: > { %s4632_s28 = sadd.s32 4294967295, %s5482_s27   ;;  %p4636_p0 = scmp.ge.s32.totalorder %s5482_s27, 1  ;;  %s5482_s27 = sphi %s5580_s27, %s28_s27  }
   0x5   : > { %p512_p1 = scmp.lt.s32.totalorder %s5482_s27, 3 }
   0x7   : > { %p513_p2 = pnand %p4636_p0, %p512_p1 }
   0x8   : > { %s7717_s0 = sld [smem:[#allocation4_spill]] (!%p513_p2)  ;;  %p566_p3 = scmp.lt.s32.totalorder (!%p513_p2), %s4632_s28, 1 }
   0x9   : > { %516 = sbr.rel (%p513_p2) target bundleno = 3118 (0xc2e), region = 92  ;;  %s7718_s1 = sld [smem:[#allocation3_spill]] (!%p513_p2) }
   0xa   : > { %s7719_s2 = sld [smem:[#allocation5_spill]] (!%p513_p2) }
   0xe   : > { %v612_v0 = vld [vmem:[%s7717_s0 + $0x38] sm:$0xff]  ;;  %v611_v1 = vld [vmem:[%s7717_s0 + $0x30] sm:$0xff]  ;;  %v610_v4 = vld [vmem:[%s7717_s0 + $0x28] sm:$0xff]  ;;  %s7721_s28 = smov (!%p566_p3, %s4632_s28), 1  ;;  %vm613_vm0 = vcmask 523264   ;;  %vm4568_vm2 = vcmask 785408  }
   0xf   : > { %v4657_v2 = vld [vmem:[%s7717_s0 + $0x78] sm:$0xff]  ;;  %5050 = vmatprep.subr.mxu0 %v612_v0  ;;  %v4656_v3 = vld [vmem:[%s7717_s0 + $0x70] sm:$0xff]  ;;  %v4655_v5 = vld [vmem:[%s7717_s0 + $0x68] sm:$0xff]  ;;  %s5330_s20 = smul.u32 72, %s7721_s28  ;;  %s4889_s23 = sshll.u32 %s7721_s28, 6 }
  0x10   : > { %5078 = vmatprep.subr.mxu1 %v4657_v2  ;;  %5051 = vmatpush3.msra.mxu0 %v612_v0  ;;  %v609_v6 = vld [vmem:[%s7717_s0 + $0x20] sm:$0xff]  ;;  %v608_v8 = vld [vmem:[%s7717_s0 + $0x18] sm:$0xff]  ;;  %v607_v10 = vld [vmem:[%s7717_s0 + $0x10] sm:$0xff]  ;;  %s575_s29 = scalar_lea.vmem %s7712_s18, %s4889_s23 }
  0x11   : > { %5079 = vmatpush3.msra.mxu1 %v4657_v2  ;;  %5052 = vmatprep.subr.mxu0 %v611_v1  ;;  %v4654_v7 = vld [vmem:[%s7717_s0 + $0x60] sm:$0xff]  ;;  %v4653_v9 = vld [vmem:[%s7717_s0 + $0x58] sm:$0xff]  ;;  %v4652_v11 = vld [vmem:[%s7717_s0 + $0x50] sm:$0xff]  ;;  %s5630_s21 = scalar_lea.vmem %s7718_s1, %s5330_s20 }
  0x12   : > { %5080 = vmatprep.subr.mxu1 %v4656_v3  ;;  %5053 = vmatpush3.msra.mxu0 %v611_v1  ;;  %v606_v12 = vld [vmem:[%s7717_s0 + $0x8] sm:$0xff]  ;;  %v597_v14 = vld [vmem:[%s5630_s21] sm:$0xff]  ;;  %v4673_v18 = vld [vmem:[%s7717_s0 + $0xb8] sm:$0xff] }
  0x13   : > { %5081 = vmatpush3.msra.mxu1 %v4656_v3  ;;  %5054 = vmatprep.subr.mxu0 %v610_v4  ;;  %v4651_v13 = vld [vmem:[%s7717_s0 + $0x48] sm:$0xff]  ;;  %v605_v15 = vld [vmem:[%s7717_s0] sm:$0xff]  ;;  %v4672_v21 = vld [vmem:[%s7717_s0 + $0xb0] sm:$0xff] }
  0x14   : > { %5082 = vmatprep.subr.mxu1 %v4655_v5  ;;  %5055 = vmatpush3.msra.mxu0 %v610_v4  ;;  %v4650_v16 = vld [vmem:[%s7717_s0 + $0x40] sm:$0xff]  ;;  %v598_v17 = vld [vmem:[%s5630_s21 + $0x8] sm:$0xff]  ;;  %v4689_v22 = vld [vmem:[%s7717_s0 + $0xf8] sm:$0xff] }
  0x15   : > { %5083 = vmatpush3.msra.mxu1 %v4655_v5  ;;  %5056 = vmatprep.subr.mxu0 %v609_v6  ;;  %v751_v19 = vld [vmem:[%s5630_s21 + $0x1] sm:$0xff]  ;;  %v752_v20 = vld [vmem:[%s5630_s21 + $0x9] sm:$0xff]  ;;  %v600_v24 = vld [vmem:[%s5630_s21 + $0x18] sm:$0xff] }
  0x16   : > { %5084 = vmatprep.subr.mxu1 %v4654_v7  ;;  %5057 = vmatpush3.msra.mxu0 %v609_v6  ;;  %v599_v23 = vld [vmem:[%s5630_s21 + $0x10] sm:$0xff]  ;;  %v4671_v25 = vld [vmem:[%s7717_s0 + $0xa8] sm:$0xff]  ;;  %v4670_v28 = vld [vmem:[%s7717_s0 + $0xa0] sm:$0xff] }
  0x17   : > { %5085 = vmatpush3.msra.mxu1 %v4654_v7  ;;  %5058 = vmatprep.subr.mxu0 %v608_v8  ;;  %v4688_v26 = vld [vmem:[%s7717_s0 + $0xf0] sm:$0xff]  ;;  %v754_v29 = vld [vmem:[%s5630_s21 + $0x19] sm:$0xff]  ;;  %v4687_v30 = vld [vmem:[%s7717_s0 + $0xe8] sm:$0xff] }
  0x18   : > { %5086 = vmatprep.subr.mxu1 %v4653_v9  ;;  %5059 = vmatpush3.msra.mxu0 %v608_v8  ;;  %v753_v27 = vld [vmem:[%s5630_s21 + $0x11] sm:$0xff]  ;;  %v601_v31 = vld [vmem:[%s5630_s21 + $0x20] sm:$0xff]  ;;  %v602_v32 = vld [vmem:[%s5630_s21 + $0x28] sm:$0xff] }
  0x19   : > { %5087 = vmatpush3.msra.mxu1 %v4653_v9  ;;  %5060 = vmatprep.subr.mxu0 %v607_v10  ;;  %v4669_v33 = vld [vmem:[%s7717_s0 + $0x98] sm:$0xff]  ;;  %v4686_v34 = vld [vmem:[%s7717_s0 + $0xe0] sm:$0xff]  ;;  %v4668_v36 = vld [vmem:[%s7717_s0 + $0x90] sm:$0xff] }
  0x1a   : > { %5088 = vmatprep.subr.mxu1 %v4652_v11  ;;  %5061 = vmatpush3.msra.mxu0 %v607_v10  ;;  %v755_v35 = vld [vmem:[%s5630_s21 + $0x21] sm:$0xff]  ;;  %v756_v37 = vld [vmem:[%s5630_s21 + $0x29] sm:$0xff]  ;;  %v4685_v38 = vld [vmem:[%s7717_s0 + $0xd8] sm:$0xff] }
  0x1b   : > { %5089 = vmatpush3.msra.mxu1 %v4652_v11  ;;  %5062 = vmatprep.subr.mxu0 %v606_v12  ;;  %v603_v39 = vld [vmem:[%s5630_s21 + $0x30] sm:$0xff]  ;;  %v604_v40 = vld [vmem:[%s5630_s21 + $0x38] sm:$0xff]  ;;  %v4667_v41 = vld [vmem:[%s7717_s0 + $0x88] sm:$0xff] }
  0x1c   : > { %5090 = vmatprep.subr.mxu1 %v4651_v13  ;;  %5063 = vmatpush3.msra.mxu0 %v606_v12  ;;  %v4684_v42 = vld [vmem:[%s7717_s0 + $0xd0] sm:$0xff]  ;;  %v4666_v44 = vld [vmem:[%s7717_s0 + $0x80] sm:$0xff]  ;;  %v4683_v46 = vld [vmem:[%s7717_s0 + $0xc8] sm:$0xff] }
  0x1d   : > { %5066 = vmatprep.mubr.msk.f32.mxu0 %vm613_vm0, %v597_v14  ;;  %5064 = vmatprep.subr.mxu0 %v605_v15  ;;  %v757_v43 = vld [vmem:[%s5630_s21 + $0x31] sm:$0xff]  ;;  %v758_v45 = vld [vmem:[%s5630_s21 + $0x39] sm:$0xff]  ;;  %v905_v47 = vld [vmem:[%s5630_s21 + $0x2] sm:$0xff] }
  0x1e   : > { %5091 = vmatpush3.msra.mxu1 %v4651_v13  ;;  %5065 = vmatpush3.msra.mxu0 %v605_v15  ;;  %v906_v48 = vld [vmem:[%s5630_s21 + $0xa] sm:$0xff]  ;;  %v4682_v49 = vld [vmem:[%s7717_s0 + $0xc0] sm:$0xff]  ;;  %v4705_v50 = vld [vmem:[%s7717_s0 + $0x138] sm:$0xff] }
  0x1f   : > { %5092 = vmatprep.subr.mxu1 %v4650_v16  ;;  %5067 = vmatmul.mubr.msk.f32.vlgmr.msra.gmra.mxu0 %vm613_vm0, %v598_v17  ;;  %v1059_v51 = vld [vmem:[%s5630_s21 + $0x3] sm:$0xff]  ;;  %v1060_v52 = vld [vmem:[%s5630_s21 + $0xb] sm:$0xff]  ;;  %v4721_v54 = vld [vmem:[%s7717_s0 + $0x178] sm:$0xff] }
  0x20   : > { %5106 = vmatprep.subr.mxu0 %v4673_v18  ;;  %5093 = vmatpush3.msra.mxu1 %v4650_v16  ;;  %v4704_v53 = vld [vmem:[%s7717_s0 + $0x130] sm:$0xff]  ;;  %v908_v56 = vld [vmem:[%s5630_s21 + $0x1a] sm:$0xff]  ;;  %v4703_v57 = vld [vmem:[%s7717_s0 + $0x128] sm:$0xff] }
  0x21   : > { %5094 = vmatprep.mubr.msk.f32.mxu1 %vm613_vm0, %v751_v19  ;;  %5107 = vmatpush3.msra.mxu0 %v4673_v18  ;;  %v907_v55 = vld [vmem:[%s5630_s21 + $0x12] sm:$0xff]  ;;  %v4702_v60 = vld [vmem:[%s7717_s0 + $0x120] sm:$0xff]  ;;  %v4719_v62 = vld [vmem:[%s7717_s0 + $0x168] sm:$0xff] }
  0x22   : > { %5095 = vmatmul.mubr.msk.f32.vlgmr.msra.gmra.mxu1 %vm613_vm0, %v752_v20  ;;  %5108 = vmatprep.subr.mxu0 %v4672_v21  ;;  %v4720_v58 = vld [vmem:[%s7717_s0 + $0x170] sm:$0xff]  ;;  %v1062_v61 = vld [vmem:[%s5630_s21 + $0x1b] sm:$0xff]  ;;  %v1063_v3 = vld [vmem:[%s5630_s21 + $0x23] sm:$0xff] }
  0x23   : > { %5134 = vmatprep.subr.mxu1 %v4689_v22  ;;  %5069 = vmatprep.mubr.msk.f32.mxu0 %vm613_vm0, %v599_v23  ;;  %v1061_v59 = vld [vmem:[%s5630_s21 + $0x13] sm:$0xff]  ;;  %v909_v63 = vld [vmem:[%s5630_s21 + $0x22] sm:$0xff]  ;;  %v910_v0 = vld [vmem:[%s5630_s21 + $0x2a] sm:$0xff] }
  0x24   : > { %5109 = vmatpush3.msra.mxu0 %v4672_v21  ;;  %5135 = vmatpush3.msra.mxu1 %v4689_v22  ;;  %v4701_v1 = vld [vmem:[%s7717_s0 + $0x118] sm:$0xff]  ;;  %v4718_v2 = vld [vmem:[%s7717_s0 + $0x160] sm:$0xff]  ;;  %v4700_v4 = vld [vmem:[%s7717_s0 + $0x110] sm:$0xff] }
  0x25   : > { %5070 = vmatmul.mubr.msk.f32.gmra.mxu0 %vm613_vm0, %v600_v24  ;;  %5110 = vmatprep.subr.mxu0 %v4671_v25  ;;  %v1064_v5 = vld [vmem:[%s5630_s21 + $0x2b] sm:$0xff]  ;;  %v4717_v6 = vld [vmem:[%s7717_s0 + $0x158] sm:$0xff]  ;;  %v4698_v12 = vld [vmem:[%s7717_s0 + $0x100] sm:$0xff] }
  0x26   : > { %5136 = vmatprep.subr.mxu1 %v4688_v26  ;;  %5097 = vmatprep.mubr.msk.f32.mxu1 %vm613_vm0, %v753_v27  ;;  %v911_v7 = vld [vmem:[%s5630_s21 + $0x32] sm:$0xff]  ;;  %v912_v8 = vld [vmem:[%s5630_s21 + $0x3a] sm:$0xff]  ;;  %v4699_v9 = vld [vmem:[%s7717_s0 + $0x108] sm:$0xff] }
  0x27   : > { %5111 = vmatpush3.msra.mxu0 %v4671_v25  ;;  %5137 = vmatpush3.msra.mxu1 %v4688_v26  ;;  %v4716_v10 = vld [vmem:[%s7717_s0 + $0x150] sm:$0xff]  ;;  %v1066_v13 = vld [vmem:[%s5630_s21 + $0x3b] sm:$0xff]  ;;  %v4715_v14 = vld [vmem:[%s7717_s0 + $0x148] sm:$0xff] }
  0x28   : > { %5112 = vmatprep.subr.mxu0 %v4670_v28  ;;  %5098 = vmatmul.mubr.msk.f32.gmra.mxu1 %vm613_vm0, %v754_v29  ;;  %v1065_v11 = vld [vmem:[%s5630_s21 + $0x33] sm:$0xff]  ;;  %v1213_v15 = vld [vmem:[%s5630_s21 + $0x4] sm:$0xff]  ;;  %v1216_v24 = vld [vmem:[%s5630_s21 + $0x1c] sm:$0xff] }
  0x29   : > { %5138 = vmatprep.subr.mxu1 %v4687_v30  ;;  %5072 = vmatprep.mubr.msk.f32.mxu0 %vm613_vm0, %v601_v31  ;;  %v1214_v16 = vld [vmem:[%s5630_s21 + $0xc] sm:$0xff]  ;;  %v4714_v17 = vld [vmem:[%s7717_s0 + $0x140] sm:$0xff]  ;;  %v4737_v18 = vld [vmem:[%s7717_s0 + $0x1b8] sm:$0xff] }
  0x2a   : > { %5113 = vmatpush3.msra.mxu0 %v4670_v28  ;;  %5139 = vmatpush3.msra.mxu1 %v4687_v30  ;;  %v1367_v19 = vld [vmem:[%s5630_s21 + $0x5] sm:$0xff]  ;;  %v1368_v20 = vld [vmem:[%s5630_s21 + $0xd] sm:$0xff]  ;;  %v1369_v23 = vld [vmem:[%s5630_s21 + $0x15] sm:$0xff] }
  0x2b   : > { %5073 = vmatmul.mubr.msk.f32.gmra.mxu0 %vm613_vm0, %v602_v32  ;;  %5114 = vmatprep.subr.mxu0 %v4669_v33  ;;  %v4736_v21 = vld [vmem:[%s7717_s0 + $0x1b0] sm:$0xff]  ;;  %v4735_v25 = vld [vmem:[%s7717_s0 + $0x1a8] sm:$0xff]  ;;  %v1370_v26 = vld [vmem:[%s5630_s21 + $0x1d] sm:$0xff] }
  0x2c   : > { %5140 = vmatprep.subr.mxu1 %v4686_v34  ;;  %5100 = vmatprep.mubr.msk.f32.mxu1 %vm613_vm0, %v755_v35  ;;  %v1215_v22 = vld [vmem:[%s5630_s21 + $0x14] sm:$0xff]  ;;  %v4734_v27 = vld [vmem:[%s7717_s0 + $0x1a0] sm:$0xff]  ;;  %v1218_v30 = vld [vmem:[%s5630_s21 + $0x2c] sm:$0xff] }
  0x2d   : > { %5115 = vmatpush3.msra.mxu0 %v4669_v33  ;;  %5141 = vmatpush3.msra.mxu1 %v4686_v34  ;;  %v1217_v28 = vld [vmem:[%s5630_s21 + $0x24] sm:$0xff]  ;;  %v4733_v31 = vld [vmem:[%s7717_s0 + $0x198] sm:$0xff]  ;;  %v1372_v32 = vld [vmem:[%s5630_s21 + $0x2d] sm:$0xff] }
  0x2e   : > { %5116 = vmatprep.subr.mxu0 %v4668_v36  ;;  %5101 = vmatmul.mubr.msk.f32.gmra.mxu1 %vm613_vm0, %v756_v37  ;;  %v1371_v29 = vld [vmem:[%s5630_s21 + $0x25] sm:$0xff]  ;;  %v4732_v33 = vld [vmem:[%s7717_s0 + $0x190] sm:$0xff] }
  0x2f   : > { %5142 = vmatprep.subr.mxu1 %v4685_v38  ;;  %5075 = vmatprep.mubr.msk.f32.mxu0 %vm613_vm0, %v603_v39  ;;  %v1219_v34 = vld [vmem:[%s5630_s21 + $0x34] sm:$0xff]  ;;  %v4731_v37 = vld [vmem:[%s7717_s0 + $0x188] sm:$0xff]  ;;  %v4730_v39 = vld [vmem:[%s7717_s0 + $0x180] sm:$0xff] }
  0x30   : > { %5117 = vmatpush3.msra.mxu0 %v4668_v36  ;;  %5143 = vmatpush3.msra.mxu1 %v4685_v38  ;;  %v1373_v35 = vld [vmem:[%s5630_s21 + $0x35] sm:$0xff]  ;;  %v1374_v38 = vld [vmem:[%s5630_s21 + $0x3d] sm:$0xff] }
  0x31   : > { %5076 = vmatmul.mubr.msk.f32.gmra.mxu0 %vm613_vm0, %v604_v40  ;;  %5118 = vmatprep.subr.mxu0 %v4667_v41  ;;  %v1220_v36 = vld [vmem:[%s5630_s21 + $0x3c] sm:$0xff]  ;;  %v1521_v40 = vld [vmem:[%s5630_s21 + $0x6] sm:$0xff] }
  0x32   : > { %5144 = vmatprep.subr.mxu1 %v4684_v42  ;;  %5103 = vmatprep.mubr.msk.f32.mxu1 %vm613_vm0, %v757_v43  ;;  %v1524_v43 = vld [vmem:[%s5630_s21 + $0x1e] sm:$0xff] }
  0x33   : > { %5119 = vmatpush3.msra.mxu0 %v4667_v41  ;;  %5145 = vmatpush3.msra.mxu1 %v4684_v42  ;;  %v1522_v41 = vld [vmem:[%s5630_s21 + $0xe] sm:$0xff]  ;;  %v1523_v42 = vld [vmem:[%s5630_s21 + $0x16] sm:$0xff] }
  0x34   : > { %5120 = vmatprep.subr.mxu0 %v4666_v44  ;;  %5104 = vmatmul.mubr.msk.f32.gmra.mxu1 %vm613_vm0, %v758_v45  ;;  %v1526_v45 = vld [vmem:[%s5630_s21 + $0x2e] sm:$0xff] }
  0x35   : > { %5146 = vmatprep.subr.mxu1 %v4683_v46  ;;  %5121 = vmatpush3.msra.mxu0 %v4666_v44  ;;  %v1525_v44 = vld [vmem:[%s5630_s21 + $0x26] sm:$0xff] }
  0x36   : > { %5122 = vmatprep.mubr.msk.f32.mxu0 %vm613_vm0, %v905_v47  ;;  %5147 = vmatpush3.msra.mxu1 %v4683_v46  ;;  %v1527_v46 = vld [vmem:[%s5630_s21 + $0x36] sm:$0xff]  ;;  %v1528_v47 = vld [vmem:[%s5630_s21 + $0x3e] sm:$0xff] }
  0x37   : > { %5123 = vmatmul.mubr.msk.f32.vlgmr.msra.gmra.mxu0 %vm613_vm0, %v906_v48  ;;  %5148 = vmatprep.subr.mxu1 %v4682_v49  ;;  %v5484_v48 = vmov 0.0  }
  0x38   : > { %5162 = vmatprep.subr.mxu0 %v4705_v50  ;;  %5149 = vmatpush3.msra.mxu1 %v4682_v49  ;;  %1938 = vst.msk [vmem:[#allocation2] sm:$0xff] %vm613_vm0, %v5484_v48  ;;  %1939 = vst.msk [vmem:[#allocation2 + $0x48] sm:$0xff] %vm613_vm0, %v5484_v48 }
  0x39   : > { %5150 = vmatprep.mubr.msk.f32.mxu1 %vm613_vm0, %v1059_v51  ;;  %5163 = vmatpush3.msra.mxu0 %v4705_v50 }
  0x3a   : > { %5151 = vmatmul.mubr.msk.f32.vlgmr.msra.gmra.mxu1 %vm613_vm0, %v1060_v52  ;;  %5164 = vmatprep.subr.mxu0 %v4704_v53 }
  0x3b   : > { %5190 = vmatprep.subr.mxu1 %v4721_v54  ;;  %5125 = vmatprep.mubr.msk.f32.mxu0 %vm613_vm0, %v907_v55 }
  0x3c   : > { %5165 = vmatpush3.msra.mxu0 %v4704_v53  ;;  %5191 = vmatpush3.msra.mxu1 %v4721_v54 }
  0x3d   : > { %5126 = vmatmul.mubr.msk.f32.gmra.mxu0 %vm613_vm0, %v908_v56  ;;  %5166 = vmatprep.subr.mxu0 %v4703_v57 }
  0x3e   : > { %5192 = vmatprep.subr.mxu1 %v4720_v58  ;;  %5153 = vmatprep.mubr.msk.f32.mxu1 %vm613_vm0, %v1061_v59 }
  0x3f   : > { %5167 = vmatpush3.msra.mxu0 %v4703_v57  ;;  %5193 = vmatpush3.msra.mxu1 %v4720_v58 }
  0x40   : > { %5168 = vmatprep.subr.mxu0 %v4702_v60  ;;  %5154 = vmatmul.mubr.msk.f32.gmra.mxu1 %vm613_vm0, %v1062_v61 }
  0x41   : > { %5194 = vmatprep.subr.mxu1 %v4719_v62  ;;  %5128 = vmatprep.mubr.msk.f32.mxu0 %vm613_vm0, %v909_v63 }
  0x42   : > { %5169 = vmatpush3.msra.mxu0 %v4702_v60  ;;  %5195 = vmatpush3.msra.mxu1 %v4719_v62 }
  0x43   : > { %5129 = vmatmul.mubr.msk.f32.gmra.mxu0 %vm613_vm0, %v910_v0  ;;  %5170 = vmatprep.subr.mxu0 %v4701_v1 }
  0x44   : > { %5196 = vmatprep.subr.mxu1 %v4718_v2  ;;  %5156 = vmatprep.mubr.msk.f32.mxu1 %vm613_vm0, %v1063_v3 }
  0x45   : > { %5171 = vmatpush3.msra.mxu0 %v4701_v1  ;;  %5197 = vmatpush3.msra.mxu1 %v4718_v2 }
  0x46   : > { %5172 = vmatprep.subr.mxu0 %v4700_v4  ;;  %5157 = vmatmul.mubr.msk.f32.gmra.mxu1 %vm613_vm0, %v1064_v5 }
  0x47   : > { %5198 = vmatprep.subr.mxu1 %v4717_v6  ;;  %5131 = vmatprep.mubr.msk.f32.mxu0 %vm613_vm0, %v911_v7 }
  0x48   : > { %5173 = vmatpush3.msra.mxu0 %v4700_v4  ;;  %5199 = vmatpush3.msra.mxu1 %v4717_v6 }
  0x49   : > { %5132 = vmatmul.mubr.msk.f32.gmra.mxu0 %vm613_vm0, %v912_v8  ;;  %5174 = vmatprep.subr.mxu0 %v4699_v9 }
  0x4a   : > { %5200 = vmatprep.subr.mxu1 %v4716_v10  ;;  %5159 = vmatprep.mubr.msk.f32.mxu1 %vm613_vm0, %v1065_v11 }
  0x4b   : > { %5175 = vmatpush3.msra.mxu0 %v4699_v9  ;;  %5201 = vmatpush3.msra.mxu1 %v4716_v10 }
  0x4c   : > { %5176 = vmatprep.subr.mxu0 %v4698_v12  ;;  %5160 = vmatmul.mubr.msk.f32.gmra.mxu1 %vm613_vm0, %v1066_v13 }
  0x4d   : > { %5202 = vmatprep.subr.mxu1 %v4715_v14  ;;  %5177 = vmatpush3.msra.mxu0 %v4698_v12 }
  0x4e   : > { %5178 = vmatprep.mubr.msk.f32.mxu0 %vm613_vm0, %v1213_v15  ;;  %5203 = vmatpush3.msra.mxu1 %v4715_v14  ;;  %v5902_v15 = vld [vmem:[%s7719_s2] ss:$0 sm:$0xff] }
  0x4f   : > { %5179 = vmatmul.mubr.msk.f32.vlgmr.msra.gmra.mxu0 %vm613_vm0, %v1214_v16  ;;  %5204 = vmatprep.subr.mxu1 %v4714_v17 }
  0x50   : > { %5218 = vmatprep.subr.mxu0 %v4737_v18  ;;  %5205 = vmatpush3.msra.mxu1 %v4714_v17 }
  0x51   : > { %5206 = vmatprep.mubr.msk.f32.mxu1 %vm613_vm0, %v1367_v19  ;;  %5219 = vmatpush3.msra.mxu0 %v4737_v18 }
  0x52   : > { %5207 = vmatmul.mubr.msk.f32.vlgmr.msra.gmra.mxu1 %vm613_vm0, %v1368_v20  ;;  %5220 = vmatprep.subr.mxu0 %v4736_v21 }
  0x53   : > { %5181 = vmatprep.mubr.msk.f32.mxu0 %vm613_vm0, %v1215_v22  ;;  %5221 = vmatpush3.msra.mxu0 %v4736_v21 }
  0x54   : > { %5209 = vmatprep.mubr.msk.f32.mxu1 %vm613_vm0, %v1369_v23  ;;  %5182 = vmatmul.mubr.msk.f32.gmra.mxu0 %vm613_vm0, %v1216_v24 }
  0x55   : > { %5222 = vmatprep.subr.mxu0 %v4735_v25  ;;  %5184 = vmatprep.mubr.msk.f32.mxu0 %vm613_vm0, %v1217_v28 }
  0x56   : > { %5223 = vmatpush3.msra.mxu0 %v4735_v25  ;;  %5210 = vmatmul.mubr.msk.f32.gmra.mxu1 %vm613_vm0, %v1370_v26 }
  0x57   : > { %5224 = vmatprep.subr.mxu0 %v4734_v27  ;;  %5212 = vmatprep.mubr.msk.f32.mxu1 %vm613_vm0, %v1371_v29 }
  0x58   : > { %5225 = vmatpush3.msra.mxu0 %v4734_v27  ;;  %v576_v27 = vlaneseq }
  0x59   : > { %5185 = vmatmul.mubr.msk.f32.gmra.mxu0 %vm613_vm0, %v1218_v30  ;;  %5226 = vmatprep.subr.mxu0 %v4733_v31 }
  0x5a   : > { %5227 = vmatpush3.msra.mxu0 %v4733_v31  ;;  %5213 = vmatmul.mubr.msk.f32.gmra.mxu1 %vm613_vm0, %v1372_v32 }
  0x5b   : > { %5228 = vmatprep.subr.mxu0 %v4732_v33  ;;  %5187 = vmatprep.mubr.msk.f32.mxu0 %vm613_vm0, %v1219_v34 }
  0x5c   : > { %5229 = vmatpush3.msra.mxu0 %v4732_v33  ;;  %5215 = vmatprep.mubr.msk.f32.mxu1 %vm613_vm0, %v1373_v35  ;;  %v577_v35 = vand.u32 127, %v576_v27 }
  0x5d   : > { %5188 = vmatmul.mubr.msk.f32.gmra.mxu0 %vm613_vm0, %v1220_v36  ;;  %5230 = vmatprep.subr.mxu0 %v4731_v37 }
  0x5e   : > { %5231 = vmatpush3.msra.mxu0 %v4731_v37  ;;  %5216 = vmatmul.mubr.msk.f32.gmra.mxu1 %vm613_vm0, %v1374_v38  ;;  %vm578_vm1 = vcmp.lt.s32.totalorder %v577_v35, 32 }
  0x5f   : > { %5232 = vmatprep.subr.mxu0 %v4730_v39  ;;  %5234 = vmatprep.mubr.msk.f32.mxu0 %vm613_vm0, %v1521_v40 }
  0x60   : > { %5233 = vmatpush3.msra.mxu0 %v4730_v39 }
  0x61   : > { %5235 = vmatmul.mubr.msk.f32.vlgmr.msra.gmra.mxu0 %vm613_vm0, %v1522_v41 }
  0x62   : > { %5237 = vmatprep.mubr.msk.f32.mxu0 %vm613_vm0, %v1523_v42 }
  0x65   : > { %5238 = vmatmul.mubr.msk.f32.gmra.mxu0 %vm613_vm0, %v1524_v43 }
  0x66   : > { %5240 = vmatprep.mubr.msk.f32.mxu0 %vm613_vm0, %v1525_v44 }
  0x69   : > { %5241 = vmatmul.mubr.msk.f32.gmra.mxu0 %vm613_vm0, %v1526_v45 }
  0x6a   : > { %5243 = vmatprep.mubr.msk.f32.mxu0 %vm613_vm0, %v1527_v46 }
  0x6d   : > { %5244 = vmatmul.mubr.msk.f32.gmra.mxu0 %vm613_vm0, %v1528_v47 }
  0x6e   : > { %2686 = vmatprep.mubr.f32.mxu0 %v5484_v48 }
  0xdf   : > { %v5068_v49 = vpop.f32.mrf.mxu0 }
  0xe0   : > { %v744_v18 = vadd.f32 %v5068_v49, %v5902_v15 }
  0xe1   : > { %v704_v50 = vpop.f32.mrf.mxu0 }
  0xe2   : > { %v5096_v51 = vpop.f32.mrf.mxu1  ;;  %v743_v20 = vadd.f32 %v5902_v15, %v704_v50 }
  0xe3   : > { %v898_v22 = vadd.f32 %v5096_v51, %v744_v18 }
  0xe4   : > { %v858_v53 = vpop.f32.mrf.mxu1 }
  0xe5   : > { %v5071_v52 = vpop.f32.mrf.mxu0  ;;  %v897_v24 = vadd.f32 %v858_v53, %v743_v20  ;;  %v5920_v53 = vsel %vm578_vm1, 1.0, %v5484_v48 }
  0xe6   : > { %v746_v32 = vadd.f32 %v5071_v52, %v5902_v15 }
  0xe7   : > { %v714_v54 = vpop.f32.mrf.mxu0 }
  0xe8   : > { %v5099_v55 = vpop.f32.mrf.mxu1  ;;  %v745_v25 = vadd.f32 %v5902_v15, %v714_v54 }
  0xe9   : > { %v900_v42 = vadd.f32 %v5099_v55, %v746_v32 }
  0xea   : > { %v868_v57 = vpop.f32.mrf.mxu1 }
  0xeb   : > { %v5074_v56 = vpop.f32.mrf.mxu0  ;;  %v899_v33 = vadd.f32 %v868_v57, %v745_v25 }
  0xec   : > { %v748_v51 = vadd.f32 %v5074_v56, %v5902_v15 }
  0xed   : > { %v724_v58 = vpop.f32.mrf.mxu0 }
  0xee   : > { %v5881_v59 = vpop.f32.mrf.mxu1  ;;  %v747_v43 = vadd.f32 %v5902_v15, %v724_v58 }
  0xef   : > { %v902_v56 = vadd.f32 %v5881_v59, %v748_v51 }
  0xf0   : > { %v878_v61 = vpop.f32.mrf.mxu1 }
  0xf1   : > { %v5883_v60 = vpop.f32.mrf.mxu0  ;;  %v901_v54 = vadd.f32 %v878_v61, %v747_v43 }
  0xf3   : > { %v5885_v62 = vpop.f32.mrf.mxu0 }
  0xf4   : > { %v5887_v63 = vpop.f32.mrf.mxu1 }
  0xf6   : > { %v5889_v0 = vpop.f32.mrf.mxu1 }
  0xf7   : > { %v5124_v1 = vpop.f32.mrf.mxu0 }
  0xf8   : > { %v1052_v26 = vadd.f32 %v5124_v1, %v898_v22 }
  0xf9   : > { %v1012_v2 = vpop.f32.mrf.mxu0 }
  0xfa   : > { %v5152_v3 = vpop.f32.mrf.mxu1  ;;  %v1051_v30 = vadd.f32 %v1012_v2, %v897_v24 }
  0xfb   : > { %v1206_v34 = vadd.f32 %v5152_v3, %v1052_v26 }
  0xfc   : > { %v1166_v5 = vpop.f32.mrf.mxu1 }
  0xfd   : > { %v5127_v4 = vpop.f32.mrf.mxu0  ;;  %v1205_v38 = vadd.f32 %v1166_v5, %v1051_v30 }
  0xfe   : > { %v1054_v47 = vadd.f32 %v5127_v4, %v900_v42 }
  0xff   : > { %v1022_v6 = vpop.f32.mrf.mxu0 }
 0x100   : > { %v5155_v7 = vpop.f32.mrf.mxu1  ;;  %v1053_v39 = vadd.f32 %v1022_v6, %v899_v33 }
 0x101   : > { %v1208_v3 = vadd.f32 %v5155_v7, %v1054_v47 }
 0x102   : > { %v1176_v9 = vpop.f32.mrf.mxu1 }
 0x103   : > { %v5891_v8 = vpop.f32.mrf.mxu0  ;;  %v1207_v49 = vadd.f32 %v1176_v9, %v1053_v39  ;;  %v749_v9 = vadd.f32 %v5902_v15, %v5885_v62  ;;  %v750_v62 = vadd.f32 %v5883_v60, %v5902_v15 }
 0x104   : > { %v1056_v7 = vadd.f32 %v5891_v8, %v902_v56 }
 0x105   : > { %v1032_v10 = vpop.f32.mrf.mxu0  ;;  %v903_v26 = vadd.f32 %v5889_v0, %v749_v9  ;;  %v904_v0 = vadd.f32 %v5887_v63, %v750_v62 }
 0x106   : > { %v5893_v11 = vpop.f32.mrf.mxu1  ;;  %v1055_v5 = vadd.f32 %v1032_v10, %v901_v54 }
 0x107   : > { %v1210_v30 = vadd.f32 %v5893_v11, %v1056_v7 }
 0x108   : > { %v1186_v13 = vpop.f32.mrf.mxu1 }
 0x109   : > { %v5895_v12 = vpop.f32.mrf.mxu0  ;;  %v1209_v24 = vadd.f32 %v1186_v13, %v1055_v5 }
 0x10b   : > { %v5897_v14 = vpop.f32.mrf.mxu0 }
 0x10c   : > { %v5904_v16 = vpop.f32.mrf.mxu1  ;;  %v1057_v13 = vadd.f32 %v5897_v14, %v903_v26  ;;  %v1058_v14 = vadd.f32 %v5895_v12, %v904_v0 }
 0x10e   : > { %v5908_v21 = vpop.f32.mrf.mxu1  ;;  %v1212_v12 = vadd.f32 %v5904_v16, %v1058_v14 }
 0x10f   : > { %v5180_v17 = vpop.f32.mrf.mxu0 }
 0x110   : > { %v1360_v40 = vadd.f32 %v5180_v17, %v1206_v34 }
 0x111   : > { %v1320_v19 = vpop.f32.mrf.mxu0 }
 0x112   : > { %v5208_v28 = vpop.f32.mrf.mxu1  ;;  %v1359_v44 = vadd.f32 %v1320_v19, %v1205_v38  ;;  %v1211_v38 = vadd.f32 %v5908_v21, %v1057_v13 }
 0x113   : > { %v1514_v50 = vadd.f32 %v5208_v28, %v1360_v40 }
 0x114   : > { %v5183_v23 = vpop.f32.mrf.mxu0  ;;  %v1474_v36 = vpop.f32.mrf.mxu1 }
 0x115   : > { %v1513_v57 = vadd.f32 %v1474_v36, %v1359_v44  ;;  %v1362_v61 = vadd.f32 %v5183_v23, %v1208_v3 }
 0x116   : > { %v1330_v29 = vpop.f32.mrf.mxu0  ;;  %v5211_v45 = vpop.f32.mrf.mxu1 }
 0x117   : > { %v1361_v1 = vadd.f32 %v1330_v29, %v1207_v49  ;;  %v1516_v28 = vadd.f32 %v5211_v45, %v1362_v61 }
 0x118   : > { %v1484_v55 = vpop.f32.mrf.mxu1 }
 0x119   : > { %v5911_v31 = vpop.f32.mrf.mxu0  ;;  %v1515_v18 = vadd.f32 %v1484_v55, %v1361_v1 }
 0x11a   : > { %v5214_v10 = vpop.f32.mrf.mxu1  ;;  %v1364_v35 = vadd.f32 %v5911_v31, %v1210_v30 }
 0x11b   : > { %v1340_v37 = vpop.f32.mrf.mxu0 }
 0x11c   : > { %v1363_v29 = vadd.f32 %v1340_v37, %v1209_v24  ;;  %v1494_v32 = vpop.f32.mrf.mxu1  ;;  %v1518_v31 = vadd.f32 %v5214_v10, %v1364_v35 }
 0x11d   : > { %v5915_v41 = vpop.f32.mrf.mxu0 }
 0x11e   : > { %v1517_v36 = vadd.f32 %v1494_v32, %v1363_v29  ;;  %v5217_v37 = vpop.f32.mrf.mxu1  ;;  %v1366_v51 = vadd.f32 %v5915_v41, %v1212_v12 }
 0x11f   : > { %v1350_v46 = vpop.f32.mrf.mxu0 }
 0x120   : > { %v1365_v43 = vadd.f32 %v1350_v46, %v1211_v38  ;;  %v1504_v45 = vpop.f32.mrf.mxu1  ;;  %v1520_v1 = vadd.f32 %v5217_v37, %v1366_v51 }
 0x121   : > { %v5236_v52 = vpop.f32.mrf.mxu0 }
 0x122   : > { %v5922_v2 = vadd.f32 %v5236_v52, %v1514_v50  ;;  %v1519_v52 = vadd.f32 %v1504_v45, %v1365_v43 }
 0x123   : > { %v1628_v58 = vpop.f32.mrf.mxu0 }
 0x124   : > { %v5924_v6 = vadd.f32 %v1628_v58, %v1513_v57  ;;  %v1679_v4 = vmul.f32 %v5920_v53, %v5922_v2  ;;  %v1713_v8 = vsel %vm613_vm0, %v5922_v2, 0.0 }
 0x125   : > { %v5239_v17 = vpop.f32.mrf.mxu0 }
 0x126   : > { %v1689_v19 = vsel %vm613_vm0, %v1679_v4, 0.0  ;;  %v1678_v20 = vmul.f32 %v5920_v53, %v5924_v6  ;;  %v5945_v33 = vadd.f32 %v5239_v17, %v1516_v28  ;;  %v1710_v60 = vsel %vm613_vm0, %v5924_v6, 0.0 }
 0x127   : > { %1690 = vadd.xlane.f32.xlu1 %v1689_v19  ;;  %v1638_v22 = vpop.f32.mrf.mxu0  ;;  %v5994_v19 = vsub.f32 1.0, %v5920_v53 }
 0x128   : > { %v5935_v25 = vadd.f32 %v1638_v22, %v1515_v18  ;;  %v1686_v59 = vsel %vm613_vm0, %v1678_v20, 0.0  ;;  %v1681_v63 = vmul.f32 %v5920_v53, %v5945_v33  ;;  %v1719_v44 = vsel %vm613_vm0, %v5945_v33, 0.0 }
 0x129   : > { %1687 = vadd.xlane.f32.xlu0 %v1686_v59  ;;  %v5242_v23 = vpop.f32.mrf.mxu0 }
 0x12a   : > { %v1680_v15 = vmul.f32 %v5920_v53, %v5935_v25  ;;  %v1716_v11 = vsel %vm613_vm0, %v5935_v25, 0.0  ;;  %v5965_v47 = vadd.f32 %v5242_v23, %v1518_v31  ;;  %v1695_v21 = vsel %vm613_vm0, %v1681_v63, 0.0 }
 0x12b   : > { %1714 = vadd.xlane.f32.xlu1 %v1713_v8  ;;  %v1648_v34 = vpop.f32.mrf.mxu0 }
 0x12c   : > { %v5957_v39 = vadd.f32 %v1648_v34, %v1517_v36  ;;  %v1692_v40 = vsel %vm613_vm0, %v1680_v15, 0.0  ;;  %v1683_v57 = vmul.f32 %v5920_v53, %v5965_v47  ;;  %v1725_v55 = vsel %vm613_vm0, %v5965_v47, 0.0 }
 0x12d   : > { %1711 = vadd.xlane.f32.xlu0 %v1710_v60  ;;  %v5245_v42 = vpop.f32.mrf.mxu0 }
 0x12e   : > { %v1682_v49 = vmul.f32 %v5920_v53, %v5957_v39  ;;  %v1722_v46 = vsel %vm613_vm0, %v5957_v39, 0.0  ;;  %v5980_v58 = vadd.f32 %v5245_v42, %v1520_v1  ;;  %v1701_v41 = vsel %vm613_vm0, %v1683_v57, 0.0 }
 0x12f   : > { %1717 = vadd.xlane.f32.xlu1 %v1716_v11  ;;  %v1658_v50 = vpop.f32.mrf.mxu0 }
 0x130   : > { %v5973_v54 = vadd.f32 %v1658_v50, %v1519_v52  ;;  %v1698_v16 = vsel %vm613_vm0, %v1682_v49, 0.0  ;;  %v1685_v56 = vmul.f32 %v5920_v53, %v5980_v58  ;;  %v1731_v9 = vsel %vm613_vm0, %v5980_v58, 0.0 }
 0x131   : > { %1693 = vadd.xlane.f32.xlu0 %v1692_v40 }
 0x132   : > { %v1684_v3 = vmul.f32 %v5920_v53, %v5973_v54  ;;  %v1728_v5 = vsel %vm613_vm0, %v5973_v54, 0.0  ;;  %v1707_v17 = vsel %vm613_vm0, %v1685_v56, 0.0 }
 0x133   : > { %1720 = vadd.xlane.f32.xlu1 %v1719_v44 }
 0x134   : > { %v1704_v4 = vsel %vm613_vm0, %v1684_v3, 0.0 }
 0x135   : > { %1696 = vadd.xlane.f32.xlu0 %v1695_v21 }
 0x137   : > { %1723 = vadd.xlane.f32.xlu1 %v1722_v46 }
 0x139   : > { %1699 = vadd.xlane.f32.xlu0 %v1698_v16 }
 0x13b   : > { %1726 = vadd.xlane.f32.xlu1 %v1725_v55 }
 0x13d   : > { %1702 = vadd.xlane.f32.xlu0 %v1701_v41 }
 0x13f   : > { %1729 = vadd.xlane.f32.xlu1 %v1728_v5 }
 0x141   : > { %1705 = vadd.xlane.f32.xlu0 %v1704_v4 }
 0x143   : > { %1732 = vadd.xlane.f32.xlu1 %v1731_v9 }
 0x145   : > { %1708 = vadd.xlane.f32.xlu0 %v1707_v17 }
 0x1b0   : > { %v1691_v61 = vpop.xlane.xlu1 %1690 }
 0x1b1   : > { %v1735_v22 = vmul.f32 %v5920_v53, %v1691_v61 }
 0x1b2   : > { %v1688_v18 = vpop.xlane.xlu0 %1687 }
 0x1b3   : > { %v1734_v23 = vmul.f32 %v5920_v53, %v1688_v18 }
 0x1b4   : > { %v1715_v20 = vpop.xlane.xlu1 %1714 }
 0x1b5   : > { %v1743_v7 = vsub.f32 %v1715_v20, %v1691_v61 }
 0x1b6   : > { %v1712_v10 = vpop.xlane.xlu0 %1711 }
 0x1b7   : > { %v1751_v24 = vmul.f32 %v1743_v7, %v5994_v19  ;;  %v1742_v59 = vsub.f32 %v1712_v10, %v1688_v18 }
 0x1b8   : > { %v1718_v62 = vpop.xlane.xlu1 %1717 }
 0x1b9   : > { %v1759_v26 = vadd.f32 %v1751_v24, %v1735_v22  ;;  %v1750_v28 = vmul.f32 %v1742_v59, %v5994_v19 }
 0x1ba   : > { %v1694_v29 = vpop.xlane.xlu0 %1693 }
 0x1bb   : > { %v1767_v8 = vmul.f32 0.03125, %v1759_v26  ;;  %v1758_v30 = vadd.f32 %v1750_v28, %v1734_v23  ;;  %v1744_v32 = vsub.f32 %v1718_v62, %v1694_v29  ;;  %v1736_v15 = vmul.f32 %v5920_v53, %v1694_v29 }
 0x1bc   : > { %v1721_v13 = vpop.xlane.xlu1 %1720 }
 0x1bd   : > { %v1766_v60 = vmul.f32 0.03125, %v1758_v30  ;;  %v1752_v0 = vmul.f32 %v1744_v32, %v5994_v19  ;;  %v6003_v35 = vsub.f32 %v5922_v2, %v1767_v8 }
 0x1be   : > { %v1697_v34 = vpop.xlane.xlu0 %1696 }
 0x1bf   : > { %v1760_v36 = vadd.f32 %v1752_v0, %v1736_v15  ;;  %v1745_v11 = vsub.f32 %v1721_v13, %v1697_v34  ;;  %v6006_v14 = vsub.f32 %v5924_v6, %v1766_v60  ;;  %v1737_v40 = vmul.f32 %v5920_v53, %v1697_v34 }
 0x1c0   : > { %v1724_v37 = vpop.xlane.xlu1 %1723  ;;  %v1783_v43 = vmul.f32 %v6003_v35, %v6003_v35 }
 0x1c1   : > { %v1768_v38 = vmul.f32 0.03125, %v1760_v36  ;;  %v1753_v63 = vmul.f32 %v1745_v11, %v5994_v19  ;;  %v1782_v42 = vmul.f32 %v6006_v14, %v6006_v14 }
 0x1c2   : > { %v1700_v31 = vpop.xlane.xlu0 %1699  ;;  %v1791_v16 = vmul.f32 %v5920_v53, %v1783_v43  ;;  %v1825_v41 = vsel %vm613_vm0, %v1783_v43, 0.0 }
 0x1c3   : > { %v1761_v2 = vadd.f32 %v1753_v63, %v1737_v40  ;;  %v1746_v44 = vsub.f32 %v1724_v37, %v1700_v31  ;;  %v1822_v45 = vsel %vm613_vm0, %v1782_v42, 0.0  ;;  %v1790_v6 = vmul.f32 %v5920_v53, %v1782_v42 }
 0x1c4   : > { %v1727_v12 = vpop.xlane.xlu1 %1726  ;;  %1823 = vadd.xlane.f32.xlu1 %v1822_v45  ;;  %v6017_v21 = vsub.f32 %v5935_v25, %v1768_v38  ;;  %v1738_v50 = vmul.f32 %v5920_v53, %v1700_v31  ;;  %v1801_v9 = vsel %vm613_vm0, %v1791_v16, 0.0  ;;  %v584_v16 = vld [vmem:[%s7711_s17 + $0x18] sm:$0xff] }
 0x1c5   : > { %v1769_v49 = vmul.f32 0.03125, %v1761_v2  ;;  %v1754_v51 = vmul.f32 %v1746_v44, %v5994_v19  ;;  %v1798_v46 = vsel %vm613_vm0, %v1790_v6, 0.0 }
 0x1c6   : > { %v1703_v52 = vpop.xlane.xlu0 %1702  ;;  %v1784_v57 = vmul.f32 %v6017_v21, %v6017_v21  ;;  %1799 = vadd.xlane.f32.xlu0 %v1798_v46  ;;  %v585_v46 = vld [vmem:[%s7711_s17 + $0x20] sm:$0xff] }
 0x1c7   : > { %v1762_v1 = vadd.f32 %v1754_v51, %v1738_v50  ;;  %v1747_v55 = vsub.f32 %v1727_v12, %v1703_v52  ;;  %v6027_v25 = vsub.f32 %v5945_v33, %v1769_v49  ;;  %v1739_v4 = vmul.f32 %v5920_v53, %v1703_v52  ;;  %v588_v50 = vld [vmem:[%s7711_s17 + $0x38] sm:$0xff]  ;;  %v587_v51 = vld [vmem:[%s7711_s17 + $0x30] sm:$0xff]  ;;  %v586_v52 = vld [vmem:[%s7711_s17 + $0x28] sm:$0xff] }
 0x1c8   : > { %1826 = vadd.xlane.f32.xlu1 %v1825_v41  ;;  %v1730_v3 = vpop.xlane.xlu1 %1729  ;;  %v1792_v61 = vmul.f32 %v5920_v53, %v1784_v57  ;;  %v1828_v33 = vsel %vm613_vm0, %v1784_v57, 0.0  ;;  %5246 = vmatprep.subr.mxu1 %v588_v50  ;;  %v583_v57 = vld [vmem:[%s7711_s17 + $0x10] sm:$0xff] }
 0x1c9   : > { %v1770_v5 = vmul.f32 0.03125, %v1762_v1  ;;  %v1755_v56 = vmul.f32 %v1747_v55, %v5994_v19  ;;  %v1785_v18 = vmul.f32 %v6027_v25, %v6027_v25  ;;  %5247 = vmatpush3.msra.mxu1 %v588_v50  ;;  %v582_v1 = vld [vmem:[%s7711_s17 + $0x8] sm:$0xff]  ;;  %v581_v55 = vld [vmem:[%s7711_s17] sm:$0xff] }
 0x1ca   : > { %v1706_v17 = vpop.xlane.xlu0 %1705  ;;  %1802 = vadd.xlane.f32.xlu0 %v1801_v9  ;;  %v1804_v23 = vsel %vm613_vm0, %v1792_v61, 0.0  ;;  %5248 = vmatprep.subr.mxu1 %v587_v51 }
 0x1cb   : > { %v1763_v20 = vadd.f32 %v1755_v56, %v1739_v4  ;;  %v1748_v7 = vsub.f32 %v1730_v3, %v1706_v17  ;;  %v6037_v10 = vsub.f32 %v5957_v39, %v1770_v5  ;;  %v1740_v24 = vmul.f32 %v5920_v53, %v1706_v17  ;;  %5249 = vmatpush3.msra.mxu1 %v587_v51 }
 0x1cc   : > { %1829 = vadd.xlane.f32.xlu1 %v1828_v33  ;;  %v1733_v62 = vpop.xlane.xlu1 %1732  ;;  %v1793_v28 = vmul.f32 %v5920_v53, %v1785_v18  ;;  %v1831_v39 = vsel %vm613_vm0, %v1785_v18, 0.0  ;;  %5250 = vmatprep.subr.mxu1 %v586_v52 }
 0x1cd   : > { %v1771_v22 = vmul.f32 0.03125, %v1763_v20  ;;  %v1756_v59 = vmul.f32 %v1748_v7, %v5994_v19  ;;  %v1786_v29 = vmul.f32 %v6037_v10, %v6037_v10  ;;  %5251 = vmatpush3.msra.mxu1 %v586_v52 }
 0x1ce   : > { %v1709_v26 = vpop.xlane.xlu0 %1708  ;;  %1805 = vadd.xlane.f32.xlu0 %v1804_v23  ;;  %v1807_v0 = vsel %vm613_vm0, %v1793_v28, 0.0  ;;  %5252 = vmatprep.subr.mxu1 %v585_v46 }
 0x1cf   : > { %v1764_v8 = vadd.f32 %v1756_v59, %v1740_v24  ;;  %v1749_v30 = vsub.f32 %v1733_v62, %v1709_v26  ;;  %v6047_v32 = vsub.f32 %v5965_v47, %v1771_v22  ;;  %v1741_v60 = vmul.f32 %v5920_v53, %v1709_v26  ;;  %5253 = vmatpush3.msra.mxu1 %v585_v46 }
 0x1d0   : > { %1832 = vadd.xlane.f32.xlu1 %v1831_v39  ;;  %v1794_v34 = vmul.f32 %v5920_v53, %v1786_v29  ;;  %v1834_v37 = vsel %vm613_vm0, %v1786_v29, 0.0  ;;  %5254 = vmatprep.subr.mxu1 %v584_v16 }
 0x1d1   : > { %v1772_v13 = vmul.f32 0.03125, %v1764_v8  ;;  %v1757_v15 = vmul.f32 %v1749_v30, %v5994_v19  ;;  %v1787_v36 = vmul.f32 %v6047_v32, %v6047_v32  ;;  %5255 = vmatpush3.msra.mxu1 %v584_v16 }
 0x1d2   : > { %1808 = vadd.xlane.f32.xlu0 %v1807_v0  ;;  %v1810_v40 = vsel %vm613_vm0, %v1794_v34, 0.0  ;;  %5256 = vmatprep.subr.mxu1 %v583_v57 }
 0x1d3   : > { %v1765_v11 = vadd.f32 %v1757_v15, %v1741_v60  ;;  %v6057_v47 = vsub.f32 %v5973_v54, %v1772_v13  ;;  %v1795_v63 = vmul.f32 %v5920_v53, %v1787_v36  ;;  %v1837_v31 = vsel %vm613_vm0, %v1787_v36, 0.0  ;;  %5257 = vmatpush3.msra.mxu1 %v583_v57 }
 0x1d4   : > { %1835 = vadd.xlane.f32.xlu1 %v1834_v37  ;;  %5258 = vmatprep.subr.mxu1 %v582_v1 }
 0x1d5   : > { %v1773_v38 = vmul.f32 0.03125, %v1765_v11  ;;  %v1788_v42 = vmul.f32 %v6057_v47, %v6057_v47  ;;  %v1813_v2 = vsel %vm613_vm0, %v1795_v63, 0.0  ;;  %5259 = vmatpush3.msra.mxu1 %v582_v1  ;;  %v4746_v1 = vld [vmem:[%s7697_s3] ss:$0 sm:$0xff] }
 0x1d6   : > { %1811 = vadd.xlane.f32.xlu0 %v1810_v40  ;;  %5260 = vmatprep.subr.mxu1 %v581_v55 }
 0x1d7   : > { %v6065_v43 = vsub.f32 %v5980_v58, %v1773_v38  ;;  %v1796_v54 = vmul.f32 %v5920_v53, %v1788_v42  ;;  %v1840_v45 = vsel %vm613_vm0, %v1788_v42, 0.0  ;;  %5261 = vmatpush3.msra.mxu1 %v581_v55 }
 0x1d8   : > { %1838 = vadd.xlane.f32.xlu1 %v1837_v31  ;;  %2934 = vmatprep.subr.mxu1 %v5484_v48 }
 0x1d9   : > { %v1789_v44 = vmul.f32 %v6065_v43, %v6065_v43  ;;  %v1816_v12 = vsel %vm613_vm0, %v1796_v54, 0.0 }
 0x1da   : > { %1814 = vadd.xlane.f32.xlu0 %v1813_v2 }
 0x1db   : > { %v1797_v6 = vmul.f32 %v5920_v53, %v1789_v44  ;;  %v1843_v58 = vsel %vm613_vm0, %v1789_v44, 0.0 }
 0x1dc   : > { %1841 = vadd.xlane.f32.xlu1 %v1840_v45 }
 0x1dd   : > { %v1819_v49 = vsel %vm613_vm0, %v1797_v6, 0.0 }
 0x1de   : > { %1817 = vadd.xlane.f32.xlu0 %v1816_v12 }
 0x1e0   : > { %1844 = vadd.xlane.f32.xlu1 %v1843_v58 }
 0x1e2   : > { %1820 = vadd.xlane.f32.xlu0 %v1819_v49 }
 0x24d   : > { %v1824_v41 = vpop.xlane.xlu1 %1823 }
 0x24f   : > { %v1800_v3 = vpop.xlane.xlu0 %1799 }
 0x250   : > { %v1854_v5 = vsub.f32 %v1824_v41, %v1800_v3  ;;  %v1846_v56 = vmul.f32 %v5920_v53, %v1800_v3 }
 0x251   : > { %v1827_v4 = vpop.xlane.xlu1 %1826 }
 0x252   : > { %v1862_v9 = vmul.f32 %v1854_v5, %v5994_v19 }
 0x253   : > { %v1803_v17 = vpop.xlane.xlu0 %1802 }
 0x254   : > { %v1870_v61 = vadd.f32 %v1862_v9, %v1846_v56  ;;  %v1855_v18 = vsub.f32 %v1827_v4, %v1803_v17  ;;  %v1847_v33 = vmul.f32 %v5920_v53, %v1803_v17  ;;  %v4747_v4 = vld [vmem:[%s7698_s4] ss:$0 sm:$0xff] }
 0x255   : > { %v1830_v20 = vpop.xlane.xlu1 %1829 }
 0x256   : > { %v1878_v7 = vmul.f32 0.03125, %v1870_v61  ;;  %v1863_v22 = vmul.f32 %v1855_v18, %v5994_v19 }
 0x257   : > { %v1806_v24 = vpop.xlane.xlu0 %1805 }
 0x258   : > { %v1886_v59 = vadd.f32 1e-06, %v1878_v7  ;;  %v1871_v62 = vadd.f32 %v1863_v22, %v1847_v33  ;;  %v1856_v23 = vsub.f32 %v1830_v20, %v1806_v24  ;;  %v1848_v29 = vmul.f32 %v5920_v53, %v1806_v24 }
 0x259   : > { %v1833_v26 = vpop.xlane.xlu1 %1832 }
 0x25a   : > { %5340 = vrsqrt.f32 %v1886_v59  ;;  %v1879_v28 = vmul.f32 0.03125, %v1871_v62  ;;  %v1864_v8 = vmul.f32 %v1856_v23, %v5994_v19 }
 0x25b   : > { %v1809_v30 = vpop.xlane.xlu0 %1808 }
 0x25c   : > { %v1887_v39 = vadd.f32 1e-06, %v1879_v28  ;;  %v1872_v13 = vadd.f32 %v1864_v8, %v1848_v29  ;;  %v1857_v60 = vsub.f32 %v1833_v26, %v1809_v30  ;;  %v1849_v34 = vmul.f32 %v5920_v53, %v1809_v30 }
 0x25d   : > { %v1836_v15 = vpop.xlane.xlu1 %1835 }
 0x25e   : > { %5342 = vrsqrt.f32 %v1887_v39  ;;  %v1880_v0 = vmul.f32 0.03125, %v1872_v13  ;;  %v1865_v36 = vmul.f32 %v1857_v60, %v5994_v19 }
 0x25f   : > { %v1812_v11 = vpop.xlane.xlu0 %1811 }
 0x260   : > { %v1888_v37 = vadd.f32 1e-06, %v1880_v0  ;;  %v1873_v38 = vadd.f32 %v1865_v36, %v1849_v34  ;;  %v1858_v40 = vsub.f32 %v1836_v15, %v1812_v11  ;;  %v1850_v31 = vmul.f32 %v5920_v53, %v1812_v11 }
 0x261   : > { %v1839_v63 = vpop.xlane.xlu1 %1838 }
 0x262   : > { %5344 = vrsqrt.f32 %v1888_v37  ;;  %v1881_v42 = vmul.f32 0.03125, %v1873_v38  ;;  %v1866_v2 = vmul.f32 %v1858_v40, %v5994_v19 }
 0x263   : > { %v1815_v54 = vpop.xlane.xlu0 %1814 }
 0x264   : > { %v1889_v44 = vadd.f32 1e-06, %v1881_v42  ;;  %v1874_v45 = vadd.f32 %v1866_v2, %v1850_v31  ;;  %v1859_v12 = vsub.f32 %v1839_v63, %v1815_v54  ;;  %v1851_v58 = vmul.f32 %v5920_v53, %v1815_v54 }
 0x265   : > { %v1842_v50 = vpop.xlane.xlu1 %1841 }
 0x266   : > { %5346 = vrsqrt.f32 %v1889_v44  ;;  %v1882_v6 = vmul.f32 0.03125, %v1874_v45  ;;  %v1867_v49 = vmul.f32 %v1859_v12, %v5994_v19 }
 0x267   : > { %v5341_v51 = vpop.eup %5340  ;;  %v1818_v52 = vpop.xlane.xlu0 %1817 }
 0x268   : > { %v1890_v46 = vadd.f32 1e-06, %v1882_v6  ;;  %v1875_v16 = vadd.f32 %v1867_v49, %v1851_v58  ;;  %v1860_v57 = vsub.f32 %v1842_v50, %v1818_v52  ;;  %v1902_v55 = vmul.f32 %v5341_v51, %v6006_v14  ;;  %v6159_v58 = vld [vmem:[%s7699_s5 + $0x1] ss:$0 sm:$0xff]  ;;  %v6166_v50 = vld [vmem:[%s7700_s6] ss:$0 sm:$0xff] }
 0x269   : > { %v1852_v3 = vmul.f32 %v5920_v53, %v1818_v52  ;;  %v1845_v7 = vpop.xlane.xlu1 %1844 }
 0x26a   : > { %5348 = vrsqrt.f32 %v1890_v46  ;;  %v1883_v41 = vmul.f32 0.03125, %v1875_v16  ;;  %v1868_v5 = vmul.f32 %v1860_v57, %v5994_v19  ;;  %v1916_v17 = vmul.f32 %v4746_v1, %v1902_v55  ;;  %v6174_v16 = vld [vmem:[%s7699_s5 + $0x2] ss:$0 sm:$0xff] }
 0x26b   : > { %v5343_v56 = vpop.eup %5342  ;;  %v1821_v9 = vpop.xlane.xlu0 %1820 }
 0x26c   : > { %v1903_v61 = vmul.f32 %v5343_v56, %v6003_v35  ;;  %v1891_v18 = vadd.f32 1e-06, %v1883_v41  ;;  %v1876_v20 = vadd.f32 %v1868_v5, %v1852_v3  ;;  %v1861_v33 = vsub.f32 %v1845_v7, %v1821_v9 }
 0x26d   : > { %v1930_v14 = vadd.f32 %v4747_v4, %v1916_v17  ;;  %v1853_v62 = vmul.f32 %v5920_v53, %v1821_v9 }
 0x26e   : > { %5350 = vrsqrt.f32 %v1891_v18  ;;  %v1884_v22 = vmul.f32 0.03125, %v1876_v20  ;;  %v1917_v24 = vmul.f32 %v4746_v1, %v1903_v61  ;;  %v1869_v23 = vmul.f32 %v1861_v33, %v5994_v19  ;;  %v6183_v61 = vld [vmem:[%s7699_s5 + $0x3] ss:$0 sm:$0xff] }
 0x26f   : > { %v5345_v59 = vpop.eup %5344  ;;  %5262 = vmatprep.mubr.msk.f32.mxu1 %vm613_vm0, %v1930_v14 }
 0x270   : > { %v1892_v26 = vadd.f32 1e-06, %v1884_v22  ;;  %v1931_v28 = vadd.f32 %v4747_v4, %v1917_v24  ;;  %v1904_v29 = vmul.f32 %v5345_v59, %v6017_v21  ;;  %v1877_v35 = vadd.f32 %v1869_v23, %v1853_v62  ;;  %v6192_v22 = vld [vmem:[%s7699_s5 + $0x4] ss:$0 sm:$0xff] }
 0x272   : > { %5352 = vrsqrt.f32 %v1892_v26  ;;  %5263 = vmatmul.mubr.msk.f32.vlgmr.msra.gmra.mxu1 %vm613_vm0, %v1931_v28  ;;  %v1918_v8 = vmul.f32 %v4746_v1, %v1904_v29  ;;  %v1885_v39 = vmul.f32 0.03125, %v1877_v35  ;;  %v6203_v29 = vld [vmem:[%s7699_s5 + $0x5] ss:$0 sm:$0xff] }
 0x273   : > { %v5347_v30 = vpop.eup %5346 }
 0x274   : > { %v1932_v13 = vadd.f32 %v4747_v4, %v1918_v8  ;;  %v1905_v60 = vmul.f32 %v5347_v30, %v6027_v25  ;;  %v1893_v15 = vadd.f32 1e-06, %v1885_v39 }
 0x276   : > { %5265 = vmatprep.mubr.msk.f32.mxu1 %vm613_vm0, %v1932_v13  ;;  %v1919_v0 = vmul.f32 %v4746_v1, %v1905_v60  ;;  %5354 = vrsqrt.f32 %v1893_v15 }
 0x277   : > { %v5349_v34 = vpop.eup %5348 }
 0x278   : > { %v1933_v36 = vadd.f32 %v4747_v4, %v1919_v0  ;;  %v1906_v11 = vmul.f32 %v5349_v34, %v6037_v10 }
 0x27a   : > { %5266 = vmatmul.mubr.msk.f32.gmra.mxu1 %vm613_vm0, %v1933_v36  ;;  %v1920_v21 = vmul.f32 %v4746_v1, %v1906_v11  ;;  %v6213_v36 = vld [vmem:[%s7699_s5 + $0x6] ss:$0 sm:$0xff] }
 0x27b   : > { %v5351_v37 = vpop.eup %5350 }
 0x27c   : > { %v1934_v38 = vadd.f32 %v4747_v4, %v1920_v21  ;;  %v1907_v40 = vmul.f32 %v5351_v37, %v6047_v32 }
 0x27e   : > { %5268 = vmatprep.mubr.msk.f32.mxu1 %vm613_vm0, %v1934_v38  ;;  %v1921_v63 = vmul.f32 %v4746_v1, %v1907_v40 }
 0x27f   : > { %v5353_v25 = vpop.eup %5352 }
 0x280   : > { %v1935_v42 = vadd.f32 %v4747_v4, %v1921_v63  ;;  %v1908_v31 = vmul.f32 %v5353_v25, %v6057_v47 }
 0x282   : > { %5269 = vmatmul.mubr.msk.f32.gmra.mxu1 %vm613_vm0, %v1935_v42  ;;  %v1922_v2 = vmul.f32 %v4746_v1, %v1908_v31 }
 0x283   : > { %v5355_v54 = vpop.eup %5354 }
 0x284   : > { %v1936_v44 = vadd.f32 %v4747_v4, %v1922_v2  ;;  %v1909_v10 = vmul.f32 %v5355_v54, %v6065_v43  ;;  %v6152_v43 = vld [vmem:[%s7699_s5] ss:$0 sm:$0xff] }
 0x286   : > { %5271 = vmatprep.mubr.msk.f32.mxu1 %vm613_vm0, %v1936_v44  ;;  %v1923_v45 = vmul.f32 %v4746_v1, %v1909_v10 }
 0x288   : > { %v1937_v12 = vadd.f32 %v4747_v4, %v1923_v45 }
 0x28a   : > { %5272 = vmatmul.mubr.msk.f32.gmra.mxu1 %vm613_vm0, %v1937_v12 }
 0x332   : > { %v6139_v32 = vpop.f32.mrf.mxu1 }
 0x333   : > { %2070 = vst.msk [vmem:[#allocation2 + $0x10] sm:$0xff] %vm613_vm0, %v6139_v32 }
 0x334   : > { %v6143_v6 = vpop.f32.mrf.mxu1 }
 0x335   : > { %2069 = vst.msk [vmem:[#allocation2 + $0x8] sm:$0xff] %vm613_vm0, %v6143_v6 }
 0x33a   : > { %v6147_v47 = vpop.f32.mrf.mxu1  ;;  %v2181_v7 = vld [vmem:[#allocation2 + $0x10] sm:$0xff] }
 0x33b   : > { %2072 = vst.msk [vmem:[#allocation2 + $0x20] sm:$0xff] %vm613_vm0, %v6147_v47  ;;  %v2197_v35 = vmul.f32 %v6183_v61, %v2181_v7 }
 0x33c   : > { %v6161_v49 = vpop.f32.mrf.mxu1  ;;  %v2085_v51 = vld [vmem:[#allocation2 + $0x5] sm:$0xff]  ;;  %v2086_v1 = vld [vmem:[#allocation2 + $0xd] sm:$0xff] }
 0x33d   : > { %v2116_v52 = vld [vmem:[#allocation2 + $0x6] sm:$0xff]  ;;  %2071 = vst.msk [vmem:[#allocation2 + $0x18] sm:$0xff] %vm613_vm0, %v6161_v49  ;;  %v2100_v46 = vmul.f32 %v6152_v43, %v2085_v51  ;;  %v2117_v55 = vld [vmem:[#allocation2 + $0xe] sm:$0xff]  ;;  %v2101_v5 = vmul.f32 %v6152_v43, %v2086_v1 }
 0x33e   : > { %v2148_v57 = vld [vmem:[#allocation2 + $0x7] sm:$0xff]  ;;  %v2132_v3 = vmul.f32 %v6159_v58, %v2116_v52  ;;  %v2149_v56 = vld [vmem:[#allocation2 + $0xf] sm:$0xff]  ;;  %v2133_v20 = vmul.f32 %v6159_v58, %v2117_v55 }
 0x33f   : > { %v2108_v41 = vadd.f32 %v6166_v50, %v2100_v46  ;;  %v2180_v4 = vld [vmem:[#allocation2 + $0x8] sm:$0xff]  ;;  %v2164_v17 = vmul.f32 %v6174_v16, %v2148_v57  ;;  %v2109_v18 = vadd.f32 %v6166_v50, %v2101_v5  ;;  %v2165_v23 = vmul.f32 %v6174_v16, %v2149_v56 }
 0x340   : > { %v2212_v14 = vld [vmem:[#allocation2 + $0x9] sm:$0xff]  ;;  %v2196_v59 = vmul.f32 %v6183_v61, %v2180_v4 }
 0x341   : > { %v2140_v9 = vadd.f32 %v2132_v3, %v2108_v41  ;;  %v2141_v62 = vadd.f32 %v2133_v20, %v2109_v18  ;;  %v2244_v28 = vld [vmem:[#allocation2 + $0xa] sm:$0xff]  ;;  %v2228_v39 = vmul.f32 %v6192_v22, %v2212_v14 }
 0x342   : > { %v6187_v33 = vpop.f32.mrf.mxu1  ;;  %v2276_v34 = vld [vmem:[#allocation2 + $0xb] sm:$0xff]  ;;  %v2260_v38 = vmul.f32 %v6203_v29, %v2244_v28  ;;  %v2183_v3 = vld [vmem:[#allocation2 + $0x20] sm:$0xff] }
 0x343   : > { %2074 = vst.msk [vmem:[#allocation2 + $0x30] sm:$0xff] %vm613_vm0, %v6187_v33  ;;  %v2172_v24 = vadd.f32 %v2164_v17, %v2140_v9  ;;  %v2173_v13 = vadd.f32 %v2165_v23, %v2141_v62  ;;  %v2292_v45 = vmul.f32 %v6213_v36, %v2276_v34 }
 0x344   : > { %v6198_v26 = vpop.f32.mrf.mxu1  ;;  %v2213_v8 = vld [vmem:[#allocation2 + $0x11] sm:$0xff]  ;;  %v2088_v25 = vld [vmem:[#allocation2 + $0x1d] sm:$0xff] }
 0x345   : > { %2073 = vst.msk [vmem:[#allocation2 + $0x28] sm:$0xff] %vm613_vm0, %v6198_v26  ;;  %v2204_v30 = vadd.f32 %v2196_v59, %v2172_v24  ;;  %v2229_v60 = vmul.f32 %v6192_v22, %v2213_v8  ;;  %v2087_v15 = vld [vmem:[#allocation2 + $0x15] sm:$0xff]  ;;  %v2205_v40 = vadd.f32 %v2197_v35, %v2173_v13  ;;  %v2119_v42 = vld [vmem:[#allocation2 + $0x1e] sm:$0xff]  ;;  %v2103_v44 = vmul.f32 %v6152_v43, %v2088_v25 }
 0x346   : > { %v2118_v0 = vld [vmem:[#allocation2 + $0x16] sm:$0xff]  ;;  %v2102_v21 = vmul.f32 %v6152_v43, %v2087_v15  ;;  %v2151_v46 = vld [vmem:[#allocation2 + $0x1f] sm:$0xff]  ;;  %v2135_v41 = vmul.f32 %v6159_v58, %v2119_v42  ;;  %v2199_v8 = vmul.f32 %v6183_v61, %v2183_v3 }
 0x347   : > { %v2245_v11 = vld [vmem:[#allocation2 + $0x12] sm:$0xff]  ;;  %v2236_v37 = vadd.f32 %v2228_v39, %v2204_v30  ;;  %v2134_v54 = vmul.f32 %v6159_v58, %v2118_v0  ;;  %v2237_v12 = vadd.f32 %v2229_v60, %v2205_v40  ;;  %v2111_v55 = vadd.f32 %v6166_v50, %v2103_v44  ;;  %v2246_v35 = vld [vmem:[#allocation2 + $0x1a] sm:$0xff] }
 0x348   : > { %v2150_v63 = vld [vmem:[#allocation2 + $0x17] sm:$0xff]  ;;  %v2110_v2 = vadd.f32 %v6166_v50, %v2102_v21  ;;  %v2261_v51 = vmul.f32 %v6203_v29, %v2245_v11  ;;  %v2167_v14 = vmul.f32 %v6174_v16, %v2151_v46 }
 0x349   : > { %v2277_v31 = vld [vmem:[#allocation2 + $0x13] sm:$0xff]  ;;  %v2268_v10 = vadd.f32 %v2260_v38, %v2236_v37  ;;  %v2166_v1 = vmul.f32 %v6174_v16, %v2150_v63  ;;  %v2143_v7 = vadd.f32 %v2135_v41, %v2111_v55  ;;  %v2278_v21 = vld [vmem:[#allocation2 + $0x1b] sm:$0xff]  ;;  %v2262_v63 = vmul.f32 %v6203_v29, %v2246_v35 }
 0x34a   : > { %v2182_v52 = vld [vmem:[#allocation2 + $0x18] sm:$0xff]  ;;  %v2142_v57 = vadd.f32 %v2134_v54, %v2110_v2  ;;  %v6225_v5 = vpop.f32.mrf.mxu1  ;;  %v2269_v56 = vadd.f32 %v2261_v51, %v2237_v12  ;;  %v2293_v9 = vmul.f32 %v6213_v36, %v2277_v31  ;;  %v2294_v12 = vmul.f32 %v6213_v36, %v2278_v21 }
 0x34b   : > { %v6227_v4 = vadd.f32 %v2292_v45, %v2268_v10  ;;  %v2214_v17 = vld [vmem:[#allocation2 + $0x19] sm:$0xff]  ;;  %2076 = vst.msk [vmem:[#allocation2 + $0x40] sm:$0xff] %vm613_vm0, %v6225_v5  ;;  %v2198_v20 = vmul.f32 %v6183_v61, %v2182_v52  ;;  %v2175_v60 = vadd.f32 %v2167_v14, %v2143_v7 }
 0x34c   : > { %v2174_v18 = vadd.f32 %v2166_v1, %v2142_v57  ;;  %v2215_v24 = vld [vmem:[#allocation2 + $0x21] sm:$0xff]  ;;  %v6234_v59 = vpop.f32.mrf.mxu1  ;;  %v6240_v28 = vadd.f32 %v2293_v9, %v2269_v56  ;;  %v2230_v13 = vmul.f32 %v6192_v22, %v2214_v17  ;;  %v2090_v31 = vld [vmem:[#allocation2 + $0x2d] sm:$0xff] }
 0x34d   : > { %v2342_v62 = vsel %vm613_vm0, %v6227_v4, 0.0  ;;  %v2310_v23 = vmul.f32 %v5920_v53, %v6227_v4  ;;  %v2089_v30 = vld [vmem:[#allocation2 + $0x25] sm:$0xff]  ;;  %2075 = vst.msk [vmem:[#allocation2 + $0x38] sm:$0xff] %vm613_vm0, %v6234_v59  ;;  %v2231_v15 = vmul.f32 %v6192_v22, %v2215_v24  ;;  %v2207_v25 = vadd.f32 %v2199_v8, %v2175_v60  ;;  %v2121_v57 = vld [vmem:[#allocation2 + $0x2e] sm:$0xff] }
 0x34e   : > { %2343 = vadd.xlane.f32.xlu1 %v2342_v62  ;;  %v2206_v39 = vadd.f32 %v2198_v20, %v2174_v18  ;;  %v2120_v0 = vld [vmem:[#allocation2 + $0x26] sm:$0xff]  ;;  %v2311_v11 = vmul.f32 %v5920_v53, %v6240_v28  ;;  %v2104_v38 = vmul.f32 %v6152_v43, %v2089_v30  ;;  %v2345_v2 = vsel %vm613_vm0, %v6240_v28, 0.0  ;;  %v2153_v20 = vld [vmem:[#allocation2 + $0x2f] sm:$0xff] }
 0x34f   : > { %v2318_v34 = vsel %vm613_vm0, %v2310_v23, 0.0  ;;  %v2247_v37 = vld [vmem:[#allocation2 + $0x22] sm:$0xff]  ;;  %v2136_v10 = vmul.f32 %v6159_v58, %v2120_v0  ;;  %v2239_v51 = vadd.f32 %v2231_v15, %v2207_v25  ;;  %v2105_v3 = vmul.f32 %v6152_v43, %v2090_v31  ;;  %v2185_v23 = vld [vmem:[#allocation2 + $0x30] sm:$0xff] }
 0x350   : > { %2319 = vadd.xlane.f32.xlu0 %v2318_v34  ;;  %v2238_v40 = vadd.f32 %v2230_v13, %v2206_v39  ;;  %v2152_v42 = vld [vmem:[#allocation2 + $0x27] sm:$0xff]  ;;  %v2112_v44 = vadd.f32 %v6166_v50, %v2104_v38  ;;  %v2263_v52 = vmul.f32 %v6203_v29, %v2247_v37  ;;  %v2321_v1 = vsel %vm613_vm0, %v2311_v11, 0.0 }
 0x351   : > { %v2279_v54 = vld [vmem:[#allocation2 + $0x23] sm:$0xff]  ;;  %v2168_v41 = vmul.f32 %v6174_v16, %v2152_v42  ;;  %v2113_v24 = vadd.f32 %v6166_v50, %v2105_v3  ;;  %v2137_v62 = vmul.f32 %v6159_v58, %v2121_v57  ;;  %v2169_v11 = vmul.f32 %v6174_v16, %v2153_v20 }
 0x352   : > { %2346 = vadd.xlane.f32.xlu1 %v2345_v2  ;;  %v2270_v45 = vadd.f32 %v2262_v63, %v2238_v40  ;;  %v2184_v46 = vld [vmem:[#allocation2 + $0x28] sm:$0xff]  ;;  %v2144_v55 = vadd.f32 %v2136_v10, %v2112_v44  ;;  %v2271_v9 = vadd.f32 %v2263_v52, %v2239_v51  ;;  %v2295_v17 = vmul.f32 %v6213_v36, %v2279_v54 }
 0x353   : > { %v2216_v18 = vld [vmem:[#allocation2 + $0x29] sm:$0xff]  ;;  %v2200_v14 = vmul.f32 %v6183_v61, %v2184_v46  ;;  %v2145_v34 = vadd.f32 %v2137_v62, %v2113_v24  ;;  %v2201_v63 = vmul.f32 %v6183_v61, %v2185_v23 }
 0x354   : > { %2322 = vadd.xlane.f32.xlu0 %v2321_v1  ;;  %v6261_v56 = vadd.f32 %v2294_v12, %v2270_v45  ;;  %v2176_v7 = vadd.f32 %v2168_v41, %v2144_v55  ;;  %v6271_v30 = vadd.f32 %v2295_v17, %v2271_v9  ;;  %v2248_v39 = vld [vmem:[#allocation2 + $0x2a] sm:$0xff]  ;;  %v2091_v60 = vld [vmem:[#allocation2 + $0x35] sm:$0xff]  ;;  %v2232_v0 = vmul.f32 %v6192_v22, %v2216_v18  ;;  %v2092_v10 = vld [vmem:[#allocation2 + $0x3d] sm:$0xff] }
 0x355   : > { %v2217_v13 = vld [vmem:[#allocation2 + $0x31] sm:$0xff]  ;;  %v2106_v25 = vmul.f32 %v6152_v43, %v2091_v60  ;;  %v2264_v31 = vmul.f32 %v6203_v29, %v2248_v39  ;;  %v2177_v2 = vadd.f32 %v2169_v11, %v2145_v34  ;;  %v2123_v41 = vld [vmem:[#allocation2 + $0x3e] sm:$0xff]  ;;  %v2107_v20 = vmul.f32 %v6152_v43, %v2092_v10 }
 0x356   : > { %v2348_v35 = vsel %vm613_vm0, %v6261_v56, 0.0  ;;  %v2312_v8 = vmul.f32 %v5920_v53, %v6261_v56  ;;  %v2208_v15 = vadd.f32 %v2200_v14, %v2176_v7  ;;  %v2122_v21 = vld [vmem:[#allocation2 + $0x36] sm:$0xff]  ;;  %v2313_v38 = vmul.f32 %v5920_v53, %v6271_v30  ;;  %v2280_v40 = vld [vmem:[#allocation2 + $0x2b] sm:$0xff]  ;;  %v2155_v23 = vld [vmem:[#allocation2 + $0x3f] sm:$0xff] }
 0x357   : > { %2349 = vadd.xlane.f32.xlu1 %v2348_v35  ;;  %v2233_v54 = vmul.f32 %v6192_v22, %v2217_v13  ;;  %v2154_v44 = vld [vmem:[#allocation2 + $0x37] sm:$0xff]  ;;  %v2351_v45 = vsel %vm613_vm0, %v6271_v30, 0.0  ;;  %v2114_v51 = vadd.f32 %v6166_v50, %v2106_v25  ;;  %v2138_v52 = vmul.f32 %v6159_v58, %v2122_v21  ;;  %v2187_v11 = vld [vmem:[#allocation2 + $0x40] sm:$0xff] }
 0x358   : > { %v2324_v37 = vsel %vm613_vm0, %v2312_v8, 0.0  ;;  %v2240_v42 = vadd.f32 %v2232_v0, %v2208_v15  ;;  %v2249_v12 = vld [vmem:[#allocation2 + $0x32] sm:$0xff]  ;;  %v2296_v57 = vmul.f32 %v6213_v36, %v2280_v40  ;;  %v2209_v1 = vadd.f32 %v2201_v63, %v2177_v2  ;;  %v2250_v34 = vld [vmem:[#allocation2 + $0x3a] sm:$0xff] }
 0x359   : > { %2325 = vadd.xlane.f32.xlu0 %v2324_v37  ;;  %v2186_v55 = vld [vmem:[#allocation2 + $0x38] sm:$0xff]  ;;  %v2327_v3 = vsel %vm613_vm0, %v2313_v38, 0.0  ;;  %v2146_v17 = vadd.f32 %v2138_v52, %v2114_v51  ;;  %v2170_v18 = vmul.f32 %v6174_v16, %v2154_v44  ;;  %v2265_v24 = vmul.f32 %v6203_v29, %v2249_v12  ;;  %v2219_v25 = vld [vmem:[#allocation2 + $0x41] sm:$0xff] }
 0x35a   : > { %v2272_v46 = vadd.f32 %v2264_v31, %v2240_v42  ;;  %v2281_v9 = vld [vmem:[#allocation2 + $0x33] sm:$0xff]  ;;  %v2241_v14 = vadd.f32 %v2233_v54, %v2209_v1  ;;  %v2202_v8 = vmul.f32 %v6183_v61, %v2186_v55  ;;  %v2115_v39 = vadd.f32 %v6166_v50, %v2107_v20  ;;  %v2282_v63 = vld [vmem:[#allocation2 + $0x3b] sm:$0xff] }
 0x35b   : > { %2352 = vadd.xlane.f32.xlu1 %v2351_v45  ;;  %v2218_v62 = vld [vmem:[#allocation2 + $0x39] sm:$0xff]  ;;  %v2178_v35 = vadd.f32 %v2170_v18, %v2146_v17  ;;  %v2139_v13 = vmul.f32 %v6159_v58, %v2123_v41  ;;  %v2297_v0 = vmul.f32 %v6213_v36, %v2281_v9  ;;  %v2171_v50 = vmul.f32 %v6174_v16, %v2155_v23  ;;  %v2251_v16 = vld [vmem:[#allocation2 + $0x42] sm:$0xff] }
 0x35c   : > { %v6290_v7 = vadd.f32 %v2296_v57, %v2272_v46  ;;  %v2273_v15 = vadd.f32 %v2265_v24, %v2241_v14  ;;  %v2234_v37 = vmul.f32 %v6192_v22, %v2218_v62  ;;  %v2266_v31 = vmul.f32 %v6203_v29, %v2250_v34  ;;  %v2283_v57 = vld [vmem:[#allocation2 + $0x43] sm:$0xff] }
 0x35d   : > { %2328 = vadd.xlane.f32.xlu0 %v2327_v3  ;;  %v2210_v21 = vadd.f32 %v2202_v8, %v2178_v35  ;;  %v2147_v38 = vadd.f32 %v2139_v13, %v2115_v39  ;;  %v2203_v54 = vmul.f32 %v6183_v61, %v2187_v11  ;;  %v2298_v12 = vmul.f32 %v6213_v36, %v2282_v63 }
 0x35e   : > { %v2354_v60 = vsel %vm613_vm0, %v6290_v7, 0.0  ;;  %v2314_v43 = vmul.f32 %v5920_v53, %v6290_v7  ;;  %v6304_v40 = vadd.f32 %v2297_v0, %v2273_v15  ;;  %v2235_v52 = vmul.f32 %v6192_v22, %v2219_v25 }
 0x35f   : > { %2355 = vadd.xlane.f32.xlu1 %v2354_v60  ;;  %v2242_v42 = vadd.f32 %v2234_v37, %v2210_v21  ;;  %v2179_v2 = vadd.f32 %v2171_v50, %v2147_v38  ;;  %v2267_v55 = vmul.f32 %v6203_v29, %v2251_v16  ;;  %v2299_v17 = vmul.f32 %v6213_v36, %v2283_v57 }
 0x360   : > { %v2330_v58 = vsel %vm613_vm0, %v2314_v43, 0.0  ;;  %v2357_v44 = vsel %vm613_vm0, %v6304_v40, 0.0  ;;  %v2315_v10 = vmul.f32 %v5920_v53, %v6304_v40 }
 0x361   : > { %2331 = vadd.xlane.f32.xlu0 %v2330_v58  ;;  %v2274_v45 = vadd.f32 %v2266_v31, %v2242_v42  ;;  %v2211_v51 = vadd.f32 %v2203_v54, %v2179_v2 }
 0x362   : > { %v2333_v46 = vsel %vm613_vm0, %v2315_v10, 0.0 }
 0x363   : > { %2358 = vadd.xlane.f32.xlu1 %v2357_v44  ;;  %v6315_v1 = vadd.f32 %v2298_v12, %v2274_v45  ;;  %v2243_v61 = vadd.f32 %v2235_v52, %v2211_v51 }
 0x365   : > { %2334 = vadd.xlane.f32.xlu0 %v2333_v46  ;;  %v2360_v41 = vsel %vm613_vm0, %v6315_v1, 0.0  ;;  %v2316_v3 = vmul.f32 %v5920_v53, %v6315_v1  ;;  %v2275_v9 = vadd.f32 %v2267_v55, %v2243_v61 }
 0x367   : > { %2361 = vadd.xlane.f32.xlu1 %v2360_v41  ;;  %v2336_v22 = vsel %vm613_vm0, %v2316_v3, 0.0  ;;  %v6324_v18 = vadd.f32 %v2299_v17, %v2275_v9 }
 0x369   : > { %2337 = vadd.xlane.f32.xlu0 %v2336_v22  ;;  %v2363_v20 = vsel %vm613_vm0, %v6324_v18, 0.0  ;;  %v2317_v29 = vmul.f32 %v5920_v53, %v6324_v18 }
 0x36b   : > { %2364 = vadd.xlane.f32.xlu1 %v2363_v20  ;;  %v2339_v14 = vsel %vm613_vm0, %v2317_v29, 0.0 }
 0x36d   : > { %2340 = vadd.xlane.f32.xlu0 %v2339_v14 }
 0x3d7   : > { %v2344_v24 = vpop.xlane.xlu1 %2343 }
 0x3d9   : > { %v2320_v62 = vpop.xlane.xlu0 %2319 }
 0x3da   : > { %v2374_v23 = vsub.f32 %v2344_v24, %v2320_v62  ;;  %v2366_v35 = vmul.f32 %v5920_v53, %v2320_v62 }
 0x3db   : > { %v2347_v36 = vpop.xlane.xlu1 %2346 }
 0x3dc   : > { %v2382_v8 = vmul.f32 %v2374_v23, %v5994_v19 }
 0x3dd   : > { %v2323_v39 = vpop.xlane.xlu0 %2322 }
 0x3de   : > { %v2390_v13 = vadd.f32 %v2382_v8, %v2366_v35  ;;  %v2375_v60 = vsub.f32 %v2347_v36, %v2323_v39  ;;  %v2367_v15 = vmul.f32 %v5920_v53, %v2323_v39 }
 0x3e0   : > { %v2398_v43 = vmul.f32 0.03125, %v2390_v13  ;;  %v2383_v0 = vmul.f32 %v2375_v60, %v5994_v19  ;;  %v2350_v34 = vpop.xlane.xlu1 %2349 }
 0x3e2   : > { %v2391_v11 = vadd.f32 %v2383_v0, %v2367_v15  ;;  %v2326_v21 = vpop.xlane.xlu0 %2325  ;;  %v6336_v37 = vsub.f32 %v6227_v4, %v2398_v43 }
 0x3e3   : > { %v2376_v38 = vsub.f32 %v2350_v34, %v2326_v21  ;;  %v2368_v25 = vmul.f32 %v5920_v53, %v2326_v21 }
 0x3e4   : > { %v2399_v50 = vmul.f32 0.03125, %v2391_v11  ;;  %v2353_v58 = vpop.xlane.xlu1 %2352  ;;  %v2414_v63 = vmul.f32 %v6336_v37, %v6336_v37 }
 0x3e5   : > { %v2384_v42 = vmul.f32 %v2376_v38, %v5994_v19 }
 0x3e6   : > { %v2329_v31 = vpop.xlane.xlu0 %2328  ;;  %v2454_v2 = vsel %vm613_vm0, %v2414_v63, 0.0  ;;  %v2422_v54 = vmul.f32 %v5920_v53, %v2414_v63  ;;  %v6345_v44 = vsub.f32 %v6240_v28, %v2399_v50 }
 0x3e7   : > { %v2392_v4 = vadd.f32 %v2384_v42, %v2368_v25  ;;  %v2377_v10 = vsub.f32 %v2353_v58, %v2329_v31  ;;  %2455 = vadd.xlane.f32.xlu1 %v2454_v2  ;;  %v2369_v51 = vmul.f32 %v5920_v53, %v2329_v31 }
 0x3e8   : > { %v2430_v16 = vsel %vm613_vm0, %v2422_v54, 0.0  ;;  %v2415_v45 = vmul.f32 %v6345_v44, %v6345_v44  ;;  %v2356_v46 = vpop.xlane.xlu1 %2355 }
 0x3e9   : > { %v2400_v12 = vmul.f32 0.03125, %v2392_v4  ;;  %v2385_v52 = vmul.f32 %v2377_v10, %v5994_v19  ;;  %2431 = vadd.xlane.f32.xlu0 %v2430_v16 }
 0x3ea   : > { %v2457_v57 = vsel %vm613_vm0, %v2415_v45, 0.0  ;;  %v2423_v28 = vmul.f32 %v5920_v53, %v2415_v45  ;;  %v2332_v55 = vpop.xlane.xlu0 %2331 }
 0x3eb   : > { %v2393_v61 = vadd.f32 %v2385_v52, %v2369_v51  ;;  %2458 = vadd.xlane.f32.xlu1 %v2457_v57  ;;  %v6355_v41 = vsub.f32 %v6261_v56, %v2400_v12  ;;  %v2378_v3 = vsub.f32 %v2356_v46, %v2332_v55  ;;  %v2370_v29 = vmul.f32 %v5920_v53, %v2332_v55 }
 0x3ec   : > { %v2433_v9 = vsel %vm613_vm0, %v2423_v28, 0.0  ;;  %v2359_v22 = vpop.xlane.xlu1 %2358 }
 0x3ed   : > { %v2401_v17 = vmul.f32 0.03125, %v2393_v61  ;;  %2434 = vadd.xlane.f32.xlu0 %v2433_v9  ;;  %v2416_v20 = vmul.f32 %v6355_v41, %v6355_v41  ;;  %v2386_v14 = vmul.f32 %v2378_v3, %v5994_v19 }
 0x3ee   : > { %v2335_v24 = vpop.xlane.xlu0 %2334 }
 0x3ef   : > { %v2460_v62 = vsel %vm613_vm0, %v2416_v20, 0.0  ;;  %v2424_v23 = vmul.f32 %v5920_v53, %v2416_v20  ;;  %v6365_v56 = vsub.f32 %v6271_v30, %v2401_v17  ;;  %v2394_v36 = vadd.f32 %v2386_v14, %v2370_v29 }
 0x3f0   : > { %v2379_v35 = vsub.f32 %v2359_v22, %v2335_v24  ;;  %2461 = vadd.xlane.f32.xlu1 %v2460_v62  ;;  %v2371_v60 = vmul.f32 %v5920_v53, %v2335_v24  ;;  %v2362_v15 = vpop.xlane.xlu1 %2361 }
 0x3f1   : > { %v2436_v8 = vsel %vm613_vm0, %v2424_v23, 0.0  ;;  %v2417_v39 = vmul.f32 %v6365_v56, %v6365_v56  ;;  %v2402_v13 = vmul.f32 0.03125, %v2394_v36  ;;  %v2585_v23 = vld [vmem:[%s7703_s9 + $0x78] sm:$0xff]  ;;  %v2583_v36 = vld [vmem:[%s7703_s9 + $0x68] sm:$0xff] }
 0x3f2   : > { %v2387_v43 = vmul.f32 %v2379_v35, %v5994_v19  ;;  %2437 = vadd.xlane.f32.xlu0 %v2436_v8  ;;  %v2338_v11 = vpop.xlane.xlu0 %2337  ;;  %2638 = vmatprep.subr.mxu0 %v2585_v23  ;;  %v2582_v35 = vld [vmem:[%s7703_s9 + $0x60] sm:$0xff]  ;;  %v2581_v8 = vld [vmem:[%s7703_s9 + $0x58] sm:$0xff] }
 0x3f3   : > { %v2463_v0 = vsel %vm613_vm0, %v2417_v39, 0.0  ;;  %v2425_v30 = vmul.f32 %v5920_v53, %v2417_v39  ;;  %v6375_v21 = vsub.f32 %v6290_v7, %v2402_v13  ;;  %v2380_v38 = vsub.f32 %v2362_v15, %v2338_v11  ;;  %v2580_v39 = vld [vmem:[%s7703_s9 + $0x50] sm:$0xff]  ;;  %v2579_v13 = vld [vmem:[%s7703_s9 + $0x48] sm:$0xff] }
 0x3f4   : > { %v2395_v34 = vadd.f32 %v2387_v43, %v2371_v60  ;;  %2464 = vadd.xlane.f32.xlu1 %v2463_v0  ;;  %v2372_v25 = vmul.f32 %v5920_v53, %v2338_v11  ;;  %v2365_v31 = vpop.xlane.xlu1 %2364  ;;  %v2578_v60 = vld [vmem:[%s7703_s9 + $0x40] sm:$0xff]  ;;  %v2577_v43 = vld [vmem:[%s7703_s9 + $0x38] sm:$0xff]  ;;  %v2576_v15 = vld [vmem:[%s7703_s9 + $0x30] sm:$0xff] }
 0x3f5   : > { %v2439_v50 = vsel %vm613_vm0, %v2425_v30, 0.0  ;;  %v2418_v63 = vmul.f32 %v6375_v21, %v6375_v21  ;;  %v2388_v42 = vmul.f32 %v2380_v38, %v5994_v19  ;;  %v2575_v0 = vld [vmem:[%s7703_s9 + $0x28] sm:$0xff]  ;;  %v2574_v30 = vld [vmem:[%s7703_s9 + $0x20] sm:$0xff]  ;;  %v2572_v11 = vld [vmem:[%s7703_s9 + $0x10] sm:$0xff] }
 0x3f6   : > { %v2403_v58 = vmul.f32 0.03125, %v2395_v34  ;;  %2440 = vadd.xlane.f32.xlu0 %v2439_v50  ;;  %v2341_v2 = vpop.xlane.xlu0 %2340  ;;  %v2573_v34 = vld [vmem:[%s7703_s9 + $0x18] sm:$0xff]  ;;  %v2571_v38 = vld [vmem:[%s7703_s9 + $0x8] sm:$0xff]  ;;  %v2570_v50 = vld [vmem:[%s7703_s9] sm:$0xff] }
 0x3f7   : > { %v2466_v54 = vsel %vm613_vm0, %v2418_v63, 0.0  ;;  %v2426_v4 = vmul.f32 %v5920_v53, %v2418_v63  ;;  %v2396_v10 = vadd.f32 %v2388_v42, %v2372_v25  ;;  %v2381_v16 = vsub.f32 %v2365_v31, %v2341_v2  ;;  %v2894_v63 = vld [vmem:[%s7705_s11 + $0x78] sm:$0xff]  ;;  %v2893_v25 = vld [vmem:[%s7705_s11 + $0x70] sm:$0xff]  ;;  %v2892_v42 = vld [vmem:[%s7705_s11 + $0x68] sm:$0xff] }
 0x3f8   : > { %v6385_v7 = vsub.f32 %v6304_v40, %v2403_v58  ;;  %2467 = vadd.xlane.f32.xlu1 %v2466_v54  ;;  %v2373_v52 = vmul.f32 %v5920_v53, %v2341_v2  ;;  %v6462_v58 = vld [vmem:[%s7711_s17 + $0x38] sm:$0xff]  ;;  %2935 = vmatpush1.msra.mxu1 %v2894_v63  ;;  %v2891_v31 = vld [vmem:[%s7705_s11 + $0x60] sm:$0xff]  ;;  %v2889_v54 = vld [vmem:[%s7705_s11 + $0x50] sm:$0xff] }
 0x3f9   : > { %v2442_v45 = vsel %vm613_vm0, %v2426_v4, 0.0  ;;  %v2404_v51 = vmul.f32 0.03125, %v2396_v10  ;;  %v2389_v46 = vmul.f32 %v2381_v16, %v5994_v19  ;;  %2936 = vmatprep.subr.mxu1 %v5484_v48  ;;  %v2890_v2 = vld [vmem:[%s7705_s11 + $0x58] sm:$0xff]  ;;  %v2888_v4 = vld [vmem:[%s7705_s11 + $0x48] sm:$0xff] }
 0x3fa   : > { %v2419_v12 = vmul.f32 %v6385_v7, %v6385_v7  ;;  %2443 = vadd.xlane.f32.xlu0 %v2442_v45  ;;  %2937 = vmatpush1.msra.mxu1 %v2893_v25 }
 0x3fb   : > { %v2397_v40 = vadd.f32 %v2389_v46, %v2373_v52  ;;  %v6395_v61 = vsub.f32 %v6315_v1, %v2404_v51  ;;  %2938 = vmatprep.subr.mxu1 %v5484_v48 }
 0x3fc   : > { %v2469_v57 = vsel %vm613_vm0, %v2419_v12, 0.0  ;;  %v2427_v28 = vmul.f32 %v5920_v53, %v2419_v12  ;;  %2939 = vmatpush1.msra.mxu1 %v2892_v42 }
 0x3fd   : > { %2470 = vadd.xlane.f32.xlu1 %v2469_v57  ;;  %v2405_v3 = vmul.f32 0.03125, %v2397_v40  ;;  %v2420_v9 = vmul.f32 %v6395_v61, %v6395_v61  ;;  %2940 = vmatprep.subr.mxu1 %v5484_v48 }
 0x3fe   : > { %v2445_v55 = vsel %vm613_vm0, %v2427_v28, 0.0  ;;  %2941 = vmatpush1.msra.mxu1 %v2891_v31 }
 0x3ff   : > { %2446 = vadd.xlane.f32.xlu0 %v2445_v55  ;;  %v2472_v17 = vsel %vm613_vm0, %v2420_v9, 0.0  ;;  %v2428_v22 = vmul.f32 %v5920_v53, %v2420_v9  ;;  %v6403_v20 = vsub.f32 %v6324_v18, %v2405_v3  ;;  %v2584_v18 = vld [vmem:[%s7703_s9 + $0x70] sm:$0xff]  ;;  %2942 = vmatprep.subr.mxu1 %v5484_v48 }
 0x400   : > { %2639 = vmatpush1.msra.mxu0 %v2584_v18  ;;  %2943 = vmatpush1.msra.mxu1 %v2890_v2 }
 0x401   : > { %2473 = vadd.xlane.f32.xlu1 %v2472_v17  ;;  %v2448_v29 = vsel %vm613_vm0, %v2428_v22, 0.0  ;;  %v2421_v1 = vmul.f32 %v6403_v20, %v6403_v20  ;;  %2640 = vmatprep.subr.mxu0 %v2583_v36 }
 0x402   : > { %2641 = vmatpush1.msra.mxu0 %v2582_v35  ;;  %2944 = vmatprep.subr.mxu1 %v5484_v48 }
 0x403   : > { %2449 = vadd.xlane.f32.xlu0 %v2448_v29  ;;  %v2475_v14 = vsel %vm613_vm0, %v2421_v1, 0.0  ;;  %v2429_v24 = vmul.f32 %v5920_v53, %v2421_v1  ;;  %2642 = vmatprep.subr.mxu0 %v2581_v8 }
 0x404   : > { %2643 = vmatpush1.msra.mxu0 %v2580_v39  ;;  %2945 = vmatpush1.msra.mxu1 %v2889_v54 }
 0x405   : > { %2476 = vadd.xlane.f32.xlu1 %v2475_v14  ;;  %v2451_v62 = vsel %vm613_vm0, %v2429_v24, 0.0  ;;  %2644 = vmatprep.subr.mxu0 %v2579_v13 }
 0x406   : > { %2645 = vmatpush1.msra.mxu0 %v2578_v60  ;;  %2946 = vmatprep.subr.mxu1 %v5484_v48 }
 0x407   : > { %2452 = vadd.xlane.f32.xlu0 %v2451_v62  ;;  %2646 = vmatprep.subr.mxu0 %v2577_v43 }
 0x408   : > { %2647 = vmatpush1.msra.mxu0 %v2576_v15  ;;  %2947 = vmatpush1.msra.mxu1 %v2888_v4  ;;  %v6506_v4 = vld [vmem:[%s7701_s7] ss:$0 sm:$0xff] }
 0x409   : > { %2648 = vmatprep.subr.mxu0 %v2575_v0  ;;  %2948 = vmatprep.subr.mxu1 %v5484_v48 }
 0x40a   : > { %2649 = vmatpush1.msra.mxu0 %v2574_v30 }
 0x40b   : > { %2650 = vmatprep.subr.mxu0 %v2573_v34 }
 0x40c   : > { %2651 = vmatpush1.msra.mxu0 %v2572_v11 }
 0x40d   : > { %2652 = vmatprep.subr.mxu0 %v2571_v38 }
 0x40e   : > { %2653 = vmatpush1.msra.mxu0 %v2570_v50 }
 0x40f   : > { %5274 = vmatprep.subr.mxu0 %v6462_v58 }
 0x470   : > { %v2456_v10 = vpop.xlane.xlu1 %2455 }
 0x472   : > { %v2432_v16 = vpop.xlane.xlu0 %2431 }
 0x473   : > { %v2486_v45 = vsub.f32 %v2456_v10, %v2432_v16  ;;  %v2478_v51 = vmul.f32 %v5920_v53, %v2432_v16 }
 0x474   : > { %v2459_v12 = vpop.xlane.xlu1 %2458 }
 0x475   : > { %v2494_v52 = vmul.f32 %v2486_v45, %v5994_v19 }
 0x476   : > { %v2435_v46 = vpop.xlane.xlu0 %2434 }
 0x477   : > { %v2502_v57 = vadd.f32 %v2494_v52, %v2478_v51  ;;  %v2487_v28 = vsub.f32 %v2459_v12, %v2435_v46  ;;  %v2479_v55 = vmul.f32 %v5920_v53, %v2435_v46  ;;  %v6514_v52 = vld [vmem:[%s7702_s8] ss:$0 sm:$0xff] }
 0x479   : > { %v2510_v40 = vmul.f32 0.03125, %v2502_v57  ;;  %v2495_v3 = vmul.f32 %v2487_v28, %v5994_v19  ;;  %v2462_v9 = vpop.xlane.xlu1 %2461 }
 0x47b   : > { %v2518_v17 = vadd.f32 1e-06, %v2510_v40  ;;  %v2503_v22 = vadd.f32 %v2495_v3, %v2479_v55  ;;  %v2438_v29 = vpop.xlane.xlu0 %2437 }
 0x47c   : > { %v2488_v1 = vsub.f32 %v2462_v9, %v2438_v29  ;;  %v2480_v62 = vmul.f32 %v5920_v53, %v2438_v29 }
 0x47d   : > { %5356 = vrsqrt.f32 %v2518_v17  ;;  %v2511_v14 = vmul.f32 0.03125, %v2503_v22  ;;  %v2465_v24 = vpop.xlane.xlu1 %2464 }
 0x47e   : > { %v2496_v23 = vmul.f32 %v2488_v1, %v5994_v19 }
 0x47f   : > { %v2519_v18 = vadd.f32 1e-06, %v2511_v14  ;;  %v2441_v36 = vpop.xlane.xlu0 %2440 }
 0x480   : > { %v2504_v35 = vadd.f32 %v2496_v23, %v2480_v62  ;;  %v2489_v8 = vsub.f32 %v2465_v24, %v2441_v36  ;;  %v2481_v13 = vmul.f32 %v5920_v53, %v2441_v36 }
 0x481   : > { %5358 = vrsqrt.f32 %v2519_v18  ;;  %v2468_v43 = vpop.xlane.xlu1 %2467 }
 0x482   : > { %v2512_v39 = vmul.f32 0.03125, %v2504_v35  ;;  %v2497_v60 = vmul.f32 %v2489_v8, %v5994_v19  ;;  %v5469_v35 = vld [vmem:[%s7711_s17 + $0x30] sm:$0xff] }
 0x483   : > { %v2444_v30 = vpop.xlane.xlu0 %2443 }
 0x484   : > { %v2520_v15 = vadd.f32 1e-06, %v2512_v39  ;;  %v2505_v0 = vadd.f32 %v2497_v60, %v2481_v13  ;;  %v2490_v34 = vsub.f32 %v2468_v43, %v2444_v30  ;;  %v2482_v50 = vmul.f32 %v5920_v53, %v2444_v30 }
 0x486   : > { %5360 = vrsqrt.f32 %v2520_v15  ;;  %v2513_v11 = vmul.f32 0.03125, %v2505_v0  ;;  %v2471_v38 = vpop.xlane.xlu1 %2470  ;;  %v2498_v63 = vmul.f32 %v2490_v34, %v5994_v19 }
 0x488   : > { %v2521_v25 = vadd.f32 1e-06, %v2513_v11  ;;  %v2447_v42 = vpop.xlane.xlu0 %2446  ;;  %v2506_v31 = vadd.f32 %v2498_v63, %v2482_v50  ;;  %v5472_v50 = vld [vmem:[%s7711_s17 + $0x18] sm:$0xff] }
 0x489   : > { %v2491_v2 = vsub.f32 %v2471_v38, %v2447_v42  ;;  %v2483_v45 = vmul.f32 %v5920_v53, %v2447_v42 }
 0x48a   : > { %v5357_v54 = vpop.eup %5356  ;;  %5362 = vrsqrt.f32 %v2521_v25  ;;  %v2514_v16 = vmul.f32 0.03125, %v2506_v31  ;;  %v2474_v51 = vpop.xlane.xlu1 %2473 }
 0x48b   : > { %v2534_v10 = vmul.f32 %v5357_v54, %v6336_v37  ;;  %v2499_v12 = vmul.f32 %v2491_v2, %v5994_v19  ;;  %v5474_v54 = vld [vmem:[%s7711_s17 + $0x8] sm:$0xff] }
 0x48c   : > { %v2522_v46 = vadd.f32 1e-06, %v2514_v16  ;;  %v2450_v28 = vpop.xlane.xlu0 %2449 }
 0x48d   : > { %v2507_v57 = vadd.f32 %v2499_v12, %v2483_v45  ;;  %v2548_v40 = vmul.f32 %v6506_v4, %v2534_v10  ;;  %v2492_v3 = vsub.f32 %v2474_v51, %v2450_v28  ;;  %v2484_v22 = vmul.f32 %v5920_v53, %v2450_v28  ;;  %v5475_v45 = vld [vmem:[%s7711_s17] sm:$0xff] }
 0x48e   : > { %v5359_v55 = vpop.eup %5358  ;;  %5364 = vrsqrt.f32 %v2522_v46  ;;  %v2477_v14 = vpop.xlane.xlu1 %2476 }
 0x48f   : > { %v2515_v37 = vmul.f32 0.03125, %v2507_v57  ;;  %v2562_v9 = vadd.f32 %v6514_v52, %v2548_v40  ;;  %v2535_v17 = vmul.f32 %v5359_v55, %v6345_v44  ;;  %v2500_v29 = vmul.f32 %v2492_v3, %v5994_v19 }
 0x490   : > { %v2453_v24 = vpop.xlane.xlu0 %2452 }
 0x491   : > { %v2523_v1 = vadd.f32 1e-06, %v2515_v37  ;;  %4772 = vmatmul.mubr.msk.f32.vlgmr.msra.gmra.mxu0 %vm613_vm0, %v2562_v9  ;;  %v2549_v62 = vmul.f32 %v6506_v4, %v2535_v17  ;;  %v2508_v23 = vadd.f32 %v2500_v29, %v2484_v22  ;;  %v2493_v18 = vsub.f32 %v2477_v14, %v2453_v24  ;;  %v2883_v17 = vld [vmem:[%s7705_s11 + $0x20] sm:$0xff]  ;;  %v2882_v22 = vld [vmem:[%s7705_s11 + $0x18] sm:$0xff]  ;;  %v2881_v29 = vld [vmem:[%s7705_s11 + $0x10] sm:$0xff] }
 0x492   : > { %2692 = vmatprep.mubr.f32.mxu0 %v5484_v48  ;;  %5275 = vmatpush3.msra.mxu0 %v6462_v58  ;;  %v2485_v39 = vmul.f32 %v5920_v53, %v2453_v24  ;;  %v5470_v58 = vld [vmem:[%s7711_s17 + $0x28] sm:$0xff]  ;;  %v2879_v14 = vld [vmem:[%s7705_s11] sm:$0xff]  ;;  %v2902_v24 = vld [vmem:[%s7705_s11 + $0xb8] sm:$0xff] }
 0x493   : > { %v5361_v36 = vpop.eup %5360  ;;  %5366 = vrsqrt.f32 %v2523_v1  ;;  %v2563_v44 = vadd.f32 %v6514_v52, %v2549_v62  ;;  %5276 = vmatprep.subr.mxu0 %v5469_v35  ;;  %v2516_v8 = vmul.f32 0.03125, %v2508_v23  ;;  %v2501_v13 = vmul.f32 %v2493_v18, %v5994_v19  ;;  %v2880_v1 = vld [vmem:[%s7705_s11 + $0x8] sm:$0xff]  ;;  %v2901_v62 = vld [vmem:[%s7705_s11 + $0xb0] sm:$0xff]  ;;  %v2899_v18 = vld [vmem:[%s7705_s11 + $0xa0] sm:$0xff] }
 0x494   : > { %v2536_v60 = vmul.f32 %v5361_v36, %v6355_v41  ;;  %5277 = vmatpush3.msra.mxu0 %v5469_v35  ;;  %v5471_v41 = vld [vmem:[%s7711_s17 + $0x20] sm:$0xff]  ;;  %v2900_v23 = vld [vmem:[%s7705_s11 + $0xa8] sm:$0xff]  ;;  %v2898_v36 = vld [vmem:[%s7705_s11 + $0x98] sm:$0xff] }
 0x495   : > { %4773 = vmatmul.mubr.msk.f32.gmra.mxu0 %vm613_vm0, %v2563_v44  ;;  %5278 = vmatprep.subr.mxu0 %v5470_v58  ;;  %v2524_v43 = vadd.f32 1e-06, %v2516_v8  ;;  %v2509_v15 = vadd.f32 %v2501_v13, %v2485_v39  ;;  %v2897_v44 = vld [vmem:[%s7705_s11 + $0x90] sm:$0xff]  ;;  %v2896_v35 = vld [vmem:[%s7705_s11 + $0x88] sm:$0xff]  ;;  %v2895_v8 = vld [vmem:[%s7705_s11 + $0x80] sm:$0xff]  ;;  %v6649_v39 = vshrl.u32 %v576_v27, 7 }
 0x496   : > { %2698 = vmatprep.mubr.f32.mxu0 %v5484_v48  ;;  %v2550_v0 = vmul.f32 %v6506_v4, %v2536_v60  ;;  %5279 = vmatpush3.msra.mxu0 %v5470_v58  ;;  %v2586_v60 = vld [vmem:[%s7704_s10] sm:$0x3] }
 0x497   : > { %v5363_v30 = vpop.eup %5362  ;;  %5280 = vmatprep.subr.mxu0 %v5471_v41  ;;  %5368 = vrsqrt.f32 %v2524_v43  ;;  %v2517_v34 = vmul.f32 0.03125, %v2509_v15  ;;  %v2590_v13 = vsub.s32 0, %v6649_v39  ;;  %v2594_v58 = vsub.s32 1, %v6649_v39 }
 0x498   : > { %v2564_v11 = vadd.f32 %v6514_v52, %v2550_v0  ;;  %v2537_v38 = vmul.f32 %v5363_v30, %v6365_v56  ;;  %5281 = vmatpush3.msra.mxu0 %v5471_v41  ;;  %v5473_v56 = vld [vmem:[%s7711_s17 + $0x10] sm:$0xff] }
 0x499   : > { %5282 = vmatprep.subr.mxu0 %v5472_v50  ;;  %v2525_v63 = vadd.f32 1e-06, %v2517_v34  ;;  %v6658_v43 = vrot.slane %v2586_v60, %v2590_v13  ;;  %v6662_v15 = vrot.slane %v2586_v60, %v2594_v58 }
 0x49a   : > { %4774 = vmatmul.mubr.msk.f32.gmra.mxu0 %vm613_vm0, %v2564_v11  ;;  %v2551_v25 = vmul.f32 %v6506_v4, %v2537_v38 }
 0x49b   : > { %2704 = vmatprep.mubr.f32.mxu0 %v5484_v48  ;;  %5283 = vmatpush3.msra.mxu0 %v5472_v50  ;;  %v5365_v42 = vpop.eup %5364  ;;  %5370 = vrsqrt.f32 %v2525_v63 }
 0x49c   : > { %v2565_v31 = vadd.f32 %v6514_v52, %v2551_v25  ;;  %5284 = vmatprep.subr.mxu0 %v5473_v56  ;;  %v2538_v2 = vmul.f32 %v5365_v42, %v6375_v21 }
 0x49d   : > { %5285 = vmatpush3.msra.mxu0 %v5473_v56 }
 0x49e   : > { %4775 = vmatmul.mubr.msk.f32.gmra.mxu0 %vm613_vm0, %v2565_v31  ;;  %5286 = vmatprep.subr.mxu0 %v5474_v54  ;;  %v2552_v10 = vmul.f32 %v6506_v4, %v2538_v2 }
 0x49f   : > { %2710 = vmatprep.mubr.f32.mxu0 %v5484_v48  ;;  %5287 = vmatpush3.msra.mxu0 %v5474_v54 }
 0x4a0   : > { %v5367_v16 = vpop.eup %5366  ;;  %5288 = vmatprep.subr.mxu0 %v5475_v45  ;;  %v2566_v21 = vadd.f32 %v6514_v52, %v2552_v10 }
 0x4a1   : > { %v2539_v12 = vmul.f32 %v5367_v16, %v6385_v7  ;;  %5289 = vmatpush3.msra.mxu0 %v5475_v45 }
 0x4a2   : > { %4776 = vmatmul.mubr.msk.f32.gmra.mxu0 %vm613_vm0, %v2566_v21 }
 0x4a3   : > { %v2553_v51 = vmul.f32 %v6506_v4, %v2539_v12  ;;  %2716 = vmatprep.mubr.f32.mxu0 %v5484_v48 }
 0x4a4   : > { %v5369_v46 = vpop.eup %5368 }
 0x4a5   : > { %v2567_v57 = vadd.f32 %v6514_v52, %v2553_v51  ;;  %v2540_v28 = vmul.f32 %v5369_v46, %v6395_v61  ;;  %v2887_v61 = vld [vmem:[%s7705_s11 + $0x40] sm:$0xff] }
 0x4a6   : > { %2949 = vmatpush1.msra.mxu1 %v2887_v61 }
 0x4a7   : > { %4777 = vmatmul.mubr.msk.f32.gmra.mxu0 %vm613_vm0, %v2567_v57  ;;  %v2554_v40 = vmul.f32 %v6506_v4, %v2540_v28  ;;  %2950 = vmatprep.subr.mxu1 %v5484_v48 }
 0x4a8   : > { %2722 = vmatprep.mubr.f32.mxu0 %v5484_v48  ;;  %v5371_v55 = vpop.eup %5370 }
 0x4a9   : > { %v2568_v7 = vadd.f32 %v6514_v52, %v2554_v40  ;;  %v2541_v3 = vmul.f32 %v5371_v55, %v6403_v20  ;;  %v2886_v20 = vld [vmem:[%s7705_s11 + $0x38] sm:$0xff] }
 0x4aa   : > { %2951 = vmatpush1.msra.mxu1 %v2886_v20 }
 0x4ab   : > { %4778 = vmatmul.mubr.msk.f32.gmra.mxu0 %vm613_vm0, %v2568_v7  ;;  %v2555_v37 = vmul.f32 %v6506_v4, %v2541_v3  ;;  %2952 = vmatprep.subr.mxu1 %v5484_v48  ;;  %v2885_v4 = vld [vmem:[%s7705_s11 + $0x30] sm:$0xff] }
 0x4ac   : > { %2728 = vmatprep.mubr.f32.mxu0 %v5484_v48  ;;  %2953 = vmatpush1.msra.mxu1 %v2885_v4 }
 0x4ad   : > { %v2569_v9 = vadd.f32 %v6514_v52, %v2555_v37  ;;  %2954 = vmatprep.subr.mxu1 %v5484_v48  ;;  %v2884_v52 = vld [vmem:[%s7705_s11 + $0x28] sm:$0xff] }
 0x4ae   : > { %2955 = vmatpush1.msra.mxu1 %v2884_v52 }
 0x4af   : > { %4779 = vmatmul.mubr.msk.f32.gmra.mxu0 %vm613_vm0, %v2569_v9  ;;  %2956 = vmatprep.subr.mxu1 %v5484_v48 }
 0x4b0   : > { %2957 = vmatpush1.msra.mxu1 %v2883_v17 }
 0x4b1   : > { %2958 = vmatprep.subr.mxu1 %v5484_v48 }
 0x4b2   : > { %2959 = vmatpush1.msra.mxu1 %v2882_v22 }
 0x4b3   : > { %2960 = vmatprep.subr.mxu1 %v5484_v48 }
 0x4b4   : > { %2961 = vmatpush1.msra.mxu1 %v2881_v29 }
 0x4b5   : > { %2962 = vmatprep.subr.mxu1 %v5484_v48 }
 0x4b6   : > { %2963 = vmatpush1.msra.mxu1 %v2880_v1 }
 0x4b7   : > { %2964 = vmatprep.subr.mxu1 %v5484_v48 }
 0x4b8   : > { %2965 = vmatpush1.msra.mxu1 %v2879_v14 }
 0x4b9   : > { %2982 = vmatprep.subr.mxu1 %v5484_v48 }
 0x4ba   : > { %2983 = vmatpush2.msra.mxu1 %v2902_v24 }
 0x4bb   : > { %2984 = vmatprep.subr.mxu1 %v5484_v48 }
 0x4bc   : > { %2985 = vmatpush2.msra.mxu1 %v2901_v62 }
 0x4bd   : > { %2986 = vmatprep.subr.mxu1 %v5484_v48 }
 0x4be   : > { %2987 = vmatpush2.msra.mxu1 %v2900_v23 }
 0x4bf   : > { %2988 = vmatprep.subr.mxu1 %v5484_v48 }
 0x4c0   : > { %2989 = vmatpush2.msra.mxu1 %v2899_v18 }
 0x4c1   : > { %2990 = vmatprep.subr.mxu1 %v5484_v48 }
 0x4c2   : > { %2991 = vmatpush2.msra.mxu1 %v2898_v36 }
 0x4c3   : > { %2992 = vmatprep.subr.mxu1 %v5484_v48 }
 0x4c4   : > { %2993 = vmatpush2.msra.mxu1 %v2897_v44 }
 0x4c5   : > { %2994 = vmatprep.subr.mxu1 %v5484_v48 }
 0x4c6   : > { %2995 = vmatpush2.msra.mxu1 %v2896_v35 }
 0x4c7   : > { %2996 = vmatprep.subr.mxu1 %v5484_v48 }
 0x4c8   : > { %2997 = vmatpush2.msra.mxu1 %v2895_v8 }
 0x4c9   : > { %4049 = vmatprep.subr.mxu1 %v5484_v48 }
 0x551   : > { %v2688_v0 = vpop.f32.mrf.mxu0 }
 0x552   : > { %v6665_v27 = vadd.f32 %v2688_v0, %v6658_v43 }
 0x553   : > { %v2690_v30 = vpop.f32.mrf.mxu0 }
 0x554   : > { %v2751_v41 = vmul.f32 0.044715, %v6665_v27  ;;  %v6669_v34 = vadd.f32 %v2690_v30, %v6662_v15 }
 0x555   : > { %v2694_v11 = vpop.f32.mrf.mxu0 }
 0x556   : > { %v2767_v38 = vmul.f32 %v2751_v41, %v6665_v27  ;;  %v2752_v50 = vmul.f32 0.044715, %v6669_v34  ;;  %v6674_v63 = vadd.f32 %v2694_v11, %v6658_v43 }
 0x557   : > { %v2696_v25 = vpop.f32.mrf.mxu0 }
 0x558   : > { %v2783_v42 = vmul.f32 %v2767_v38, %v6665_v27  ;;  %v2768_v31 = vmul.f32 %v2752_v50, %v6669_v34  ;;  %v2753_v56 = vmul.f32 0.044715, %v6674_v63  ;;  %v6680_v2 = vadd.f32 %v2696_v25, %v6662_v15 }
 0x55a   : > { %v2799_v54 = vadd.f32 %v2783_v42, %v6665_v27  ;;  %v2784_v10 = vmul.f32 %v2768_v31, %v6669_v34  ;;  %v2769_v16 = vmul.f32 %v2753_v56, %v6674_v63  ;;  %v2754_v45 = vmul.f32 0.044715, %v6680_v2  ;;  %v2700_v21 = vpop.f32.mrf.mxu0 }
 0x55b   : > { %v6687_v12 = vadd.f32 %v2700_v21, %v6658_v43 }
 0x55c   : > { %v2815_v51 = vmul.f32 0.7978846, %v2799_v54  ;;  %v2800_v46 = vadd.f32 %v2784_v10, %v6669_v34  ;;  %v2770_v57 = vmul.f32 %v2754_v45, %v6680_v2  ;;  %v2702_v28 = vpop.f32.mrf.mxu0  ;;  %v2785_v40 = vmul.f32 %v2769_v16, %v6674_v63 }
 0x55d   : > { %v2755_v55 = vmul.f32 0.044715, %v6687_v12  ;;  %v6694_v7 = vadd.f32 %v2702_v28, %v6662_v15 }
 0x55e   : > { %5372 = vtanh.f32 %v2815_v51  ;;  %v2786_v3 = vmul.f32 %v2770_v57, %v6680_v2  ;;  %v2706_v37 = vpop.f32.mrf.mxu0  ;;  %v2816_v9 = vmul.f32 0.7978846, %v2800_v46  ;;  %v2801_v61 = vadd.f32 %v2785_v40, %v6674_v63 }
 0x55f   : > { %v2771_v20 = vmul.f32 %v2755_v55, %v6687_v12  ;;  %v2756_v4 = vmul.f32 0.044715, %v6694_v7  ;;  %v6701_v52 = vadd.f32 %v2706_v37, %v6658_v43  ;;  %v2735_v37 = vmul.f32 0.5, %v6665_v27 }
 0x560   : > { %v2802_v17 = vadd.f32 %v2786_v3, %v6680_v2  ;;  %v2708_v22 = vpop.f32.mrf.mxu0  ;;  %5374 = vtanh.f32 %v2816_v9  ;;  %v2817_v29 = vmul.f32 0.7978846, %v2801_v61  ;;  %v2736_v9 = vmul.f32 0.5, %v6669_v34 }
 0x561   : > { %v2772_v1 = vmul.f32 %v2756_v4, %v6694_v7  ;;  %v2757_v14 = vmul.f32 0.044715, %v6701_v52  ;;  %v6707_v24 = vadd.f32 %v2708_v22, %v6662_v15  ;;  %v2787_v62 = vmul.f32 %v2771_v20, %v6687_v12 }
 0x562   : > { %v2818_v23 = vmul.f32 0.7978846, %v2802_v17  ;;  %5376 = vtanh.f32 %v2817_v29  ;;  %v2712_v35 = vpop.f32.mrf.mxu0 }
 0x563   : > { %v2788_v18 = vmul.f32 %v2772_v1, %v6694_v7  ;;  %v2773_v36 = vmul.f32 %v2757_v14, %v6701_v52  ;;  %v2758_v44 = vmul.f32 0.044715, %v6707_v24  ;;  %v2803_v8 = vadd.f32 %v2787_v62, %v6687_v12 }
 0x564   : > { %v6715_v60 = vadd.f32 %v2712_v35, %v6658_v43  ;;  %5378 = vtanh.f32 %v2818_v23  ;;  %v2714_v41 = vpop.f32.mrf.mxu0  ;;  %v2737_v62 = vmul.f32 0.5, %v6674_v63 }
 0x565   : > { %v2804_v0 = vadd.f32 %v2788_v18, %v6694_v7  ;;  %v2774_v30 = vmul.f32 %v2758_v44, %v6707_v24  ;;  %v2819_v11 = vmul.f32 0.7978846, %v2803_v8  ;;  %v2789_v38 = vmul.f32 %v2773_v36, %v6701_v52 }
 0x566   : > { %v2759_v50 = vmul.f32 0.044715, %v6715_v60  ;;  %v6722_v25 = vadd.f32 %v2714_v41, %v6662_v15  ;;  %v2738_v44 = vmul.f32 0.5, %v6680_v2 }
 0x567   : > { %v2790_v42 = vmul.f32 %v2774_v30, %v6707_v24  ;;  %v2718_v31 = vpop.f32.mrf.mxu0  ;;  %v2820_v56 = vmul.f32 0.7978846, %v2804_v0  ;;  %5380 = vtanh.f32 %v2819_v11  ;;  %v2805_v54 = vadd.f32 %v2789_v38, %v6701_v52 }
 0x568   : > { %v2775_v10 = vmul.f32 %v2759_v50, %v6715_v60  ;;  %v2760_v16 = vmul.f32 0.044715, %v6722_v25  ;;  %v6729_v45 = vadd.f32 %v2718_v31, %v6658_v43 }
 0x569   : > { %v2806_v21 = vadd.f32 %v2790_v42, %v6707_v24  ;;  %v2720_v51 = vpop.f32.mrf.mxu0  ;;  %5382 = vtanh.f32 %v2820_v56  ;;  %v2821_v46 = vmul.f32 0.7978846, %v2805_v54 }
 0x56a   : > { %v2776_v57 = vmul.f32 %v2760_v16, %v6722_v25  ;;  %v2761_v28 = vmul.f32 0.044715, %v6729_v45  ;;  %v6735_v40 = vadd.f32 %v2720_v51, %v6662_v15  ;;  %v2791_v55 = vmul.f32 %v2775_v10, %v6715_v60 }
 0x56b   : > { %v5373_v3 = vpop.eup %5372  ;;  %v2822_v61 = vmul.f32 0.7978846, %v2806_v21  ;;  %5384 = vtanh.f32 %v2821_v46  ;;  %v2724_v22 = vpop.f32.mrf.mxu0 }
 0x56c   : > { %v2792_v20 = vmul.f32 %v2776_v57, %v6722_v25  ;;  %v2777_v4 = vmul.f32 %v2761_v28, %v6729_v45  ;;  %v2762_v17 = vmul.f32 0.044715, %v6735_v40  ;;  %v2847_v29 = vadd.f32 1.0, %v5373_v3 }
 0x56d   : > { %v5375_v1 = vpop.eup %5374  ;;  %v6744_v14 = vadd.f32 %v2724_v22, %v6658_v43  ;;  %5386 = vtanh.f32 %v2822_v61  ;;  %v2807_v27 = vadd.f32 %v2791_v55, %v6715_v60  ;;  %v2726_v18 = vpop.f32.mrf.mxu0 }
 0x56e   : > { %v2808_v34 = vadd.f32 %v2792_v20, %v6722_v25  ;;  %v2778_v23 = vmul.f32 %v2762_v17, %v6735_v40  ;;  %v2848_v36 = vadd.f32 1.0, %v5375_v1  ;;  %v6753_v0 = vadd.f32 %v2726_v18, %v6662_v15 }
 0x56f   : > { %v5377_v35 = vpop.eup %5376  ;;  %v2763_v8 = vmul.f32 0.044715, %v6744_v14  ;;  %v2823_v30 = vmul.f32 0.7978846, %v2807_v27  ;;  %v2793_v63 = vmul.f32 %v2777_v4, %v6729_v45  ;;  %v2730_v11 = vpop.f32.mrf.mxu0  ;;  %v2863_v50 = vmul.f32 %v2847_v29, %v2735_v37 }
 0x570   : > { %v2794_v41 = vmul.f32 %v2778_v23, %v6735_v40  ;;  %v2864_v38 = vmul.f32 %v2848_v36, %v2736_v9  ;;  %v2824_v42 = vmul.f32 0.7978846, %v2808_v34  ;;  %v2764_v56 = vmul.f32 0.044715, %v6753_v0 }
 0x571   : > { %v5379_v31 = vpop.eup %5378  ;;  %v6759_v2 = vadd.f32 %v2730_v11, %v6658_v43  ;;  %v2849_v54 = vadd.f32 1.0, %v5377_v35  ;;  %5388 = vtanh.f32 %v2823_v30  ;;  %v2779_v16 = vmul.f32 %v2763_v8, %v6744_v14  ;;  %v2732_v21 = vpop.f32.mrf.mxu0 }
 0x572   : > { %v2810_v10 = vadd.f32 %v2794_v41, %v6735_v40  ;;  %4781 = vmatprep.mubr.msk.f32.mxu1 %vm613_vm0, %v2864_v38  ;;  %v2850_v51 = vadd.f32 1.0, %v5379_v31  ;;  %5390 = vtanh.f32 %v2824_v42  ;;  %v2780_v46 = vmul.f32 %v2764_v56, %v6753_v0 }
 0x573   : > { %v2765_v57 = vmul.f32 0.044715, %v6759_v2  ;;  %v6767_v28 = vadd.f32 %v2732_v21, %v6662_v15  ;;  %2999 = vmatmul.mubr.f32.vlgmr.msra.gmra.mxu1 %v2863_v50  ;;  %v2809_v43 = vadd.f32 %v2793_v63, %v6729_v45  ;;  %v2865_v4 = vmul.f32 %v2849_v54, %v2737_v62 }
 0x574   : > { %v5381_v55 = vpop.eup %5380  ;;  %v2866_v3 = vmul.f32 %v2850_v51, %v2738_v44  ;;  %v2826_v37 = vmul.f32 0.7978846, %v2810_v10  ;;  %v2796_v9 = vmul.f32 %v2780_v46, %v6753_v0  ;;  %v2795_v29 = vmul.f32 %v2779_v16, %v6744_v14 }
 0x575   : > { %v2781_v61 = vmul.f32 %v2765_v57, %v6759_v2  ;;  %v2766_v20 = vmul.f32 0.044715, %v6767_v28  ;;  %v2851_v22 = vadd.f32 1.0, %v5381_v55  ;;  %v2825_v15 = vmul.f32 0.7978846, %v2809_v43 }
 0x576   : > { %v5383_v17 = vpop.eup %5382  ;;  %4782 = vmatprep.mubr.msk.f32.mxu1 %vm613_vm0, %v2866_v3  ;;  %5392 = vtanh.f32 %v2826_v37  ;;  %v2812_v1 = vadd.f32 %v2796_v9, %v6753_v0  ;;  %v2740_v34 = vmul.f32 0.5, %v6694_v7  ;;  %v2739_v36 = vmul.f32 0.5, %v6687_v12 }
 0x577   : > { %v2782_v27 = vmul.f32 %v2766_v20, %v6767_v28  ;;  %3004 = vmatmul.mubr.f32.gmra.mxu1 %v2865_v4  ;;  %v2852_v23 = vadd.f32 1.0, %v5383_v17  ;;  %5394 = vtanh.f32 %v2825_v15  ;;  %v2811_v62 = vadd.f32 %v2795_v29, %v6744_v14 }
 0x578   : > { %v5385_v18 = vpop.eup %5384  ;;  %v2797_v44 = vmul.f32 %v2781_v61, %v6759_v2  ;;  %v2828_v30 = vmul.f32 0.7978846, %v2812_v1  ;;  %v2867_v41 = vmul.f32 %v2851_v22, %v2739_v36  ;;  %v2742_v12 = vmul.f32 0.5, %v6707_v24 }
 0x579   : > { %v2798_v35 = vmul.f32 %v2782_v27, %v6767_v28  ;;  %v2868_v8 = vmul.f32 %v2852_v23, %v2740_v34  ;;  %v2853_v11 = vadd.f32 1.0, %v5385_v18  ;;  %v2827_v38 = vmul.f32 0.7978846, %v2811_v62 }
 0x57a   : > { %v5387_v63 = vpop.eup %5386  ;;  %v2813_v50 = vadd.f32 %v2797_v44, %v6759_v2  ;;  %5396 = vtanh.f32 %v2828_v30  ;;  %v2741_v31 = vmul.f32 0.5, %v6701_v52  ;;  %v2744_v24 = vmul.f32 0.5, %v6722_v25 }
 0x57b   : > { %v2814_v7 = vadd.f32 %v2798_v35, %v6767_v28  ;;  %4783 = vmatprep.mubr.msk.f32.mxu1 %vm613_vm0, %v2868_v8  ;;  %v2854_v42 = vadd.f32 1.0, %v5387_v63  ;;  %5398 = vtanh.f32 %v2827_v38  ;;  %v2743_v43 = vmul.f32 0.5, %v6715_v60 }
 0x57c   : > { %3009 = vmatmul.mubr.f32.gmra.mxu1 %v2867_v41  ;;  %v2829_v56 = vmul.f32 0.7978846, %v2813_v50  ;;  %v2869_v21 = vmul.f32 %v2853_v11, %v2741_v31  ;;  %v2746_v37 = vmul.f32 0.5, %v6735_v40  ;;  %v2745_v4 = vmul.f32 0.5, %v6729_v45 }
 0x57d   : > { %v2870_v54 = vmul.f32 %v2854_v42, %v2742_v12  ;;  %v2830_v10 = vmul.f32 0.7978846, %v2814_v7  ;;  %v2748_v60 = vmul.f32 0.5, %v6753_v0  ;;  %v2747_v1 = vmul.f32 0.5, %v6744_v14  ;;  %v4780_v14 = vld [vmem:[%s7706_s12] ss:$0 sm:$0xff] }
 0x57e   : > { %v5389_v16 = vpop.eup %5388  ;;  %5400 = vtanh.f32 %v2829_v56  ;;  %v2750_v45 = vmul.f32 0.5, %v6767_v28  ;;  %v2749_v44 = vmul.f32 0.5, %v6759_v2 }
 0x57f   : > { %v5391_v51 = vpop.eup %5390  ;;  %4784 = vmatprep.mubr.msk.f32.mxu1 %vm613_vm0, %v2870_v54  ;;  %v2855_v46 = vadd.f32 1.0, %v5389_v16  ;;  %5402 = vtanh.f32 %v2830_v10 }
 0x580   : > { %3014 = vmatmul.mubr.f32.gmra.mxu1 %v2869_v21  ;;  %v2856_v57 = vadd.f32 1.0, %v5391_v51 }
 0x581   : > { %v2871_v3 = vmul.f32 %v2855_v46, %v2743_v43 }
 0x582   : > { %v2872_v55 = vmul.f32 %v2856_v57, %v2744_v24 }
 0x583   : > { %v5393_v52 = vpop.eup %5392 }
 0x584   : > { %4785 = vmatprep.mubr.msk.f32.mxu1 %vm613_vm0, %v2872_v55  ;;  %v2858_v9 = vadd.f32 1.0, %v5393_v52  ;;  %v5395_v61 = vpop.eup %5394 }
 0x585   : > { %3019 = vmatmul.mubr.f32.gmra.mxu1 %v2871_v3  ;;  %v2857_v17 = vadd.f32 1.0, %v5395_v61  ;;  %v6838_v61 = vld [vmem:[%s7699_s5 + $0x8] ss:$0 sm:$0xff] }
 0x586   : > { %v2874_v20 = vmul.f32 %v2858_v9, %v2746_v37 }
 0x587   : > { %v5397_v22 = vpop.eup %5396  ;;  %v2873_v25 = vmul.f32 %v2857_v17, %v2745_v4 }
 0x588   : > { %4786 = vmatprep.mubr.msk.f32.mxu1 %vm613_vm0, %v2874_v20  ;;  %v5399_v15 = vpop.eup %5398  ;;  %v2860_v29 = vadd.f32 1.0, %v5397_v22  ;;  %v6845_v20 = vld [vmem:[%s7700_s6 + $0x1] ss:$0 sm:$0xff] }
 0x589   : > { %3024 = vmatmul.mubr.f32.gmra.mxu1 %v2873_v25  ;;  %v2859_v27 = vadd.f32 1.0, %v5399_v15  ;;  %v6853_v15 = vld [vmem:[%s7699_s5 + $0x9] ss:$0 sm:$0xff] }
 0x58a   : > { %v2876_v34 = vmul.f32 %v2860_v29, %v2748_v60 }
 0x58b   : > { %v5401_v40 = vpop.eup %5400  ;;  %v2875_v18 = vmul.f32 %v2859_v27, %v2747_v1 }
 0x58c   : > { %v5403_v23 = vpop.eup %5402  ;;  %v2861_v36 = vadd.f32 1.0, %v5401_v40  ;;  %4787 = vmatprep.mubr.msk.f32.mxu1 %vm613_vm0, %v2876_v34 }
 0x58d   : > { %v2862_v62 = vadd.f32 1.0, %v5403_v23  ;;  %3029 = vmatmul.mubr.f32.gmra.mxu1 %v2875_v18 }
 0x58e   : > { %v2877_v0 = vmul.f32 %v2861_v36, %v2749_v44 }
 0x58f   : > { %v2878_v35 = vmul.f32 %v2862_v62, %v2750_v45  ;;  %v6864_v62 = vld [vmem:[%s7699_s5 + $0xa] ss:$0 sm:$0xff] }
 0x591   : > { %4788 = vmatprep.mubr.msk.f32.mxu1 %vm613_vm0, %v2878_v35 }
 0x592   : > { %3034 = vmatmul.mubr.f32.gmra.mxu1 %v2877_v0 }
 0x633   : > { %v3000_v8 = vpop.f32.mrf.mxu1 }
 0x634   : > { %v3001_v30 = vadd.f32 %v4780_v14, %v3000_v8 }
 0x635   : > { %v3002_v63 = vpop.f32.mrf.mxu1 }
 0x636   : > { %v3039_v41 = vadd.f32 %v3001_v30, %v6143_v6 }
 0x637   : > { %v3005_v11 = vpop.f32.mrf.mxu1 }
 0x638   : > { %v3006_v28 = vadd.f32 %v4780_v14, %v3005_v11  ;;  %5290 = vmatprep.mubr.msk.f32.mxu0 %vm613_vm0, %v3039_v41 }
 0x639   : > { %v3007_v38 = vpop.f32.mrf.mxu1 }
 0x63a   : > { %v3040_v2 = vadd.f32 %v6139_v32, %v3006_v28  ;;  %v6878_v38 = vld [vmem:[%s7699_s5 + $0xc] ss:$0 sm:$0xff] }
 0x63c   : > { %v3010_v50 = vpop.f32.mrf.mxu1  ;;  %5291 = vmatmul.mubr.msk.f32.vlgmr.msra.gmra.mxu0 %vm613_vm0, %v3040_v2  ;;  %v6883_v2 = vld [vmem:[%s7699_s5 + $0xd] ss:$0 sm:$0xff] }
 0x63d   : > { %v3011_v7 = vadd.f32 %v4780_v14, %v3010_v50 }
 0x63e   : > { %v3012_v12 = vpop.f32.mrf.mxu1 }
 0x63f   : > { %v3041_v42 = vadd.f32 %v3011_v7, %v6161_v49 }
 0x640   : > { %v3015_v31 = vpop.f32.mrf.mxu1 }
 0x641   : > { %v3016_v56 = vadd.f32 %v4780_v14, %v3015_v31  ;;  %5293 = vmatprep.mubr.msk.f32.mxu0 %vm613_vm0, %v3041_v42 }
 0x642   : > { %v3017_v54 = vpop.f32.mrf.mxu1 }
 0x643   : > { %v3042_v6 = vadd.f32 %v6147_v47, %v3016_v56 }
 0x645   : > { %v3020_v10 = vpop.f32.mrf.mxu1  ;;  %5294 = vmatmul.mubr.msk.f32.gmra.mxu0 %vm613_vm0, %v3042_v6 }
 0x646   : > { %v3021_v16 = vadd.f32 %v4780_v14, %v3020_v10 }
 0x647   : > { %v3022_v21 = vpop.f32.mrf.mxu1 }
 0x648   : > { %v3043_v32 = vadd.f32 %v3021_v16, %v6198_v26 }
 0x649   : > { %v3025_v51 = vpop.f32.mrf.mxu1 }
 0x64a   : > { %5296 = vmatprep.mubr.msk.f32.mxu0 %vm613_vm0, %v3043_v32  ;;  %v3026_v46 = vadd.f32 %v4780_v14, %v3025_v51 }
 0x64b   : > { %v3027_v24 = vpop.f32.mrf.mxu1 }
 0x64c   : > { %v3044_v49 = vadd.f32 %v6187_v33, %v3026_v46 }
 0x64d   : > { %v3030_v57 = vpop.f32.mrf.mxu1 }
 0x64e   : > { %v3031_v43 = vadd.f32 %v4780_v14, %v3030_v57  ;;  %5297 = vmatmul.mubr.msk.f32.gmra.mxu0 %vm613_vm0, %v3044_v49 }
 0x64f   : > { %v3032_v55 = vpop.f32.mrf.mxu1 }
 0x650   : > { %v3045_v47 = vadd.f32 %v3031_v43, %v6234_v59  ;;  %v6831_v59 = vld [vmem:[%s7699_s5 + $0x7] ss:$0 sm:$0xff] }
 0x652   : > { %v3035_v52 = vpop.f32.mrf.mxu1  ;;  %5299 = vmatprep.mubr.msk.f32.mxu0 %vm613_vm0, %v3045_v47 }
 0x653   : > { %v3036_v3 = vadd.f32 %v4780_v14, %v3035_v52  ;;  %v6871_v14 = vld [vmem:[%s7699_s5 + $0xb] ss:$0 sm:$0xff] }
 0x654   : > { %v3037_v37 = vpop.f32.mrf.mxu1 }
 0x655   : > { %v3046_v26 = vadd.f32 %v6225_v5, %v3036_v3 }
 0x657   : > { %5300 = vmatmul.mubr.msk.f32.gmra.mxu0 %vm613_vm0, %v3046_v26 }
 0x658   : > { %3799 = vmatprep.mubr.f32.mxu0 %v5484_v48 }
 0x6fc   : > { %v6820_v9 = vpop.f32.mrf.mxu0 }
 0x6fd   : > { %3177 = vst.msk [vmem:[#allocation2 + $0x10] sm:$0xff] %vm613_vm0, %v6820_v9 }
 0x6fe   : > { %v6824_v33 = vpop.f32.mrf.mxu0 }
 0x6ff   : > { %3176 = vst.msk [vmem:[#allocation2 + $0x8] sm:$0xff] %vm613_vm0, %v6824_v33 }
 0x704   : > { %v3290_v8 = vld [vmem:[#allocation2 + $0x10] sm:$0xff] }
 0x705   : > { %v6833_v5 = vpop.f32.mrf.mxu0  ;;  %v3306_v56 = vmul.f32 %v6864_v62, %v3290_v8 }
 0x706   : > { %3179 = vst.msk [vmem:[#allocation2 + $0x20] sm:$0xff] %vm613_vm0, %v6833_v5  ;;  %v3193_v4 = vld [vmem:[#allocation2 + $0x5] sm:$0xff]  ;;  %v3194_v29 = vld [vmem:[#allocation2 + $0xd] sm:$0xff] }
 0x707   : > { %v3225_v17 = vld [vmem:[#allocation2 + $0x6] sm:$0xff]  ;;  %v6847_v22 = vpop.f32.mrf.mxu0  ;;  %v3209_v25 = vmul.f32 %v6831_v59, %v3193_v4  ;;  %v3226_v1 = vld [vmem:[#allocation2 + $0xe] sm:$0xff]  ;;  %v3210_v34 = vmul.f32 %v6831_v59, %v3194_v29 }
 0x708   : > { %3178 = vst.msk [vmem:[#allocation2 + $0x18] sm:$0xff] %vm613_vm0, %v6847_v22  ;;  %v3257_v60 = vld [vmem:[#allocation2 + $0x7] sm:$0xff]  ;;  %v3241_v40 = vmul.f32 %v6838_v61, %v3225_v17  ;;  %v3258_v18 = vld [vmem:[#allocation2 + $0xf] sm:$0xff]  ;;  %v3242_v35 = vmul.f32 %v6838_v61, %v3226_v1 }
 0x709   : > { %v3217_v27 = vadd.f32 %v6845_v20, %v3209_v25  ;;  %v3289_v23 = vld [vmem:[#allocation2 + $0x8] sm:$0xff]  ;;  %v3273_v45 = vmul.f32 %v6853_v15, %v3257_v60  ;;  %v3218_v44 = vadd.f32 %v6845_v20, %v3210_v34  ;;  %v3274_v11 = vmul.f32 %v6853_v15, %v3258_v18 }
 0x70a   : > { %v3321_v0 = vld [vmem:[#allocation2 + $0x9] sm:$0xff]  ;;  %v3305_v63 = vmul.f32 %v6864_v62, %v3289_v23 }
 0x70b   : > { %v3249_v36 = vadd.f32 %v3241_v40, %v3217_v27  ;;  %v3250_v41 = vadd.f32 %v3242_v35, %v3218_v44  ;;  %v3353_v28 = vld [vmem:[#allocation2 + $0xa] sm:$0xff]  ;;  %v3337_v12 = vmul.f32 %v6871_v14, %v3321_v0 }
 0x70c   : > { %v3385_v42 = vld [vmem:[#allocation2 + $0xb] sm:$0xff]  ;;  %v3369_v46 = vmul.f32 %v6878_v38, %v3353_v28 }
 0x70d   : > { %v3281_v30 = vadd.f32 %v3273_v45, %v3249_v36  ;;  %v3282_v31 = vadd.f32 %v3274_v11, %v3250_v41  ;;  %v3401_v43 = vmul.f32 %v6883_v2, %v3385_v42  ;;  %v3292_v41 = vld [vmem:[#allocation2 + $0x20] sm:$0xff] }
 0x70e   : > { %v6885_v50 = vpop.f32.mrf.mxu0 }
 0x70f   : > { %v3313_v7 = vadd.f32 %v3305_v63, %v3281_v30  ;;  %v3322_v54 = vld [vmem:[#allocation2 + $0x11] sm:$0xff]  ;;  %3181 = vst.msk [vmem:[#allocation2 + $0x30] sm:$0xff] %vm613_vm0, %v6885_v50  ;;  %v3314_v24 = vadd.f32 %v3306_v56, %v3282_v31  ;;  %v3196_v52 = vld [vmem:[#allocation2 + $0x1d] sm:$0xff] }
 0x710   : > { %v3354_v6 = vld [vmem:[#allocation2 + $0x12] sm:$0xff]  ;;  %v3338_v10 = vmul.f32 %v6871_v14, %v3322_v54  ;;  %v6892_v32 = vpop.f32.mrf.mxu0  ;;  %v3228_v25 = vld [vmem:[#allocation2 + $0x1e] sm:$0xff]  ;;  %v3212_v29 = vmul.f32 %v6831_v59, %v3196_v52 }
 0x711   : > { %v3195_v16 = vld [vmem:[#allocation2 + $0x15] sm:$0xff]  ;;  %v3345_v51 = vadd.f32 %v3337_v12, %v3313_v7  ;;  %3180 = vst.msk [vmem:[#allocation2 + $0x28] sm:$0xff] %vm613_vm0, %v6892_v32  ;;  %v3370_v55 = vmul.f32 %v6878_v38, %v3354_v6  ;;  %v3260_v23 = vld [vmem:[#allocation2 + $0x1f] sm:$0xff]  ;;  %v3244_v44 = vmul.f32 %v6838_v61, %v3228_v25 }
 0x712   : > { %v3227_v21 = vld [vmem:[#allocation2 + $0x16] sm:$0xff]  ;;  %v3211_v57 = vmul.f32 %v6831_v59, %v3195_v16  ;;  %v3346_v37 = vadd.f32 %v3338_v10, %v3314_v24  ;;  %v3220_v45 = vadd.f32 %v6845_v20, %v3212_v29  ;;  %v3276_v7 = vmul.f32 %v6853_v15, %v3260_v23 }
 0x713   : > { %v3386_v49 = vld [vmem:[#allocation2 + $0x13] sm:$0xff]  ;;  %v3377_v3 = vadd.f32 %v3369_v46, %v3345_v51  ;;  %v3243_v4 = vmul.f32 %v6838_v61, %v3227_v21  ;;  %v3387_v6 = vld [vmem:[#allocation2 + $0x1b] sm:$0xff]  ;;  %v3308_v21 = vmul.f32 %v6864_v62, %v3292_v41 }
 0x714   : > { %v3259_v47 = vld [vmem:[#allocation2 + $0x17] sm:$0xff]  ;;  %v3219_v26 = vadd.f32 %v6845_v20, %v3211_v57  ;;  %v3402_v60 = vmul.f32 %v6883_v2, %v3386_v49  ;;  %v3378_v27 = vadd.f32 %v3370_v55, %v3346_v37  ;;  %v3252_v28 = vadd.f32 %v3244_v44, %v3220_v45 }
 0x715   : > { %v3291_v17 = vld [vmem:[#allocation2 + $0x18] sm:$0xff]  ;;  %v6904_v1 = vadd.f32 %v3401_v43, %v3377_v3  ;;  %v3275_v34 = vmul.f32 %v6853_v15, %v3259_v47  ;;  %v3403_v52 = vmul.f32 %v6883_v2, %v3387_v6 }
 0x716   : > { %v3251_v40 = vadd.f32 %v3243_v4, %v3219_v26  ;;  %v3307_v18 = vmul.f32 %v6864_v62, %v3291_v17  ;;  %v3323_v36 = vld [vmem:[#allocation2 + $0x19] sm:$0xff]  ;;  %v6916_v30 = vadd.f32 %v3402_v60, %v3378_v27  ;;  %v3284_v16 = vadd.f32 %v3276_v7, %v3252_v28 }
 0x717   : > { %v6910_v35 = vpop.f32.mrf.mxu0  ;;  %v3453_v0 = vsel %vm613_vm0, %v6904_v1, 0.0  ;;  %v3421_v8 = vmul.f32 %v5920_v53, %v6904_v1  ;;  %v3355_v11 = vld [vmem:[#allocation2 + $0x1a] sm:$0xff]  ;;  %v3339_v54 = vmul.f32 %v6871_v14, %v3323_v36 }
 0x718   : > { %v3283_v63 = vadd.f32 %v3275_v34, %v3251_v40  ;;  %3183 = vst.msk [vmem:[#allocation2 + $0x40] sm:$0xff] %vm613_vm0, %v6910_v35  ;;  %3454 = vadd.xlane.f32.xlu1 %v3453_v0  ;;  %v3422_v31 = vmul.f32 %v5920_v53, %v6916_v30  ;;  %v3324_v10 = vld [vmem:[#allocation2 + $0x21] sm:$0xff]  ;;  %v3456_v49 = vsel %vm613_vm0, %v6916_v30, 0.0  ;;  %v3371_v43 = vmul.f32 %v6878_v38, %v3355_v11  ;;  %v3198_v26 = vld [vmem:[#allocation2 + $0x2d] sm:$0xff] }
 0x719   : > { %v6921_v12 = vpop.f32.mrf.mxu0  ;;  %v3429_v42 = vsel %vm613_vm0, %v3421_v8, 0.0  ;;  %v3340_v51 = vmul.f32 %v6871_v14, %v3324_v10  ;;  %v3197_v46 = vld [vmem:[#allocation2 + $0x25] sm:$0xff]  ;;  %v3316_v3 = vadd.f32 %v3308_v21, %v3284_v16  ;;  %v3230_v27 = vld [vmem:[#allocation2 + $0x2e] sm:$0xff] }
 0x71a   : > { %v3315_v56 = vadd.f32 %v3307_v18, %v3283_v63  ;;  %3182 = vst.msk [vmem:[#allocation2 + $0x38] sm:$0xff] %vm613_vm0, %v6921_v12  ;;  %3430 = vadd.xlane.f32.xlu0 %v3429_v42  ;;  %v3229_v24 = vld [vmem:[#allocation2 + $0x26] sm:$0xff]  ;;  %v3213_v47 = vmul.f32 %v6831_v59, %v3197_v46  ;;  %v3432_v4 = vsel %vm613_vm0, %v3422_v31, 0.0  ;;  %v3214_v18 = vmul.f32 %v6831_v59, %v3198_v26  ;;  %v3262_v0 = vld [vmem:[#allocation2 + $0x2f] sm:$0xff] }
 0x71b   : > { %v3356_v55 = vld [vmem:[#allocation2 + $0x22] sm:$0xff]  ;;  %v3245_v29 = vmul.f32 %v6838_v61, %v3229_v24  ;;  %v3348_v40 = vadd.f32 %v3340_v51, %v3316_v3  ;;  %v3294_v8 = vld [vmem:[#allocation2 + $0x30] sm:$0xff]  ;;  %v3246_v7 = vmul.f32 %v6838_v61, %v3230_v27  ;;  %v3278_v51 = vmul.f32 %v6853_v15, %v3262_v0 }
 0x71c   : > { %v3347_v57 = vadd.f32 %v3339_v54, %v3315_v56  ;;  %3457 = vadd.xlane.f32.xlu1 %v3456_v49  ;;  %v3261_v37 = vld [vmem:[#allocation2 + $0x27] sm:$0xff]  ;;  %v3221_v60 = vadd.f32 %v6845_v20, %v3213_v47  ;;  %v3372_v34 = vmul.f32 %v6878_v38, %v3356_v55  ;;  %v3222_v28 = vadd.f32 %v6845_v20, %v3214_v18 }
 0x71d   : > { %v3388_v25 = vld [vmem:[#allocation2 + $0x23] sm:$0xff]  ;;  %v3277_v44 = vmul.f32 %v6853_v15, %v3261_v37  ;;  %v3310_v46 = vmul.f32 %v6864_v62, %v3294_v8  ;;  %v3389_v47 = vld [vmem:[#allocation2 + $0x2b] sm:$0xff] }
 0x71e   : > { %v3379_v17 = vadd.f32 %v3371_v43, %v3347_v57  ;;  %3433 = vadd.xlane.f32.xlu0 %v3432_v4  ;;  %v3293_v23 = vld [vmem:[#allocation2 + $0x28] sm:$0xff]  ;;  %v3253_v45 = vadd.f32 %v3245_v29, %v3221_v60  ;;  %v3380_v63 = vadd.f32 %v3372_v34, %v3348_v40  ;;  %v3404_v41 = vmul.f32 %v6883_v2, %v3388_v25 }
 0x71f   : > { %v3325_v11 = vld [vmem:[#allocation2 + $0x29] sm:$0xff]  ;;  %v3309_v54 = vmul.f32 %v6864_v62, %v3293_v23  ;;  %v3254_v21 = vadd.f32 %v3246_v7, %v3222_v28  ;;  %v3405_v18 = vmul.f32 %v6883_v2, %v3389_v47 }
 0x720   : > { %v6941_v36 = vadd.f32 %v3403_v52, %v3379_v17  ;;  %v3285_v56 = vadd.f32 %v3277_v44, %v3253_v45  ;;  %v3357_v6 = vld [vmem:[#allocation2 + $0x2a] sm:$0xff]  ;;  %v6952_v16 = vadd.f32 %v3404_v41, %v3380_v63  ;;  %v3341_v55 = vmul.f32 %v6871_v14, %v3325_v11 }
 0x721   : > { %v3326_v10 = vld [vmem:[#allocation2 + $0x31] sm:$0xff]  ;;  %v3373_v26 = vmul.f32 %v6878_v38, %v3357_v6  ;;  %v3286_v4 = vadd.f32 %v3278_v51, %v3254_v21  ;;  %v3200_v25 = vld [vmem:[#allocation2 + $0x3d] sm:$0xff] }
 0x722   : > { %v3459_v42 = vsel %vm613_vm0, %v6941_v36, 0.0  ;;  %v3423_v31 = vmul.f32 %v5920_v53, %v6941_v36  ;;  %v3199_v24 = vld [vmem:[#allocation2 + $0x35] sm:$0xff]  ;;  %v3317_v43 = vadd.f32 %v3309_v54, %v3285_v56  ;;  %v3424_v37 = vmul.f32 %v5920_v53, %v6952_v16  ;;  %v3232_v0 = vld [vmem:[#allocation2 + $0x3e] sm:$0xff] }
 0x723   : > { %3460 = vadd.xlane.f32.xlu1 %v3459_v42  ;;  %v3231_v49 = vld [vmem:[#allocation2 + $0x36] sm:$0xff]  ;;  %v3215_v52 = vmul.f32 %v6831_v59, %v3199_v24  ;;  %v3342_v17 = vmul.f32 %v6871_v14, %v3326_v10  ;;  %v3462_v60 = vsel %vm613_vm0, %v6952_v16, 0.0  ;;  %v3318_v45 = vadd.f32 %v3310_v46, %v3286_v4  ;;  %v3264_v42 = vld [vmem:[#allocation2 + $0x3f] sm:$0xff] }
 0x724   : > { %v3435_v57 = vsel %vm613_vm0, %v3423_v31, 0.0  ;;  %v3263_v3 = vld [vmem:[#allocation2 + $0x37] sm:$0xff]  ;;  %v3349_v29 = vadd.f32 %v3341_v55, %v3317_v43  ;;  %v3247_v34 = vmul.f32 %v6838_v61, %v3231_v49  ;;  %v3438_v8 = vsel %vm613_vm0, %v3424_v37, 0.0  ;;  %v3296_v46 = vld [vmem:[#allocation2 + $0x40] sm:$0xff] }
 0x725   : > { %3436 = vadd.xlane.f32.xlu0 %v3435_v57  ;;  %v3358_v27 = vld [vmem:[#allocation2 + $0x32] sm:$0xff]  ;;  %v3223_v40 = vadd.f32 %v6845_v20, %v3215_v52  ;;  %v3279_v44 = vmul.f32 %v6853_v15, %v3263_v3  ;;  %v3216_v7 = vmul.f32 %v6831_v59, %v3200_v25  ;;  %v3350_v31 = vadd.f32 %v3342_v17, %v3318_v45  ;;  %v3359_v57 = vld [vmem:[#allocation2 + $0x3a] sm:$0xff] }
 0x726   : > { %v3295_v23 = vld [vmem:[#allocation2 + $0x38] sm:$0xff]  ;;  %v3381_v63 = vadd.f32 %v3373_v26, %v3349_v29  ;;  %v3374_v56 = vmul.f32 %v6878_v38, %v3358_v27  ;;  %v3248_v51 = vmul.f32 %v6838_v61, %v3232_v0  ;;  %v3280_v43 = vmul.f32 %v6853_v15, %v3264_v42  ;;  %v3360_v27 = vld [vmem:[#allocation2 + $0x42] sm:$0xff] }
 0x727   : > { %3463 = vadd.xlane.f32.xlu1 %v3462_v60  ;;  %v3390_v41 = vld [vmem:[#allocation2 + $0x33] sm:$0xff]  ;;  %v3255_v11 = vadd.f32 %v3247_v34, %v3223_v40  ;;  %v3311_v54 = vmul.f32 %v6864_v62, %v3295_v23  ;;  %v3224_v21 = vadd.f32 %v6845_v20, %v3216_v7  ;;  %v3328_v20 = vld [vmem:[#allocation2 + $0x41] sm:$0xff]  ;;  %v3312_v26 = vmul.f32 %v6864_v62, %v3296_v46 }
 0x728   : > { %v3327_v28 = vld [vmem:[#allocation2 + $0x39] sm:$0xff]  ;;  %v6973_v6 = vadd.f32 %v3405_v18, %v3381_v63  ;;  %v3382_v24 = vadd.f32 %v3374_v56, %v3350_v31  ;;  %v3406_v49 = vmul.f32 %v6883_v2, %v3390_v41  ;;  %v3375_v15 = vmul.f32 %v6878_v38, %v3359_v57  ;;  %v3392_v18 = vld [vmem:[#allocation2 + $0x43] sm:$0xff] }
 0x729   : > { %3439 = vadd.xlane.f32.xlu0 %v3438_v8  ;;  %v3287_v10 = vadd.f32 %v3279_v44, %v3255_v11  ;;  %v3343_v59 = vmul.f32 %v6871_v14, %v3327_v28  ;;  %v3256_v3 = vadd.f32 %v3248_v51, %v3224_v21  ;;  %v3391_v37 = vld [vmem:[#allocation2 + $0x3b] sm:$0xff]  ;;  %v3344_v29 = vmul.f32 %v6871_v14, %v3328_v20 }
 0x72a   : > { %v3465_v55 = vsel %vm613_vm0, %v6973_v6, 0.0  ;;  %v3425_v47 = vmul.f32 %v5920_v53, %v6973_v6  ;;  %v6984_v61 = vadd.f32 %v3406_v49, %v3382_v24  ;;  %v3407_v23 = vmul.f32 %v6883_v2, %v3391_v37 }
 0x72b   : > { %v3319_v52 = vadd.f32 %v3311_v54, %v3287_v10  ;;  %3466 = vadd.xlane.f32.xlu1 %v3465_v55  ;;  %v3288_v25 = vadd.f32 %v3280_v43, %v3256_v3  ;;  %v3376_v8 = vmul.f32 %v6878_v38, %v3360_v27  ;;  %v3408_v11 = vmul.f32 %v6883_v2, %v3392_v18 }
 0x72c   : > { %v3441_v4 = vsel %vm613_vm0, %v3425_v47, 0.0  ;;  %v3426_v60 = vmul.f32 %v5920_v53, %v6984_v61  ;;  %v3468_v40 = vsel %vm613_vm0, %v6984_v61, 0.0 }
 0x72d   : > { %v3351_v17 = vadd.f32 %v3343_v59, %v3319_v52  ;;  %3442 = vadd.xlane.f32.xlu0 %v3441_v4  ;;  %v3320_v62 = vadd.f32 %v3312_v26, %v3288_v25 }
 0x72e   : > { %v3444_v45 = vsel %vm613_vm0, %v3426_v60, 0.0 }
 0x72f   : > { %v3383_v34 = vadd.f32 %v3375_v15, %v3351_v17  ;;  %3469 = vadd.xlane.f32.xlu1 %v3468_v40  ;;  %v3352_v0 = vadd.f32 %v3344_v29, %v3320_v62 }
 0x731   : > { %v6996_v44 = vadd.f32 %v3407_v23, %v3383_v34  ;;  %3445 = vadd.xlane.f32.xlu0 %v3444_v45  ;;  %v3384_v41 = vadd.f32 %v3376_v8, %v3352_v0 }
 0x733   : > { %v3471_v14 = vsel %vm613_vm0, %v6996_v44, 0.0  ;;  %v3427_v63 = vmul.f32 %v5920_v53, %v6996_v44  ;;  %v7005_v7 = vadd.f32 %v3408_v11, %v3384_v41 }
 0x734   : > { %3472 = vadd.xlane.f32.xlu1 %v3471_v14 }
 0x735   : > { %v3447_v28 = vsel %vm613_vm0, %v3427_v63, 0.0  ;;  %v3474_v42 = vsel %vm613_vm0, %v7005_v7, 0.0  ;;  %v3428_v38 = vmul.f32 %v5920_v53, %v7005_v7 }
 0x736   : > { %3448 = vadd.xlane.f32.xlu0 %v3447_v28 }
 0x737   : > { %v3450_v31 = vsel %vm613_vm0, %v3428_v38, 0.0 }
 0x738   : > { %3475 = vadd.xlane.f32.xlu1 %v3474_v42 }
 0x73a   : > { %3451 = vadd.xlane.f32.xlu0 %v3450_v31 }
 0x7a1   : > { %v3455_v56 = vpop.xlane.xlu1 %3454 }
 0x7a3   : > { %v3431_v54 = vpop.xlane.xlu0 %3430 }
 0x7a4   : > { %v3485_v10 = vsub.f32 %v3455_v56, %v3431_v54  ;;  %v3477_v21 = vmul.f32 %v5920_v53, %v3431_v54 }
 0x7a5   : > { %v3458_v2 = vpop.xlane.xlu1 %3457 }
 0x7a6   : > { %v3493_v51 = vmul.f32 %v3485_v10, %v5994_v19 }
 0x7a7   : > { %v3434_v46 = vpop.xlane.xlu0 %3433 }
 0x7a8   : > { %v3501_v24 = vadd.f32 %v3493_v51, %v3477_v21  ;;  %v3486_v49 = vsub.f32 %v3458_v2, %v3434_v46  ;;  %v3478_v57 = vmul.f32 %v5920_v53, %v3434_v46 }
 0x7aa   : > { %v3509_v59 = vmul.f32 0.03125, %v3501_v24  ;;  %v3494_v43 = vmul.f32 %v3486_v49, %v5994_v19 }
 0x7ac   : > { %v3461_v55 = vpop.xlane.xlu1 %3460  ;;  %v3502_v47 = vadd.f32 %v3494_v43, %v3478_v57  ;;  %v7017_v52 = vsub.f32 %v6904_v1, %v3509_v59 }
 0x7ae   : > { %v3437_v3 = vpop.xlane.xlu0 %3436  ;;  %v3510_v20 = vmul.f32 0.03125, %v3502_v47  ;;  %v3525_v26 = vmul.f32 %v7017_v52, %v7017_v52 }
 0x7af   : > { %v3487_v37 = vsub.f32 %v3461_v55, %v3437_v3  ;;  %v3479_v4 = vmul.f32 %v5920_v53, %v3437_v3 }
 0x7b0   : > { %v3464_v17 = vpop.xlane.xlu1 %3463  ;;  %v3565_v25 = vsel %vm613_vm0, %v3525_v26, 0.0  ;;  %v3533_v60 = vmul.f32 %v5920_v53, %v3525_v26  ;;  %v7026_v29 = vsub.f32 %v6916_v30, %v3510_v20 }
 0x7b1   : > { %v3495_v15 = vmul.f32 %v3487_v37, %v5994_v19  ;;  %3566 = vadd.xlane.f32.xlu1 %v3565_v25 }
 0x7b2   : > { %v3440_v1 = vpop.xlane.xlu0 %3439  ;;  %v3541_v34 = vsel %vm613_vm0, %v3533_v60, 0.0  ;;  %v3526_v23 = vmul.f32 %v7026_v29, %v7026_v29 }
 0x7b3   : > { %v3503_v27 = vadd.f32 %v3495_v15, %v3479_v4  ;;  %v3488_v40 = vsub.f32 %v3464_v17, %v3440_v1  ;;  %3542 = vadd.xlane.f32.xlu0 %v3541_v34  ;;  %v3480_v18 = vmul.f32 %v5920_v53, %v3440_v1 }
 0x7b4   : > { %v3467_v0 = vpop.xlane.xlu1 %3466  ;;  %v3568_v8 = vsel %vm613_vm0, %v3526_v23, 0.0  ;;  %v3534_v30 = vmul.f32 %v5920_v53, %v3526_v23 }
 0x7b5   : > { %v3511_v62 = vmul.f32 0.03125, %v3503_v27  ;;  %v3496_v45 = vmul.f32 %v3488_v40, %v5994_v19  ;;  %3569 = vadd.xlane.f32.xlu1 %v3568_v8 }
 0x7b6   : > { %v3443_v41 = vpop.xlane.xlu0 %3442  ;;  %v3544_v11 = vsel %vm613_vm0, %v3534_v30, 0.0 }
 0x7b7   : > { %v3504_v14 = vadd.f32 %v3496_v45, %v3480_v18  ;;  %v7036_v63 = vsub.f32 %v6941_v36, %v3511_v62  ;;  %v3489_v42 = vsub.f32 %v3467_v0, %v3443_v41  ;;  %3545 = vadd.xlane.f32.xlu0 %v3544_v11  ;;  %v3481_v31 = vmul.f32 %v5920_v53, %v3443_v41 }
 0x7b8   : > { %v3470_v56 = vpop.xlane.xlu1 %3469 }
 0x7b9   : > { %v3512_v28 = vmul.f32 0.03125, %v3504_v14  ;;  %v3527_v38 = vmul.f32 %v7036_v63, %v7036_v63  ;;  %v3497_v54 = vmul.f32 %v3489_v42, %v5994_v19 }
 0x7ba   : > { %v3446_v21 = vpop.xlane.xlu0 %3445 }
 0x7bb   : > { %v3571_v10 = vsel %vm613_vm0, %v3527_v38, 0.0  ;;  %v3535_v2 = vmul.f32 %v5920_v53, %v3527_v38  ;;  %v7046_v36 = vsub.f32 %v6952_v16, %v3512_v28  ;;  %v3505_v51 = vadd.f32 %v3497_v54, %v3481_v31 }
 0x7bc   : > { %3572 = vadd.xlane.f32.xlu1 %v3571_v10  ;;  %v3490_v46 = vsub.f32 %v3470_v56, %v3446_v21  ;;  %v3482_v43 = vmul.f32 %v5920_v53, %v3446_v21 }
 0x7bd   : > { %v3547_v24 = vsel %vm613_vm0, %v3535_v2, 0.0  ;;  %v3473_v49 = vpop.xlane.xlu1 %3472  ;;  %v3528_v59 = vmul.f32 %v7046_v36, %v7046_v36  ;;  %v3513_v57 = vmul.f32 0.03125, %v3505_v51 }
 0x7be   : > { %3548 = vadd.xlane.f32.xlu0 %v3547_v24  ;;  %v3498_v55 = vmul.f32 %v3490_v46, %v5994_v19  ;;  %v4831_v46 = vld [vmem:[%s7703_s9 + $0xf0] sm:$0xff]  ;;  %v4830_v24 = vld [vmem:[%s7703_s9 + $0xe8] sm:$0xff] }
 0x7bf   : > { %v3449_v47 = vpop.xlane.xlu0 %3448  ;;  %v3574_v16 = vsel %vm613_vm0, %v3528_v59, 0.0  ;;  %v3536_v3 = vmul.f32 %v5920_v53, %v3528_v59  ;;  %v7056_v26 = vsub.f32 %v6973_v6, %v3513_v57  ;;  %v4828_v59 = vld [vmem:[%s7703_s9 + $0xd8] sm:$0xff]  ;;  %v4827_v57 = vld [vmem:[%s7703_s9 + $0xd0] sm:$0xff] }
 0x7c0   : > { %v3506_v20 = vadd.f32 %v3498_v55, %v3482_v43  ;;  %v3491_v37 = vsub.f32 %v3473_v49, %v3449_v47  ;;  %3575 = vadd.xlane.f32.xlu1 %v3574_v16  ;;  %v3483_v15 = vmul.f32 %v5920_v53, %v3449_v47  ;;  %v4829_v49 = vld [vmem:[%s7703_s9 + $0xe0] sm:$0xff]  ;;  %v4826_v43 = vld [vmem:[%s7703_s9 + $0xc8] sm:$0xff]  ;;  %v4824_v47 = vld [vmem:[%s7703_s9 + $0xb8] sm:$0xff] }
 0x7c1   : > { %v3550_v4 = vsel %vm613_vm0, %v3536_v3, 0.0  ;;  %v3529_v60 = vmul.f32 %v7056_v26, %v7056_v26  ;;  %v3476_v1 = vpop.xlane.xlu1 %3475  ;;  %v4825_v55 = vld [vmem:[%s7703_s9 + $0xc0] sm:$0xff]  ;;  %v4823_v16 = vld [vmem:[%s7703_s9 + $0xb0] sm:$0xff]  ;;  %v4822_v3 = vld [vmem:[%s7703_s9 + $0xa8] sm:$0xff] }
 0x7c2   : > { %v3514_v17 = vmul.f32 0.03125, %v3506_v20  ;;  %v3499_v25 = vmul.f32 %v3491_v37, %v5994_v19  ;;  %3551 = vadd.xlane.f32.xlu0 %v3550_v4  ;;  %v4821_v20 = vld [vmem:[%s7703_s9 + $0xa0] sm:$0xff]  ;;  %v4820_v37 = vld [vmem:[%s7703_s9 + $0x98] sm:$0xff]  ;;  %v4819_v4 = vld [vmem:[%s7703_s9 + $0x90] sm:$0xff] }
 0x7c3   : > { %v3452_v27 = vpop.xlane.xlu0 %3451  ;;  %v3577_v23 = vsel %vm613_vm0, %v3529_v60, 0.0  ;;  %v3537_v6 = vmul.f32 %v5920_v53, %v3529_v60  ;;  %v4856_v60 = vld [vmem:[%s7705_s11 + $0x130] sm:$0xff] }
 0x7c4   : > { %v3507_v40 = vadd.f32 %v3499_v25, %v3483_v15  ;;  %v3492_v34 = vsub.f32 %v3476_v1, %v3452_v27  ;;  %3578 = vadd.xlane.f32.xlu1 %v3577_v23  ;;  %v7066_v62 = vsub.f32 %v6984_v61, %v3514_v17  ;;  %v3484_v45 = vmul.f32 %v5920_v53, %v3452_v27  ;;  %v4818_v17 = vld [vmem:[%s7703_s9 + $0x88] sm:$0xff]  ;;  %v4817_v15 = vld [vmem:[%s7703_s9 + $0x80] sm:$0xff]  ;;  %v4857_v25 = vld [vmem:[%s7705_s11 + $0x138] sm:$0xff] }
 0x7c5   : > { %v3553_v8 = vsel %vm613_vm0, %v3537_v6, 0.0  ;;  %4050 = vmatpush1.msra.mxu1 %v4857_v25  ;;  %v4855_v1 = vld [vmem:[%s7705_s11 + $0x128] sm:$0xff]  ;;  %v4854_v27 = vld [vmem:[%s7705_s11 + $0x120] sm:$0xff] }
 0x7c6   : > { %v3515_v18 = vmul.f32 0.03125, %v3507_v40  ;;  %v3500_v0 = vmul.f32 %v3492_v34, %v5994_v19  ;;  %v3530_v30 = vmul.f32 %v7066_v62, %v7066_v62  ;;  %3554 = vadd.xlane.f32.xlu0 %v3553_v8  ;;  %4051 = vmatprep.subr.mxu1 %v5484_v48  ;;  %v4853_v40 = vld [vmem:[%s7705_s11 + $0x118] sm:$0xff]  ;;  %v4852_v34 = vld [vmem:[%s7705_s11 + $0x110] sm:$0xff]  ;;  %v4851_v23 = vld [vmem:[%s7705_s11 + $0x108] sm:$0xff] }
 0x7c7   : > { %4052 = vmatpush1.msra.mxu1 %v4856_v60 }
 0x7c8   : > { %v3508_v14 = vadd.f32 %v3500_v0, %v3484_v45  ;;  %v7074_v41 = vsub.f32 %v6996_v44, %v3515_v18  ;;  %v3580_v11 = vsel %vm613_vm0, %v3530_v30, 0.0  ;;  %v3538_v61 = vmul.f32 %v5920_v53, %v3530_v30  ;;  %4053 = vmatprep.subr.mxu1 %v5484_v48 }
 0x7c9   : > { %3581 = vadd.xlane.f32.xlu1 %v3580_v11  ;;  %4054 = vmatpush1.msra.mxu1 %v4855_v1 }
 0x7ca   : > { %v3516_v28 = vmul.f32 0.03125, %v3508_v14  ;;  %v3531_v42 = vmul.f32 %v7074_v41, %v7074_v41  ;;  %v3556_v38 = vsel %vm613_vm0, %v3538_v61, 0.0  ;;  %4055 = vmatprep.subr.mxu1 %v5484_v48 }
 0x7cb   : > { %3557 = vadd.xlane.f32.xlu0 %v3556_v38  ;;  %4056 = vmatpush1.msra.mxu1 %v4854_v27 }
 0x7cc   : > { %v3583_v31 = vsel %vm613_vm0, %v3531_v42, 0.0  ;;  %v3539_v56 = vmul.f32 %v5920_v53, %v3531_v42  ;;  %v7084_v54 = vsub.f32 %v7005_v7, %v3516_v28  ;;  %v4832_v7 = vld [vmem:[%s7703_s9 + $0xf8] sm:$0xff]  ;;  %4057 = vmatprep.subr.mxu1 %v5484_v48 }
 0x7cd   : > { %3584 = vadd.xlane.f32.xlu1 %v3583_v31  ;;  %3751 = vmatprep.subr.mxu0 %v4832_v7 }
 0x7ce   : > { %v3559_v44 = vsel %vm613_vm0, %v3539_v56, 0.0  ;;  %v3532_v10 = vmul.f32 %v7084_v54, %v7084_v54  ;;  %3752 = vmatpush1.msra.mxu0 %v4831_v46  ;;  %4058 = vmatpush1.msra.mxu1 %v4853_v40  ;;  %v7181_v40 = vld [vmem:[%s7701_s7 + $0x1] ss:$0 sm:$0xff] }
 0x7cf   : > { %3560 = vadd.xlane.f32.xlu0 %v3559_v44  ;;  %3753 = vmatprep.subr.mxu0 %v4830_v24 }
 0x7d0   : > { %v3586_v2 = vsel %vm613_vm0, %v3532_v10, 0.0  ;;  %v3540_v21 = vmul.f32 %v5920_v53, %v3532_v10  ;;  %3754 = vmatpush1.msra.mxu0 %v4829_v49  ;;  %4059 = vmatprep.subr.mxu1 %v5484_v48 }
 0x7d1   : > { %3587 = vadd.xlane.f32.xlu1 %v3586_v2  ;;  %3755 = vmatprep.subr.mxu0 %v4828_v59 }
 0x7d2   : > { %v3562_v51 = vsel %vm613_vm0, %v3540_v21, 0.0  ;;  %3756 = vmatpush1.msra.mxu0 %v4827_v57  ;;  %4060 = vmatpush1.msra.mxu1 %v4852_v34 }
 0x7d3   : > { %3563 = vadd.xlane.f32.xlu0 %v3562_v51  ;;  %3757 = vmatprep.subr.mxu0 %v4826_v43 }
 0x7d4   : > { %3758 = vmatpush1.msra.mxu0 %v4825_v55  ;;  %4061 = vmatprep.subr.mxu1 %v5484_v48 }
 0x7d5   : > { %3759 = vmatprep.subr.mxu0 %v4824_v47  ;;  %4062 = vmatpush1.msra.mxu1 %v4851_v23 }
 0x7d6   : > { %3760 = vmatpush1.msra.mxu0 %v4823_v16  ;;  %4063 = vmatprep.subr.mxu1 %v5484_v48 }
 0x7d7   : > { %3761 = vmatprep.subr.mxu0 %v4822_v3 }
 0x7d8   : > { %3762 = vmatpush1.msra.mxu0 %v4821_v20 }
 0x7d9   : > { %3763 = vmatprep.subr.mxu0 %v4820_v37 }
 0x7da   : > { %3764 = vmatpush1.msra.mxu0 %v4819_v4 }
 0x7db   : > { %3765 = vmatprep.subr.mxu0 %v4818_v17 }
 0x7dc   : > { %3766 = vmatpush1.msra.mxu0 %v4817_v15 }
 0x83a   : > { %v3567_v6 = vpop.xlane.xlu1 %3566 }
 0x83c   : > { %v3543_v18 = vpop.xlane.xlu0 %3542 }
 0x83d   : > { %v3597_v45 = vsub.f32 %v3567_v6, %v3543_v18  ;;  %v3589_v0 = vmul.f32 %v5920_v53, %v3543_v18 }
 0x83e   : > { %v3570_v30 = vpop.xlane.xlu1 %3569 }
 0x83f   : > { %v3605_v8 = vmul.f32 %v3597_v45, %v5994_v19  ;;  %v7187_v45 = vld [vmem:[%s7702_s8 + $0x1] ss:$0 sm:$0xff] }
 0x840   : > { %v3546_v11 = vpop.xlane.xlu0 %3545 }
 0x841   : > { %v3613_v14 = vadd.f32 %v3605_v8, %v3589_v0  ;;  %v3598_v61 = vsub.f32 %v3570_v30, %v3546_v11  ;;  %v3590_v42 = vmul.f32 %v5920_v53, %v3546_v11 }
 0x843   : > { %v3621_v28 = vmul.f32 0.03125, %v3613_v14  ;;  %v3606_v38 = vmul.f32 %v3598_v61, %v5994_v19 }
 0x845   : > { %v3573_v31 = vpop.xlane.xlu1 %3572  ;;  %v3629_v56 = vadd.f32 1e-06, %v3621_v28  ;;  %v3614_v44 = vadd.f32 %v3606_v38, %v3590_v42 }
 0x847   : > { %v3549_v10 = vpop.xlane.xlu0 %3548  ;;  %5404 = vrsqrt.f32 %v3629_v56  ;;  %v3622_v21 = vmul.f32 0.03125, %v3614_v44 }
 0x848   : > { %v3599_v2 = vsub.f32 %v3573_v31, %v3549_v10  ;;  %v3591_v51 = vmul.f32 %v5920_v53, %v3549_v10 }
 0x849   : > { %v3576_v46 = vpop.xlane.xlu1 %3575  ;;  %v3630_v24 = vadd.f32 1e-06, %v3622_v21 }
 0x84a   : > { %v3607_v7 = vmul.f32 %v3599_v2, %v5994_v19 }
 0x84b   : > { %v3552_v59 = vpop.xlane.xlu0 %3551  ;;  %5406 = vrsqrt.f32 %v3630_v24 }
 0x84c   : > { %v3615_v49 = vadd.f32 %v3607_v7, %v3591_v51  ;;  %v3600_v57 = vsub.f32 %v3576_v46, %v3552_v59  ;;  %v3592_v55 = vmul.f32 %v5920_v53, %v3552_v59 }
 0x84d   : > { %v3579_v16 = vpop.xlane.xlu1 %3578 }
 0x84e   : > { %v3623_v43 = vmul.f32 0.03125, %v3615_v49  ;;  %v3608_v47 = vmul.f32 %v3600_v57, %v5994_v19 }
 0x84f   : > { %v3555_v37 = vpop.xlane.xlu0 %3554 }
 0x850   : > { %v3631_v3 = vadd.f32 1e-06, %v3623_v43  ;;  %v3616_v20 = vadd.f32 %v3608_v47, %v3592_v55  ;;  %v3601_v17 = vsub.f32 %v3579_v16, %v3555_v37  ;;  %v3593_v1 = vmul.f32 %v5920_v53, %v3555_v37 }
 0x852   : > { %5408 = vrsqrt.f32 %v3631_v3  ;;  %v3624_v4 = vmul.f32 0.03125, %v3616_v20  ;;  %v3582_v15 = vpop.xlane.xlu1 %3581  ;;  %v3609_v27 = vmul.f32 %v3601_v17, %v5994_v19 }
 0x854   : > { %v5405_v25 = vpop.eup %5404  ;;  %v3632_v60 = vadd.f32 1e-06, %v3624_v4  ;;  %v3558_v23 = vpop.xlane.xlu0 %3557  ;;  %v3617_v6 = vadd.f32 %v3609_v27, %v3593_v1 }
 0x855   : > { %v3645_v34 = vmul.f32 %v5405_v25, %v7017_v52  ;;  %v3602_v18 = vsub.f32 %v3582_v15, %v3558_v23  ;;  %v3594_v14 = vmul.f32 %v5920_v53, %v3558_v23 }
 0x856   : > { %5410 = vrsqrt.f32 %v3632_v60  ;;  %v3585_v0 = vpop.xlane.xlu1 %3584  ;;  %v3625_v30 = vmul.f32 0.03125, %v3617_v6 }
 0x857   : > { %v3659_v8 = vmul.f32 %v7181_v40, %v3645_v34  ;;  %v3610_v11 = vmul.f32 %v3602_v18, %v5994_v19 }
 0x858   : > { %v5407_v61 = vpop.eup %5406  ;;  %v3561_v28 = vpop.xlane.xlu0 %3560  ;;  %v3633_v42 = vadd.f32 1e-06, %v3625_v30 }
 0x859   : > { %v3673_v52 = vadd.f32 %v7187_v45, %v3659_v8  ;;  %v3618_v38 = vadd.f32 %v3610_v11, %v3594_v14  ;;  %v3603_v31 = vsub.f32 %v3585_v0, %v3561_v28  ;;  %v3646_v56 = vmul.f32 %v5407_v61, %v7026_v29 }
 0x85a   : > { %5412 = vrsqrt.f32 %v3633_v42  ;;  %v3595_v10 = vmul.f32 %v5920_v53, %v3561_v28  ;;  %v3588_v21 = vpop.xlane.xlu1 %3587  ;;  %v4845_v42 = vld [vmem:[%s7705_s11 + $0xd8] sm:$0xff] }
 0x85b   : > { %4834 = vmatmul.mubr.msk.f32.vlgmr.msra.gmra.mxu0 %vm613_vm0, %v3673_v52  ;;  %v3626_v44 = vmul.f32 0.03125, %v3618_v38  ;;  %v3611_v2 = vmul.f32 %v3603_v31, %v5994_v19  ;;  %v3660_v7 = vmul.f32 %v7181_v40, %v3646_v56  ;;  %v4846_v52 = vld [vmem:[%s7705_s11 + $0xe0] sm:$0xff]  ;;  %v4844_v38 = vld [vmem:[%s7705_s11 + $0xd0] sm:$0xff]  ;;  %v4843_v31 = vld [vmem:[%s7705_s11 + $0xc8] sm:$0xff] }
 0x85c   : > { %3805 = vmatprep.mubr.f32.mxu0 %v5484_v48  ;;  %v3564_v51 = vpop.xlane.xlu0 %3563  ;;  %v4842_v56 = vld [vmem:[%s7705_s11 + $0xc0] sm:$0xff] }
 0x85d   : > { %v3634_v24 = vadd.f32 1e-06, %v3626_v44  ;;  %v3619_v49 = vadd.f32 %v3611_v2, %v3595_v10  ;;  %v3604_v59 = vsub.f32 %v3588_v21, %v3564_v51  ;;  %v3674_v57 = vadd.f32 %v7187_v45, %v3660_v7  ;;  %v4865_v44 = vld [vmem:[%s7705_s11 + $0x178] sm:$0xff]  ;;  %v4864_v10 = vld [vmem:[%s7705_s11 + $0x170] sm:$0xff]  ;;  %v4863_v2 = vld [vmem:[%s7705_s11 + $0x168] sm:$0xff] }
 0x85e   : > { %v3596_v55 = vmul.f32 %v5920_v53, %v3564_v51  ;;  %v4862_v21 = vld [vmem:[%s7705_s11 + $0x160] sm:$0xff]  ;;  %v4861_v51 = vld [vmem:[%s7705_s11 + $0x158] sm:$0xff]  ;;  %v4860_v7 = vld [vmem:[%s7705_s11 + $0x150] sm:$0xff] }
 0x85f   : > { %v5409_v46 = vpop.eup %5408  ;;  %5414 = vrsqrt.f32 %v3634_v24  ;;  %v3627_v43 = vmul.f32 0.03125, %v3619_v49  ;;  %v3612_v47 = vmul.f32 %v3604_v59, %v5994_v19  ;;  %4835 = vmatmul.mubr.msk.f32.gmra.mxu0 %vm613_vm0, %v3674_v57  ;;  %v4858_v24 = vld [vmem:[%s7705_s11 + $0x140] sm:$0xff] }
 0x860   : > { %v3647_v29 = vmul.f32 %v5409_v46, %v7036_v63  ;;  %3811 = vmatprep.mubr.f32.mxu0 %v5484_v48  ;;  %v4859_v46 = vld [vmem:[%s7705_s11 + $0x148] sm:$0xff]  ;;  %v4833_v49 = vld [vmem:[%s7704_s10 + $0x2] sm:$0x3] }
 0x861   : > { %v3635_v3 = vadd.f32 1e-06, %v3627_v43  ;;  %v3620_v20 = vadd.f32 %v3612_v47, %v3596_v55  ;;  %v7305_v59 = vrot.slane %v4833_v49, %v2590_v13  ;;  %v7309_v57 = vrot.slane %v4833_v49, %v2594_v58 }
 0x862   : > { %v3661_v16 = vmul.f32 %v7181_v40, %v3647_v29 }
 0x863   : > { %v5411_v37 = vpop.eup %5410  ;;  %5416 = vrsqrt.f32 %v3635_v3  ;;  %v3628_v17 = vmul.f32 0.03125, %v3620_v20 }
 0x864   : > { %v3675_v4 = vadd.f32 %v7187_v45, %v3661_v16  ;;  %v3648_v63 = vmul.f32 %v5411_v37, %v7046_v36 }
 0x865   : > { %v3636_v15 = vadd.f32 1e-06, %v3628_v17 }
 0x866   : > { %4836 = vmatmul.mubr.msk.f32.gmra.mxu0 %vm613_vm0, %v3675_v4  ;;  %v3662_v25 = vmul.f32 %v7181_v40, %v3648_v63 }
 0x867   : > { %3817 = vmatprep.mubr.f32.mxu0 %v5484_v48  ;;  %5418 = vrsqrt.f32 %v3636_v15  ;;  %v5413_v1 = vpop.eup %5412 }
 0x868   : > { %v3676_v60 = vadd.f32 %v7187_v45, %v3662_v25  ;;  %v3649_v27 = vmul.f32 %v5413_v1, %v7056_v26 }
 0x86a   : > { %4837 = vmatmul.mubr.msk.f32.gmra.mxu0 %vm613_vm0, %v3676_v60  ;;  %v3663_v34 = vmul.f32 %v7181_v40, %v3649_v27 }
 0x86b   : > { %3823 = vmatprep.mubr.f32.mxu0 %v5484_v48 }
 0x86c   : > { %v5415_v36 = vpop.eup %5414  ;;  %v3677_v23 = vadd.f32 %v7187_v45, %v3663_v34 }
 0x86d   : > { %v3650_v6 = vmul.f32 %v5415_v36, %v7066_v62 }
 0x86e   : > { %4838 = vmatmul.mubr.msk.f32.gmra.mxu0 %vm613_vm0, %v3677_v23 }
 0x86f   : > { %v3664_v18 = vmul.f32 %v7181_v40, %v3650_v6  ;;  %3829 = vmatprep.mubr.f32.mxu0 %v5484_v48 }
 0x870   : > { %v5417_v0 = vpop.eup %5416 }
 0x871   : > { %v3678_v8 = vadd.f32 %v7187_v45, %v3664_v18  ;;  %v3651_v26 = vmul.f32 %v5417_v0, %v7074_v41  ;;  %v4850_v41 = vld [vmem:[%s7705_s11 + $0x100] sm:$0xff] }
 0x872   : > { %4064 = vmatpush1.msra.mxu1 %v4850_v41 }
 0x873   : > { %4839 = vmatmul.mubr.msk.f32.gmra.mxu0 %vm613_vm0, %v3678_v8  ;;  %v3665_v30 = vmul.f32 %v7181_v40, %v3651_v26  ;;  %4065 = vmatprep.subr.mxu1 %v5484_v48 }
 0x874   : > { %v5419_v14 = vpop.eup %5418  ;;  %3835 = vmatprep.mubr.f32.mxu0 %v5484_v48 }
 0x875   : > { %v3679_v62 = vadd.f32 %v7187_v45, %v3665_v30  ;;  %v3652_v11 = vmul.f32 %v5419_v14, %v7084_v54  ;;  %v4849_v54 = vld [vmem:[%s7705_s11 + $0xf8] sm:$0xff] }
 0x876   : > { %4066 = vmatpush1.msra.mxu1 %v4849_v54 }
 0x877   : > { %4840 = vmatmul.mubr.msk.f32.gmra.mxu0 %vm613_vm0, %v3679_v62  ;;  %v3666_v61 = vmul.f32 %v7181_v40, %v3652_v11  ;;  %v4848_v40 = vld [vmem:[%s7705_s11 + $0xf0] sm:$0xff]  ;;  %4067 = vmatprep.subr.mxu1 %v5484_v48 }
 0x878   : > { %3841 = vmatprep.mubr.f32.mxu0 %v5484_v48  ;;  %4068 = vmatpush1.msra.mxu1 %v4848_v40 }
 0x879   : > { %v3680_v28 = vadd.f32 %v7187_v45, %v3666_v61  ;;  %4069 = vmatprep.subr.mxu1 %v5484_v48  ;;  %v4847_v45 = vld [vmem:[%s7705_s11 + $0xe8] sm:$0xff] }
 0x87a   : > { %4070 = vmatpush1.msra.mxu1 %v4847_v45 }
 0x87b   : > { %4841 = vmatmul.mubr.msk.f32.gmra.mxu0 %vm613_vm0, %v3680_v28  ;;  %4071 = vmatprep.subr.mxu1 %v5484_v48 }
 0x87c   : > { %4072 = vmatpush1.msra.mxu1 %v4846_v52 }
 0x87d   : > { %4073 = vmatprep.subr.mxu1 %v5484_v48 }
 0x87e   : > { %4074 = vmatpush1.msra.mxu1 %v4845_v42 }
 0x87f   : > { %4075 = vmatprep.subr.mxu1 %v5484_v48 }
 0x880   : > { %4076 = vmatpush1.msra.mxu1 %v4844_v38 }
 0x881   : > { %4077 = vmatprep.subr.mxu1 %v5484_v48 }
 0x882   : > { %4078 = vmatpush1.msra.mxu1 %v4843_v31 }
 0x883   : > { %4079 = vmatprep.subr.mxu1 %v5484_v48 }
 0x884   : > { %4080 = vmatpush1.msra.mxu1 %v4842_v56 }
 0x885   : > { %4097 = vmatprep.subr.mxu1 %v5484_v48 }
 0x886   : > { %4098 = vmatpush2.msra.mxu1 %v4865_v44 }
 0x887   : > { %4099 = vmatprep.subr.mxu1 %v5484_v48 }
 0x888   : > { %4100 = vmatpush2.msra.mxu1 %v4864_v10 }
 0x889   : > { %4101 = vmatprep.subr.mxu1 %v5484_v48 }
 0x88a   : > { %4102 = vmatpush2.msra.mxu1 %v4863_v2 }
 0x88b   : > { %4103 = vmatprep.subr.mxu1 %v5484_v48 }
 0x88c   : > { %4104 = vmatpush2.msra.mxu1 %v4862_v21 }
 0x88d   : > { %4105 = vmatprep.subr.mxu1 %v5484_v48 }
 0x88e   : > { %4106 = vmatpush2.msra.mxu1 %v4861_v51 }
 0x88f   : > { %4107 = vmatprep.subr.mxu1 %v5484_v48 }
 0x890   : > { %4108 = vmatpush2.msra.mxu1 %v4860_v7 }
 0x891   : > { %4109 = vmatprep.subr.mxu1 %v5484_v48 }
 0x892   : > { %4110 = vmatpush2.msra.mxu1 %v4859_v46 }
 0x893   : > { %4111 = vmatprep.subr.mxu1 %v5484_v48 }
 0x894   : > { %4112 = vmatpush2.msra.mxu1 %v4858_v24 }
 0x91b   : > { %v3801_v29 = vpop.f32.mrf.mxu0 }
 0x91c   : > { %v7312_v48 = vadd.f32 %v3801_v29, %v7305_v59 }
 0x91d   : > { %v3803_v43 = vpop.f32.mrf.mxu0 }
 0x91e   : > { %v3864_v55 = vmul.f32 0.044715, %v7312_v48  ;;  %v7316_v47 = vadd.f32 %v3803_v43, %v7309_v57 }
 0x91f   : > { %v3807_v13 = vpop.f32.mrf.mxu0 }
 0x920   : > { %v3880_v16 = vmul.f32 %v3864_v55, %v7312_v48  ;;  %v3865_v3 = vmul.f32 0.044715, %v7316_v47  ;;  %v7323_v58 = vadd.f32 %v3807_v13, %v7305_v59 }
 0x921   : > { %v3809_v37 = vpop.f32.mrf.mxu0 }
 0x922   : > { %v3896_v20 = vmul.f32 %v3880_v16, %v7312_v48  ;;  %v3881_v39 = vmul.f32 %v3865_v3, %v7316_v47  ;;  %v3866_v63 = vmul.f32 0.044715, %v7323_v58  ;;  %v7329_v15 = vadd.f32 %v3809_v37, %v7309_v57 }
 0x924   : > { %v3912_v4 = vadd.f32 %v3896_v20, %v7312_v48  ;;  %v3897_v17 = vmul.f32 %v3881_v39, %v7316_v47  ;;  %v3882_v27 = vmul.f32 %v3866_v63, %v7323_v58  ;;  %v3867_v34 = vmul.f32 0.044715, %v7329_v15 }
 0x926   : > { %v3813_v25 = vpop.f32.mrf.mxu0  ;;  %v3928_v60 = vmul.f32 0.7978846, %v3912_v4  ;;  %v3913_v1 = vadd.f32 %v3897_v17, %v7316_v47  ;;  %v3883_v6 = vmul.f32 %v3867_v34, %v7329_v15  ;;  %v3898_v26 = vmul.f32 %v3882_v27, %v7323_v58 }
 0x927   : > { %v7335_v36 = vadd.f32 %v3813_v25, %v7305_v59  ;;  %v3848_v25 = vmul.f32 0.5, %v7312_v48 }
 0x928   : > { %v3815_v23 = vpop.f32.mrf.mxu0  ;;  %5420 = vtanh.f32 %v3928_v60  ;;  %v3929_v0 = vmul.f32 0.7978846, %v3913_v1  ;;  %v3899_v30 = vmul.f32 %v3883_v6, %v7329_v15  ;;  %v3914_v28 = vadd.f32 %v3898_v26, %v7323_v58 }
 0x929   : > { %v7339_v18 = vadd.f32 %v3815_v23, %v7309_v57  ;;  %v3868_v8 = vmul.f32 0.044715, %v7335_v36  ;;  %v3849_v1 = vmul.f32 0.5, %v7316_v47 }
 0x92a   : > { %v3819_v62 = vpop.f32.mrf.mxu0  ;;  %5422 = vtanh.f32 %v3929_v0  ;;  %v3915_v41 = vadd.f32 %v3899_v30, %v7329_v15  ;;  %v3930_v42 = vmul.f32 0.7978846, %v3914_v28 }
 0x92b   : > { %v3869_v14 = vmul.f32 0.044715, %v7339_v18  ;;  %v3884_v11 = vmul.f32 %v3868_v8, %v7335_v36  ;;  %v7347_v61 = vadd.f32 %v3819_v62, %v7305_v59  ;;  %v3850_v62 = vmul.f32 0.5, %v7323_v58 }
 0x92c   : > { %v3821_v40 = vpop.f32.mrf.mxu0  ;;  %v3931_v56 = vmul.f32 0.7978846, %v3915_v41  ;;  %5424 = vtanh.f32 %v3930_v42 }
 0x92d   : > { %v3885_v54 = vmul.f32 %v3869_v14, %v7339_v18  ;;  %v3870_v45 = vmul.f32 0.044715, %v7347_v61  ;;  %v7354_v52 = vadd.f32 %v3821_v40, %v7309_v57  ;;  %v3900_v38 = vmul.f32 %v3884_v11, %v7335_v36 }
 0x92e   : > { %v3825_v51 = vpop.f32.mrf.mxu0  ;;  %5426 = vtanh.f32 %v3931_v56 }
 0x92f   : > { %v3901_v31 = vmul.f32 %v3885_v54, %v7339_v18  ;;  %v3886_v44 = vmul.f32 %v3870_v45, %v7347_v61  ;;  %v3871_v10 = vmul.f32 0.044715, %v7354_v52  ;;  %v3916_v2 = vadd.f32 %v3900_v38, %v7335_v36 }
 0x930   : > { %v7364_v46 = vadd.f32 %v3825_v51, %v7305_v59  ;;  %v3827_v29 = vpop.f32.mrf.mxu0 }
 0x931   : > { %v3917_v21 = vadd.f32 %v3901_v31, %v7339_v18  ;;  %v3887_v7 = vmul.f32 %v3871_v10, %v7354_v52  ;;  %v3932_v24 = vmul.f32 0.7978846, %v3916_v2  ;;  %v3902_v49 = vmul.f32 %v3886_v44, %v7347_v61 }
 0x932   : > { %v3872_v16 = vmul.f32 0.044715, %v7364_v46  ;;  %v7370_v3 = vadd.f32 %v3827_v29, %v7309_v57  ;;  %v3851_v2 = vmul.f32 0.5, %v7329_v15 }
 0x933   : > { %v3933_v43 = vmul.f32 0.7978846, %v3917_v21  ;;  %v3903_v55 = vmul.f32 %v3887_v7, %v7354_v52  ;;  %5428 = vtanh.f32 %v3932_v24  ;;  %v3831_v13 = vpop.f32.mrf.mxu0  ;;  %v3918_v20 = vadd.f32 %v3902_v49, %v7347_v61 }
 0x934   : > { %v3888_v4 = vmul.f32 %v3872_v16, %v7364_v46  ;;  %v3873_v17 = vmul.f32 0.044715, %v7370_v3  ;;  %v7377_v63 = vadd.f32 %v3831_v13, %v7305_v59  ;;  %v3852_v21 = vmul.f32 0.5, %v7335_v36 }
 0x935   : > { %5430 = vtanh.f32 %v3933_v43  ;;  %v5421_v39 = vpop.eup %5420  ;;  %v3919_v37 = vadd.f32 %v3903_v55, %v7354_v52  ;;  %v3833_v60 = vpop.f32.mrf.mxu0  ;;  %v3934_v34 = vmul.f32 0.7978846, %v3918_v20 }
 0x936   : > { %v3960_v27 = vadd.f32 1.0, %v5421_v39  ;;  %v3889_v6 = vmul.f32 %v3873_v17, %v7370_v3  ;;  %v3874_v0 = vmul.f32 0.044715, %v7377_v63  ;;  %v7384_v8 = vadd.f32 %v3833_v60, %v7309_v57 }
 0x937   : > { %v5423_v23 = vpop.eup %5422  ;;  %v3935_v26 = vmul.f32 0.7978846, %v3919_v37  ;;  %v3837_v30 = vpop.f32.mrf.mxu0  ;;  %5432 = vtanh.f32 %v3934_v34  ;;  %v3904_v48 = vmul.f32 %v3888_v4, %v7364_v46 }
 0x938   : > { %v3961_v14 = vadd.f32 1.0, %v5423_v23  ;;  %v3905_v47 = vmul.f32 %v3889_v6, %v7370_v3  ;;  %v3890_v11 = vmul.f32 %v3874_v0, %v7377_v63  ;;  %v3875_v28 = vmul.f32 0.044715, %v7384_v8 }
 0x939   : > { %v7392_v41 = vadd.f32 %v3837_v30, %v7305_v59  ;;  %v3839_v54 = vpop.f32.mrf.mxu0  ;;  %v3976_v45 = vmul.f32 %v3960_v27, %v3848_v25  ;;  %5434 = vtanh.f32 %v3935_v26  ;;  %v3920_v42 = vadd.f32 %v3904_v48, %v7364_v46  ;;  %v5425_v44 = vpop.eup %5424 }
 0x93a   : > { %v3977_v40 = vmul.f32 %v3961_v14, %v3849_v1  ;;  %v3921_v58 = vadd.f32 %v3905_v47, %v7370_v3  ;;  %v3891_v38 = vmul.f32 %v3875_v28, %v7384_v8  ;;  %v7399_v56 = vadd.f32 %v3839_v54, %v7309_v57 }
 0x93b   : > { %v3876_v31 = vmul.f32 0.044715, %v7392_v41  ;;  %v3843_v10 = vpop.f32.mrf.mxu0  ;;  %v3936_v51 = vmul.f32 0.7978846, %v3920_v42  ;;  %v3906_v7 = vmul.f32 %v3890_v11, %v7377_v63  ;;  %v5427_v24 = vpop.eup %5426  ;;  %v3962_v20 = vadd.f32 1.0, %v5425_v44 }
 0x93c   : > { %4868 = vmatprep.mubr.msk.f32.mxu1 %vm613_vm0, %v3977_v40  ;;  %v3907_v49 = vmul.f32 %v3891_v38, %v7384_v8  ;;  %v3877_v43 = vmul.f32 0.044715, %v7399_v56  ;;  %v7409_v55 = vadd.f32 %v3843_v10, %v7305_v59  ;;  %v3963_v13 = vadd.f32 1.0, %v5427_v24 }
 0x93d   : > { %v3892_v29 = vmul.f32 %v3876_v31, %v7392_v41  ;;  %4114 = vmatmul.mubr.f32.vlgmr.msra.gmra.mxu1 %v3976_v45  ;;  %v3845_v16 = vpop.f32.mrf.mxu0  ;;  %v3937_v15 = vmul.f32 0.7978846, %v3921_v58  ;;  %5436 = vtanh.f32 %v3936_v51  ;;  %v3853_v59 = vmul.f32 0.5, %v7339_v18 }
 0x93e   : > { %v3923_v36 = vadd.f32 %v3907_v49, %v7384_v8  ;;  %v3893_v39 = vmul.f32 %v3877_v43, %v7399_v56  ;;  %v3878_v37 = vmul.f32 0.044715, %v7409_v55  ;;  %v7415_v4 = vadd.f32 %v3845_v16, %v7309_v57 }
 0x93f   : > { %v3979_v25 = vmul.f32 %v3963_v13, %v3851_v2  ;;  %5438 = vtanh.f32 %v3937_v15  ;;  %v3922_v60 = vadd.f32 %v3906_v7, %v7377_v63  ;;  %v3978_v23 = vmul.f32 %v3962_v20, %v3850_v62 }
 0x940   : > { %v5429_v17 = vpop.eup %5428  ;;  %v3909_v27 = vmul.f32 %v3893_v39, %v7399_v56  ;;  %v3879_v34 = vmul.f32 0.044715, %v7415_v4  ;;  %v3894_v0 = vmul.f32 %v3878_v37, %v7409_v55  ;;  %v3939_v26 = vmul.f32 0.7978846, %v3923_v36 }
 0x941   : > { %v3964_v6 = vadd.f32 1.0, %v5429_v17  ;;  %4869 = vmatprep.mubr.msk.f32.mxu1 %vm613_vm0, %v3979_v25  ;;  %v3938_v30 = vmul.f32 0.7978846, %v3922_v60  ;;  %v3908_v48 = vmul.f32 %v3892_v29, %v7392_v41  ;;  %v3855_v44 = vmul.f32 0.5, %v7354_v52 }
 0x942   : > { %v5431_v1 = vpop.eup %5430  ;;  %v3925_v14 = vadd.f32 %v3909_v27, %v7399_v56  ;;  %v3895_v18 = vmul.f32 %v3879_v34, %v7415_v4  ;;  %4119 = vmatmul.mubr.f32.gmra.mxu1 %v3978_v23  ;;  %5440 = vtanh.f32 %v3939_v26  ;;  %v3910_v45 = vmul.f32 %v3894_v0, %v7409_v55 }
 0x943   : > { %v3965_v57 = vadd.f32 1.0, %v5431_v1  ;;  %v3980_v11 = vmul.f32 %v3964_v6, %v3852_v21  ;;  %5442 = vtanh.f32 %v3938_v30  ;;  %v3924_v40 = vadd.f32 %v3908_v48, %v7392_v41 }
 0x944   : > { %v5433_v28 = vpop.eup %5432  ;;  %v3911_v62 = vmul.f32 %v3895_v18, %v7415_v4  ;;  %v3941_v54 = vmul.f32 0.7978846, %v3925_v14  ;;  %v3926_v2 = vadd.f32 %v3910_v45, %v7409_v55  ;;  %v3854_v21 = vmul.f32 0.5, %v7347_v61 }
 0x945   : > { %v3981_v47 = vmul.f32 %v3965_v57, %v3853_v59  ;;  %v3966_v38 = vadd.f32 1.0, %v5433_v28  ;;  %v3940_v31 = vmul.f32 0.7978846, %v3924_v40  ;;  %v3857_v52 = vmul.f32 0.5, %v7370_v3 }
 0x946   : > { %v5435_v42 = vpop.eup %5434  ;;  %v3927_v58 = vadd.f32 %v3911_v62, %v7415_v4  ;;  %5444 = vtanh.f32 %v3941_v54  ;;  %v3942_v24 = vmul.f32 0.7978846, %v3926_v2  ;;  %v3856_v20 = vmul.f32 0.5, %v7364_v46 }
 0x947   : > { %4870 = vmatprep.mubr.msk.f32.mxu1 %vm613_vm0, %v3981_v47  ;;  %v3967_v10 = vadd.f32 1.0, %v5435_v42  ;;  %5446 = vtanh.f32 %v3940_v31  ;;  %v3982_v29 = vmul.f32 %v3966_v38, %v3854_v21  ;;  %v3859_v37 = vmul.f32 0.5, %v7384_v8 }
 0x948   : > { %4124 = vmatmul.mubr.f32.gmra.mxu1 %v3980_v11  ;;  %v3943_v51 = vmul.f32 0.7978846, %v3927_v58  ;;  %v3858_v25 = vmul.f32 0.5, %v7377_v63  ;;  %v3861_v3 = vmul.f32 0.5, %v7399_v56  ;;  %v3860_v6 = vmul.f32 0.5, %v7392_v41 }
 0x949   : > { %v3983_v7 = vmul.f32 %v3967_v10, %v3855_v44  ;;  %v3863_v26 = vmul.f32 0.5, %v7415_v4  ;;  %v3862_v18 = vmul.f32 0.5, %v7409_v55  ;;  %v4867_v41 = vld [vmem:[%s7706_s12 + $0x1] ss:$0 sm:$0xff] }
 0x94a   : > { %v5437_v49 = vpop.eup %5436  ;;  %5448 = vtanh.f32 %v3943_v51 }
 0x94b   : > { %4871 = vmatprep.mubr.msk.f32.mxu1 %vm613_vm0, %v3983_v7  ;;  %5450 = vtanh.f32 %v3942_v24  ;;  %v3968_v16 = vadd.f32 1.0, %v5437_v49 }
 0x94c   : > { %v5439_v43 = vpop.eup %5438  ;;  %4129 = vmatmul.mubr.f32.gmra.mxu1 %v3982_v29 }
 0x94d   : > { %v3969_v13 = vadd.f32 1.0, %v5439_v43  ;;  %v3984_v36 = vmul.f32 %v3968_v16, %v3856_v20 }
 0x94f   : > { %v3985_v15 = vmul.f32 %v3969_v13, %v3857_v52  ;;  %v5441_v61 = vpop.eup %5440 }
 0x950   : > { %v5443_v39 = vpop.eup %5442  ;;  %v3971_v17 = vadd.f32 1.0, %v5441_v61 }
 0x951   : > { %4872 = vmatprep.mubr.msk.f32.mxu1 %vm613_vm0, %v3985_v15  ;;  %v3970_v59 = vadd.f32 1.0, %v5443_v39 }
 0x952   : > { %4134 = vmatmul.mubr.f32.gmra.mxu1 %v3984_v36  ;;  %v3987_v1 = vmul.f32 %v3971_v17, %v3859_v37 }
 0x953   : > { %v5445_v60 = vpop.eup %5444  ;;  %v3986_v27 = vmul.f32 %v3970_v59, %v3858_v25 }
 0x954   : > { %v3973_v34 = vadd.f32 1.0, %v5445_v60  ;;  %v5447_v46 = vpop.eup %5446  ;;  %4873 = vmatprep.mubr.msk.f32.mxu1 %vm613_vm0, %v3987_v1 }
 0x955   : > { %v3972_v0 = vadd.f32 1.0, %v5447_v46 }
 0x956   : > { %4139 = vmatmul.mubr.f32.gmra.mxu1 %v3986_v27  ;;  %v3989_v23 = vmul.f32 %v3973_v34, %v3861_v3 }
 0x957   : > { %v5449_v8 = vpop.eup %5448  ;;  %v3988_v63 = vmul.f32 %v3972_v0, %v3860_v6 }
 0x958   : > { %v5451_v57 = vpop.eup %5450  ;;  %4874 = vmatprep.mubr.msk.f32.mxu1 %vm613_vm0, %v3989_v23  ;;  %v3975_v30 = vadd.f32 1.0, %v5449_v8 }
 0x959   : > { %v3974_v14 = vadd.f32 1.0, %v5451_v57 }
 0x95a   : > { %4144 = vmatmul.mubr.f32.gmra.mxu1 %v3988_v63  ;;  %v3991_v56 = vmul.f32 %v3975_v30, %v3863_v26 }
 0x95b   : > { %v3990_v48 = vmul.f32 %v3974_v14, %v3862_v18 }
 0x95c   : > { %4875 = vmatprep.mubr.msk.f32.mxu1 %vm613_vm0, %v3991_v56 }
 0x95e   : > { %4149 = vmatmul.mubr.f32.gmra.mxu1 %v3990_v48 }
 0x9fd   : > { %v4115_v47 = vpop.f32.mrf.mxu1 }
 0x9fe   : > { %v4116_v11 = vadd.f32 %v4867_v41, %v4115_v47 }
 0x9ff   : > { %v4117_v28 = vpop.f32.mrf.mxu1 }
 0xa00   : > { %v7451_v62 = vadd.f32 %v4116_v11, %v6824_v33 }
 0xa02   : > { %v4196_v4 = vsel %vm613_vm0, %v7451_v62, 0.0  ;;  %v4164_v55 = vmul.f32 %v5920_v53, %v7451_v62  ;;  %v4120_v54 = vpop.f32.mrf.mxu1 }
 0xa03   : > { %4197 = vadd.xlane.f32.xlu1 %v4196_v4  ;;  %v4121_v40 = vadd.f32 %v4867_v41, %v4120_v54 }
 0xa04   : > { %v4172_v45 = vsel %vm613_vm0, %v4164_v55, 0.0  ;;  %v4122_v42 = vpop.f32.mrf.mxu1 }
 0xa05   : > { %4173 = vadd.xlane.f32.xlu0 %v4172_v45  ;;  %v7459_v58 = vadd.f32 %v6820_v9, %v4121_v40 }
 0xa07   : > { %v4199_v33 = vsel %vm613_vm0, %v7459_v58, 0.0  ;;  %v4165_v44 = vmul.f32 %v5920_v53, %v7459_v58 }
 0xa08   : > { %v4125_v38 = vpop.f32.mrf.mxu1  ;;  %4200 = vadd.xlane.f32.xlu1 %v4199_v33 }
 0xa09   : > { %v4126_v31 = vadd.f32 %v4867_v41, %v4125_v38  ;;  %v4175_v21 = vsel %vm613_vm0, %v4165_v44, 0.0 }
 0xa0a   : > { %v4127_v10 = vpop.f32.mrf.mxu1  ;;  %4176 = vadd.xlane.f32.xlu0 %v4175_v21 }
 0xa0b   : > { %v7466_v2 = vadd.f32 %v4126_v31, %v6847_v22 }
 0xa0c   : > { %v4130_v7 = vpop.f32.mrf.mxu1 }
 0xa0d   : > { %v4202_v9 = vsel %vm613_vm0, %v7466_v2, 0.0  ;;  %v4166_v51 = vmul.f32 %v5920_v53, %v7466_v2  ;;  %v4131_v24 = vadd.f32 %v4867_v41, %v4130_v7 }
 0xa0e   : > { %4203 = vadd.xlane.f32.xlu1 %v4202_v9  ;;  %v4132_v29 = vpop.f32.mrf.mxu1 }
 0xa0f   : > { %v4178_v49 = vsel %vm613_vm0, %v4166_v51, 0.0  ;;  %v7475_v43 = vadd.f32 %v6833_v5, %v4131_v24 }
 0xa10   : > { %4179 = vadd.xlane.f32.xlu0 %v4178_v49 }
 0xa11   : > { %v4205_v22 = vsel %vm613_vm0, %v7475_v43, 0.0  ;;  %v4167_v16 = vmul.f32 %v5920_v53, %v7475_v43 }
 0xa12   : > { %v4135_v52 = vpop.f32.mrf.mxu1  ;;  %4206 = vadd.xlane.f32.xlu1 %v4205_v22 }
 0xa13   : > { %v4136_v13 = vadd.f32 %v4867_v41, %v4135_v52  ;;  %v4181_v20 = vsel %vm613_vm0, %v4167_v16, 0.0 }
 0xa14   : > { %v4137_v15 = vpop.f32.mrf.mxu1  ;;  %4182 = vadd.xlane.f32.xlu0 %v4181_v20 }
 0xa15   : > { %v7483_v61 = vadd.f32 %v4136_v13, %v6892_v32 }
 0xa16   : > { %v4140_v36 = vpop.f32.mrf.mxu1 }
 0xa17   : > { %v4141_v39 = vadd.f32 %v4867_v41, %v4140_v36  ;;  %v4208_v5 = vsel %vm613_vm0, %v7483_v61, 0.0  ;;  %v4168_v37 = vmul.f32 %v5920_v53, %v7483_v61 }
 0xa18   : > { %4209 = vadd.xlane.f32.xlu1 %v4208_v5  ;;  %v4142_v17 = vpop.f32.mrf.mxu1 }
 0xa19   : > { %v7490_v25 = vadd.f32 %v6885_v50, %v4141_v39  ;;  %v4184_v59 = vsel %vm613_vm0, %v4168_v37, 0.0 }
 0xa1a   : > { %4185 = vadd.xlane.f32.xlu0 %v4184_v59  ;;  %v4145_v60 = vpop.f32.mrf.mxu1 }
 0xa1b   : > { %v4146_v1 = vadd.f32 %v4867_v41, %v4145_v60  ;;  %v4211_v32 = vsel %vm613_vm0, %v7490_v25, 0.0  ;;  %v4169_v27 = vmul.f32 %v5920_v53, %v7490_v25 }
 0xa1c   : > { %4212 = vadd.xlane.f32.xlu1 %v4211_v32  ;;  %v4147_v3 = vpop.f32.mrf.mxu1 }
 0xa1d   : > { %v7498_v34 = vadd.f32 %v4146_v1, %v6921_v12  ;;  %v4187_v46 = vsel %vm613_vm0, %v4169_v27, 0.0 }
 0xa1e   : > { %4188 = vadd.xlane.f32.xlu0 %v4187_v46  ;;  %v4150_v50 = vpop.f32.mrf.mxu1 }
 0xa1f   : > { %v4151_v23 = vadd.f32 %v4867_v41, %v4150_v50  ;;  %v4214_v6 = vsel %vm613_vm0, %v7498_v34, 0.0  ;;  %v4170_v0 = vmul.f32 %v5920_v53, %v7498_v34 }
 0xa20   : > { %4215 = vadd.xlane.f32.xlu1 %v4214_v6  ;;  %v4152_v8 = vpop.f32.mrf.mxu1 }
 0xa21   : > { %v7506_v57 = vadd.f32 %v6910_v35, %v4151_v23  ;;  %v4190_v63 = vsel %vm613_vm0, %v4170_v0, 0.0 }
 0xa22   : > { %4191 = vadd.xlane.f32.xlu0 %v4190_v63 }
 0xa23   : > { %v4217_v12 = vsel %vm613_vm0, %v7506_v57, 0.0  ;;  %v4171_v26 = vmul.f32 %v5920_v53, %v7506_v57 }
 0xa24   : > { %4218 = vadd.xlane.f32.xlu1 %v4217_v12 }
 0xa25   : > { %v4193_v30 = vsel %vm613_vm0, %v4171_v26, 0.0 }
 0xa26   : > { %4194 = vadd.xlane.f32.xlu0 %v4193_v30 }
 0xa8c   : > { %v4198_v14 = vpop.xlane.xlu1 %4197 }
 0xa8e   : > { %v4174_v56 = vpop.xlane.xlu0 %4173 }
 0xa8f   : > { %v4228_v18 = vsub.f32 %v4198_v14, %v4174_v56  ;;  %v4220_v48 = vmul.f32 %v5920_v53, %v4174_v56 }
 0xa91   : > { %v4236_v35 = vmul.f32 %v4228_v18, %v5994_v19  ;;  %v4201_v41 = vpop.xlane.xlu1 %4200 }
 0xa93   : > { %v4244_v47 = vadd.f32 %v4236_v35, %v4220_v48  ;;  %v4177_v11 = vpop.xlane.xlu0 %4176 }
 0xa94   : > { %v4229_v4 = vsub.f32 %v4201_v41, %v4177_v11  ;;  %v4221_v54 = vmul.f32 %v5920_v53, %v4177_v11 }
 0xa95   : > { %v4252_v28 = vmul.f32 0.03125, %v4244_v47 }
 0xa96   : > { %v4237_v40 = vmul.f32 %v4229_v4, %v5994_v19 }
 0xa97   : > { %v4204_v55 = vpop.xlane.xlu1 %4203  ;;  %v7519_v45 = vsub.f32 %v7451_v62, %v4252_v28 }
 0xa98   : > { %v4245_v38 = vadd.f32 %v4237_v40, %v4221_v54 }
 0xa99   : > { %v4180_v42 = vpop.xlane.xlu0 %4179  ;;  %v4268_v33 = vmul.f32 %v7519_v45, %v7519_v45 }
 0xa9a   : > { %v4230_v31 = vsub.f32 %v4204_v55, %v4180_v42  ;;  %v4222_v44 = vmul.f32 %v5920_v53, %v4180_v42  ;;  %v4253_v10 = vmul.f32 0.03125, %v4245_v38 }
 0xa9b   : > { %v4308_v9 = vsel %vm613_vm0, %v4268_v33, 0.0  ;;  %v4276_v51 = vmul.f32 %v5920_v53, %v4268_v33  ;;  %v4207_v7 = vpop.xlane.xlu1 %4206 }
 0xa9c   : > { %v4238_v21 = vmul.f32 %v4230_v31, %v5994_v19  ;;  %4309 = vadd.xlane.f32.xlu1 %v4308_v9  ;;  %v7529_v49 = vsub.f32 %v7459_v58, %v4253_v10 }
 0xa9d   : > { %v4284_v62 = vsel %vm613_vm0, %v4276_v51, 0.0  ;;  %v4183_v29 = vpop.xlane.xlu0 %4182 }
 0xa9e   : > { %v4246_v24 = vadd.f32 %v4238_v21, %v4222_v44  ;;  %4285 = vadd.xlane.f32.xlu0 %v4284_v62  ;;  %v4231_v16 = vsub.f32 %v4207_v7, %v4183_v29  ;;  %v4269_v52 = vmul.f32 %v7529_v49, %v7529_v49  ;;  %v4223_v13 = vmul.f32 %v5920_v53, %v4183_v29 }
 0xaa0   : > { %v4254_v22 = vmul.f32 0.03125, %v4246_v24  ;;  %v4239_v20 = vmul.f32 %v4231_v16, %v5994_v19  ;;  %v4311_v15 = vsel %vm613_vm0, %v4269_v52, 0.0  ;;  %v4277_v36 = vmul.f32 %v5920_v53, %v4269_v52 }
 0xaa1   : > { %v4210_v58 = vpop.xlane.xlu1 %4209  ;;  %4312 = vadd.xlane.f32.xlu1 %v4311_v15 }
 0xaa2   : > { %v7538_v39 = vsub.f32 %v7466_v2, %v4254_v22  ;;  %v4247_v5 = vadd.f32 %v4239_v20, %v4223_v13  ;;  %v4287_v37 = vsel %vm613_vm0, %v4277_v36, 0.0 }
 0xaa3   : > { %v4186_v59 = vpop.xlane.xlu0 %4185  ;;  %4288 = vadd.xlane.f32.xlu0 %v4287_v37  ;;  %v4430_v37 = vld [vmem:[%s7709_s15 + $0x30] sm:$0xff] }
 0xaa4   : > { %v4270_v17 = vmul.f32 %v7538_v39, %v7538_v39  ;;  %v4255_v60 = vmul.f32 0.03125, %v4247_v5  ;;  %v4232_v1 = vsub.f32 %v4210_v58, %v4186_v59  ;;  %v4224_v2 = vmul.f32 %v5920_v53, %v4186_v59  ;;  %v4428_v59 = vld [vmem:[%s7709_s15 + $0x20] sm:$0xff] }
 0xaa5   : > { %v4213_v27 = vpop.xlane.xlu1 %4212 }
 0xaa6   : > { %v4314_v32 = vsel %vm613_vm0, %v4270_v17, 0.0  ;;  %v4278_v3 = vmul.f32 %v5920_v53, %v4270_v17  ;;  %v4240_v46 = vmul.f32 %v4232_v1, %v5994_v19  ;;  %v7548_v50 = vsub.f32 %v7475_v43, %v4255_v60  ;;  %v4429_v17 = vld [vmem:[%s7709_s15 + $0x28] sm:$0xff]  ;;  %v4427_v60 = vld [vmem:[%s7709_s15 + $0x18] sm:$0xff]  ;;  %v4426_v1 = vld [vmem:[%s7709_s15 + $0x10] sm:$0xff] }
 0xaa7   : > { %4315 = vadd.xlane.f32.xlu1 %v4314_v32  ;;  %v4189_v23 = vpop.xlane.xlu0 %4188  ;;  %v4425_v32 = vld [vmem:[%s7709_s15 + $0x8] sm:$0xff] }
 0xaa8   : > { %v4290_v6 = vsel %vm613_vm0, %v4278_v3, 0.0  ;;  %v4248_v0 = vadd.f32 %v4240_v46, %v4224_v2  ;;  %v4233_v8 = vsub.f32 %v4213_v27, %v4189_v23  ;;  %v4271_v63 = vmul.f32 %v7548_v50, %v7548_v50  ;;  %v4424_v27 = vld [vmem:[%s7709_s15] sm:$0xff] }
 0xaa9   : > { %4291 = vadd.xlane.f32.xlu0 %v4290_v6  ;;  %v4225_v12 = vmul.f32 %v5920_v53, %v4189_v23  ;;  %v4216_v26 = vpop.xlane.xlu1 %4215 }
 0xaaa   : > { %v4256_v30 = vmul.f32 0.03125, %v4248_v0  ;;  %v4241_v14 = vmul.f32 %v4233_v8, %v5994_v19  ;;  %v4317_v56 = vsel %vm613_vm0, %v4271_v63, 0.0  ;;  %v4279_v43 = vmul.f32 %v5920_v53, %v4271_v63 }
 0xaab   : > { %v4192_v18 = vpop.xlane.xlu0 %4191  ;;  %4318 = vadd.xlane.f32.xlu1 %v4317_v56 }
 0xaac   : > { %v4249_v48 = vadd.f32 %v4241_v14, %v4225_v12  ;;  %v4234_v35 = vsub.f32 %v4216_v26, %v4192_v18  ;;  %v4293_v41 = vsel %vm613_vm0, %v4279_v43, 0.0  ;;  %v7559_v47 = vsub.f32 %v7483_v61, %v4256_v30 }
 0xaad   : > { %4294 = vadd.xlane.f32.xlu0 %v4293_v41  ;;  %v4226_v28 = vmul.f32 %v5920_v53, %v4192_v18  ;;  %v4219_v55 = vpop.xlane.xlu1 %4218 }
 0xaae   : > { %v4257_v11 = vmul.f32 0.03125, %v4249_v48  ;;  %v4242_v4 = vmul.f32 %v4234_v35, %v5994_v19  ;;  %v4272_v40 = vmul.f32 %v7559_v47, %v7559_v47 }
 0xaaf   : > { %v4195_v54 = vpop.xlane.xlu0 %4194 }
 0xab0   : > { %v4250_v42 = vadd.f32 %v4242_v4, %v4226_v28  ;;  %v4235_v38 = vsub.f32 %v4219_v55, %v4195_v54  ;;  %v7566_v31 = vsub.f32 %v7490_v25, %v4257_v11  ;;  %v4320_v33 = vsel %vm613_vm0, %v4272_v40, 0.0 }
 0xab1   : > { %v4280_v61 = vmul.f32 %v5920_v53, %v4272_v40  ;;  %v4227_v10 = vmul.f32 %v5920_v53, %v4195_v54  ;;  %4321 = vadd.xlane.f32.xlu1 %v4320_v33 }
 0xab2   : > { %v4258_v44 = vmul.f32 0.03125, %v4250_v42  ;;  %v4243_v21 = vmul.f32 %v4235_v38, %v5994_v19  ;;  %v4273_v9 = vmul.f32 %v7566_v31, %v7566_v31 }
 0xab3   : > { %v4296_v51 = vsel %vm613_vm0, %v4280_v61, 0.0 }
 0xab4   : > { %v4251_v7 = vadd.f32 %v4243_v21, %v4227_v10  ;;  %4297 = vadd.xlane.f32.xlu0 %v4296_v51  ;;  %v4323_v25 = vsel %vm613_vm0, %v4273_v9, 0.0  ;;  %v4281_v24 = vmul.f32 %v5920_v53, %v4273_v9  ;;  %v7578_v62 = vsub.f32 %v7498_v34, %v4258_v44 }
 0xab5   : > { %4324 = vadd.xlane.f32.xlu1 %v4323_v25 }
 0xab6   : > { %v4259_v29 = vmul.f32 0.03125, %v4251_v7  ;;  %v4299_v22 = vsel %vm613_vm0, %v4281_v24, 0.0  ;;  %v4274_v16 = vmul.f32 %v7578_v62, %v7578_v62  ;;  %v7629_v24 = vld [vmem:[%s7707_s13] ss:$0 sm:$0xff] }
 0xab8   : > { %4300 = vadd.xlane.f32.xlu0 %v4299_v22  ;;  %v4326_v52 = vsel %vm613_vm0, %v4274_v16, 0.0  ;;  %v4282_v13 = vmul.f32 %v5920_v53, %v4274_v16  ;;  %v7586_v20 = vsub.f32 %v7506_v57, %v4259_v29  ;;  %v4431_v57 = vld [vmem:[%s7709_s15 + $0x38] sm:$0xff] }
 0xab9   : > { %4327 = vadd.xlane.f32.xlu1 %v4326_v52  ;;  %5302 = vmatprep.subr.mxu0 %v4431_v57 }
 0xaba   : > { %v4302_v15 = vsel %vm613_vm0, %v4282_v13, 0.0  ;;  %v4275_v34 = vmul.f32 %v7586_v20, %v7586_v20  ;;  %5303 = vmatpush3.msra.mxu0 %v4431_v57 }
 0xabb   : > { %5304 = vmatprep.subr.mxu0 %v4430_v37 }
 0xabc   : > { %4303 = vadd.xlane.f32.xlu0 %v4302_v15  ;;  %v4329_v36 = vsel %vm613_vm0, %v4275_v34, 0.0  ;;  %v4283_v58 = vmul.f32 %v5920_v53, %v4275_v34  ;;  %5305 = vmatpush3.msra.mxu0 %v4430_v37  ;;  %v7637_v15 = vld [vmem:[%s7708_s14] ss:$0 sm:$0xff] }
 0xabd   : > { %4330 = vadd.xlane.f32.xlu1 %v4329_v36  ;;  %5306 = vmatprep.subr.mxu0 %v4429_v17 }
 0xabe   : > { %v4305_v5 = vsel %vm613_vm0, %v4283_v58, 0.0  ;;  %5307 = vmatpush3.msra.mxu0 %v4429_v17 }
 0xabf   : > { %5308 = vmatprep.subr.mxu0 %v4428_v59 }
 0xac0   : > { %4306 = vadd.xlane.f32.xlu0 %v4305_v5  ;;  %5309 = vmatpush3.msra.mxu0 %v4428_v59 }
 0xac1   : > { %5310 = vmatprep.subr.mxu0 %v4427_v60 }
 0xac2   : > { %5311 = vmatpush3.msra.mxu0 %v4427_v60 }
 0xac3   : > { %5312 = vmatprep.subr.mxu0 %v4426_v1 }
 0xac4   : > { %5313 = vmatpush3.msra.mxu0 %v4426_v1 }
 0xac5   : > { %5314 = vmatprep.subr.mxu0 %v4425_v32 }
 0xac6   : > { %5315 = vmatpush3.msra.mxu0 %v4425_v32 }
 0xac7   : > { %5316 = vmatprep.subr.mxu0 %v4424_v27 }
 0xac8   : > { %5317 = vmatpush3.msra.mxu0 %v4424_v27 }
 0xb25   : > { %v4310_v3 = vpop.xlane.xlu1 %4309 }
 0xb27   : > { %v4286_v2 = vpop.xlane.xlu0 %4285 }
 0xb28   : > { %v4340_v46 = vsub.f32 %v4310_v3, %v4286_v2  ;;  %v4332_v23 = vmul.f32 %v5920_v53, %v4286_v2 }
 0xb2a   : > { %v4348_v6 = vmul.f32 %v4340_v46, %v5994_v19  ;;  %v4313_v0 = vpop.xlane.xlu1 %4312 }
 0xb2c   : > { %v4356_v8 = vadd.f32 %v4348_v6, %v4332_v23  ;;  %v4289_v63 = vpop.xlane.xlu0 %4288 }
 0xb2d   : > { %v4341_v26 = vsub.f32 %v4313_v0, %v4289_v63  ;;  %v4333_v14 = vmul.f32 %v5920_v53, %v4289_v63 }
 0xb2e   : > { %v4364_v12 = vmul.f32 0.03125, %v4356_v8 }
 0xb2f   : > { %v4349_v56 = vmul.f32 %v4341_v26, %v5994_v19 }
 0xb30   : > { %v4372_v30 = vadd.f32 1e-06, %v4364_v12  ;;  %v4316_v43 = vpop.xlane.xlu1 %4315 }
 0xb31   : > { %v4357_v18 = vadd.f32 %v4349_v56, %v4333_v14 }
 0xb32   : > { %5452 = vrsqrt.f32 %v4372_v30  ;;  %v4292_v48 = vpop.xlane.xlu0 %4291 }
 0xb33   : > { %v4342_v35 = vsub.f32 %v4316_v43, %v4292_v48  ;;  %v4365_v41 = vmul.f32 0.03125, %v4357_v18  ;;  %v4334_v11 = vmul.f32 %v5920_v53, %v4292_v48 }
 0xb34   : > { %v4319_v55 = vpop.xlane.xlu1 %4318 }
 0xb35   : > { %v4350_v28 = vmul.f32 %v4342_v35, %v5994_v19  ;;  %v4373_v4 = vadd.f32 1e-06, %v4365_v41 }
 0xb36   : > { %v4295_v40 = vpop.xlane.xlu0 %4294 }
 0xb37   : > { %v4358_v54 = vadd.f32 %v4350_v28, %v4334_v11  ;;  %5454 = vrsqrt.f32 %v4373_v4  ;;  %v4343_v42 = vsub.f32 %v4319_v55, %v4295_v40  ;;  %v4335_v33 = vmul.f32 %v5920_v53, %v4295_v40 }
 0xb39   : > { %v4366_v38 = vmul.f32 0.03125, %v4358_v54  ;;  %v4351_v61 = vmul.f32 %v4343_v42, %v5994_v19 }
 0xb3a   : > { %v4322_v21 = vpop.xlane.xlu1 %4321 }
 0xb3b   : > { %v4374_v44 = vadd.f32 1e-06, %v4366_v38  ;;  %v4359_v10 = vadd.f32 %v4351_v61, %v4335_v33 }
 0xb3d   : > { %5456 = vrsqrt.f32 %v4374_v44  ;;  %v4367_v9 = vmul.f32 0.03125, %v4359_v10  ;;  %v4298_v51 = vpop.xlane.xlu0 %4297 }
 0xb3e   : > { %v4344_v25 = vsub.f32 %v4322_v21, %v4298_v51  ;;  %v4325_v22 = vpop.xlane.xlu1 %4324  ;;  %v4336_v52 = vmul.f32 %v5920_v53, %v4298_v51 }
 0xb3f   : > { %v5453_v7 = vpop.eup %5452  ;;  %v4375_v29 = vadd.f32 1e-06, %v4367_v9 }
 0xb40   : > { %v4388_v16 = vmul.f32 %v5453_v7, %v7519_v45  ;;  %v4352_v13 = vmul.f32 %v4344_v25, %v5994_v19 }
 0xb41   : > { %5458 = vrsqrt.f32 %v4375_v29  ;;  %v4301_v34 = vpop.xlane.xlu0 %4300 }
 0xb42   : > { %v4402_v36 = vmul.f32 %v7629_v24, %v4388_v16  ;;  %v4360_v58 = vadd.f32 %v4352_v13, %v4336_v52  ;;  %v4345_v5 = vsub.f32 %v4325_v22, %v4301_v34  ;;  %v4328_v57 = vpop.xlane.xlu1 %4327  ;;  %v4337_v59 = vmul.f32 %v5920_v53, %v4301_v34 }
 0xb44   : > { %v4416_v37 = vadd.f32 %v7637_v15, %v4402_v36  ;;  %v5455_v17 = vpop.eup %5454  ;;  %v4368_v45 = vmul.f32 0.03125, %v4360_v58  ;;  %v4353_v60 = vmul.f32 %v4345_v5, %v5994_v19 }
 0xb45   : > { %v4389_v1 = vmul.f32 %v5455_v17, %v7529_v49  ;;  %v4304_v32 = vpop.xlane.xlu0 %4303 }
 0xb46   : > { %5318 = vmatprep.mubr.msk.f32.mxu0 %vm613_vm0, %v4416_v37  ;;  %v4376_v27 = vadd.f32 1e-06, %v4368_v45  ;;  %v4361_v3 = vadd.f32 %v4353_v60, %v4337_v59  ;;  %v4346_v2 = vsub.f32 %v4328_v57, %v4304_v32  ;;  %v4338_v6 = vmul.f32 %v5920_v53, %v4304_v32  ;;  %v4331_v63 = vpop.xlane.xlu1 %4330 }
 0xb47   : > { %v4403_v46 = vmul.f32 %v7629_v24, %v4389_v1 }
 0xb48   : > { %5460 = vrsqrt.f32 %v4376_v27  ;;  %v4369_v23 = vmul.f32 0.03125, %v4361_v3  ;;  %v4354_v0 = vmul.f32 %v4346_v2, %v5994_v19 }
 0xb49   : > { %v4307_v12 = vpop.xlane.xlu0 %4306  ;;  %v4417_v26 = vadd.f32 %v7637_v15, %v4403_v46 }
 0xb4a   : > { %v5457_v8 = vpop.eup %5456  ;;  %v4377_v49 = vadd.f32 1e-06, %v4369_v23  ;;  %v4362_v30 = vadd.f32 %v4354_v0, %v4338_v6  ;;  %v4347_v14 = vsub.f32 %v4331_v63, %v4307_v12  ;;  %v4339_v18 = vmul.f32 %v5920_v53, %v4307_v12 }
 0xb4b   : > { %5319 = vmatmul.mubr.msk.f32.vlgmr.msra.gmra.mxu0 %vm613_vm0, %v4417_v26  ;;  %v4390_v56 = vmul.f32 %v5457_v8, %v7538_v39 }
 0xb4c   : > { %5462 = vrsqrt.f32 %v4377_v49  ;;  %v4370_v43 = vmul.f32 0.03125, %v4362_v30  ;;  %v4355_v48 = vmul.f32 %v4347_v14, %v5994_v19 }
 0xb4d   : > { %v4404_v35 = vmul.f32 %v7629_v24, %v4390_v56 }
 0xb4e   : > { %v5459_v41 = vpop.eup %5458  ;;  %v4378_v11 = vadd.f32 1e-06, %v4370_v43  ;;  %v4363_v28 = vadd.f32 %v4355_v48, %v4339_v18 }
 0xb4f   : > { %v4418_v4 = vadd.f32 %v7637_v15, %v4404_v35  ;;  %v4391_v55 = vmul.f32 %v5459_v41, %v7548_v50 }
 0xb50   : > { %5464 = vrsqrt.f32 %v4378_v11  ;;  %v4371_v54 = vmul.f32 0.03125, %v4363_v28 }
 0xb51   : > { %5321 = vmatprep.mubr.msk.f32.mxu0 %vm613_vm0, %v4418_v4  ;;  %v4405_v39 = vmul.f32 %v7629_v24, %v4391_v55 }
 0xb52   : > { %v4379_v40 = vadd.f32 1e-06, %v4371_v54 }
 0xb53   : > { %v4419_v53 = vadd.f32 %v7637_v15, %v4405_v39 }
 0xb54   : > { %5466 = vrsqrt.f32 %v4379_v40 }
 0xb55   : > { %v5461_v19 = vpop.eup %5460  ;;  %5322 = vmatmul.mubr.msk.f32.gmra.mxu0 %vm613_vm0, %v4419_v53 }
 0xb56   : > { %v4392_v42 = vmul.f32 %v5461_v19, %v7559_v47 }
 0xb58   : > { %v4406_v38 = vmul.f32 %v7629_v24, %v4392_v42 }
 0xb59   : > { %v5463_v33 = vpop.eup %5462 }
 0xb5a   : > { %v4420_v50 = vadd.f32 %v7637_v15, %v4406_v38  ;;  %v4393_v61 = vmul.f32 %v5463_v33, %v7566_v31 }
 0xb5c   : > { %5324 = vmatprep.mubr.msk.f32.mxu0 %vm613_vm0, %v4420_v50  ;;  %v4407_v44 = vmul.f32 %v7629_v24, %v4393_v61 }
 0xb5d   : > { %v5465_v10 = vpop.eup %5464 }
 0xb5e   : > { %v4421_v21 = vadd.f32 %v7637_v15, %v4407_v44  ;;  %v4394_v9 = vmul.f32 %v5465_v10, %v7578_v62  ;;  %v4878_v62 = vld [vmem:[%s7710_s16] ss:$0 sm:$0xff] }
 0xb60   : > { %5325 = vmatmul.mubr.msk.f32.gmra.mxu0 %vm613_vm0, %v4421_v21  ;;  %v4408_v47 = vmul.f32 %v7629_v24, %v4394_v9 }
 0xb61   : > { %v5467_v51 = vpop.eup %5466 }
 0xb62   : > { %v4422_v7 = vadd.f32 %v7637_v15, %v4408_v47  ;;  %v4395_v25 = vmul.f32 %v5467_v51, %v7586_v20 }
 0xb64   : > { %5327 = vmatprep.mubr.msk.f32.mxu0 %vm613_vm0, %v4422_v7  ;;  %v4409_v31 = vmul.f32 %v7629_v24, %v4395_v25 }
 0xb66   : > { %v4423_v29 = vadd.f32 %v7637_v15, %v4409_v31 }
 0xb68   : > { %5328 = vmatmul.mubr.msk.f32.gmra.mxu0 %vm613_vm0, %v4423_v29 }
 0xc0b   : > { %v5320_v22 = vpop.f32.mrf.mxu0 }
 0xc0c   : > { %v4535_v20 = vadd.f32 %v5320_v22, %v4878_v62 }
 0xc0d   : > { %v4529_v16 = vpop.f32.mrf.mxu0 }
 0xc0e   : > { %4570 = vst.msk [vmem:[%s575_s29 + $0x8] sm:$0xff] %vm4568_vm2, %v4535_v20  ;;  %v4530_v24 = vadd.f32 %v4878_v62, %v4529_v16 }
 0xc10   : > { %4569 = vst.msk [vmem:[%s575_s29] sm:$0xff] %vm4568_vm2, %v4530_v24 }
 0xc15   : > { %v5323_v52 = vpop.f32.mrf.mxu0 }
 0xc16   : > { %v4545_v13 = vadd.f32 %v5323_v52, %v4878_v62 }
 0xc17   : > { %v4539_v15 = vpop.f32.mrf.mxu0 }
 0xc18   : > { %4572 = vst.msk [vmem:[%s575_s29 + $0x18] sm:$0xff] %vm4568_vm2, %v4545_v13  ;;  %v4540_v34 = vadd.f32 %v4878_v62, %v4539_v15 }
 0xc1a   : > { %4571 = vst.msk [vmem:[%s575_s29 + $0x10] sm:$0xff] %vm4568_vm2, %v4540_v34 }
 0xc20   : > { %v5326_v36 = vpop.f32.mrf.mxu0 }
 0xc21   : > { %v4555_v58 = vadd.f32 %v5326_v36, %v4878_v62 }
 0xc22   : > { %v4549_v5 = vpop.f32.mrf.mxu0 }
 0xc23   : > { %4574 = vst.msk [vmem:[%s575_s29 + $0x28] sm:$0xff] %vm4568_vm2, %v4555_v58  ;;  %v4550_v57 = vadd.f32 %v4878_v62, %v4549_v5 }
 0xc25   : > { %4573 = vst.msk [vmem:[%s575_s29 + $0x20] sm:$0xff] %vm4568_vm2, %v4550_v57 }
 0xc28   : > { %v5329_v37 = vpop.f32.mrf.mxu0 }
 0xc29   : > { %v4565_v17 = vadd.f32 %v5329_v37, %v4878_v62 }
 0xc2a   : > { %v4559_v45 = vpop.f32.mrf.mxu0 }
 0xc2b   : > { %4576 = vst.msk [vmem:[%s575_s29 + $0x38] sm:$0xff] %vm4568_vm2, %v4565_v17  ;;  %v4560_v59 = vadd.f32 %v4878_v62, %v4559_v45 }
 0xc2d   : > { %4575 = vst.msk [vmem:[%s575_s29 + $0x30] sm:$0xff] %vm4568_vm2, %v4560_v59 }
 0xc2e PF: > { %s28_s27 = sadd.s32 1, %s5482_s27  }
 0xc2f   : > { %p25_p4 = scmp.ge.s32.totalorder %s28_s27, 4  }
 0xc31   :  { %27 = sbr.rel (!%p25_p4) target bundleno = 4 (0x4), region = 148 }

</bundles_post_ra>
